<compile_context>
chip_gen: v7x
topology: tpu7x:2x2x1
jax: 0.10.0
libtpu: 0.0.40
codegen_flags: <defaults>
</compile_context>

<pallas_src>
import jax
import jax.numpy as jnp
from jax import lax
from jax.experimental import pallas as pl
from jax.experimental.pallas import tpu as pltpu

# ----------------------- model hyperparameters (EdgeClassifier defaults) -------
NODE_INDIM = 6
EDGE_INDIM = 4
L_GNN = 4            # number of interaction-network layers
NODE_LATENT = 8
EDGE_LATENT = 12
R_HIDDEN = 32        # relational (edge) MLP hidden size
O_HIDDEN = 32        # object (node) MLP hidden size
ENC_HIDDEN = 64      # encoder MLP hidden size
W_HIDDEN = 32        # final edge-weight MLP hidden size
ENC_L = 1            # encoder MLP depth
IN_MLP_L = 3         # depth of MLPs inside the interaction network
W_L = 2              # depth of final edge-weight MLP

PACK_COLS = 128      # full-lane packing (max fan_out is 64)

# ----------------------- static packed-parameter layout ------------------------
# Canonical order of the 39 linears:
#   [node_enc (2), edge_enc (2),
#    layer0: rel (4), obj (4), ..., layer3: rel (4), obj (4),
#    final W (3)]
_LIN_SIZES = []
_LIN_SIZES += [(NODE_INDIM, ENC_HIDDEN)] + [(ENC_HIDDEN, ENC_HIDDEN)] * (ENC_L - 1) + [(ENC_HIDDEN, NODE_LATENT)]
_LIN_SIZES += [(EDGE_INDIM, ENC_HIDDEN)] + [(ENC_HIDDEN, ENC_HIDDEN)] * (ENC_L - 1) + [(ENC_HIDDEN, EDGE_LATENT)]
_REL_SIZES = ([(2 * NODE_LATENT + EDGE_LATENT, R_HIDDEN)]
              + [(R_HIDDEN, R_HIDDEN)] * (IN_MLP_L - 1)
              + [(R_HIDDEN, EDGE_LATENT)])
_OBJ_SIZES = ([(NODE_LATENT + EDGE_LATENT, O_HIDDEN)]
              + [(O_HIDDEN, O_HIDDEN)] * (IN_MLP_L - 1)
              + [(O_HIDDEN, NODE_LATENT)])
for _ in range(L_GNN):
    _LIN_SIZES += _REL_SIZES + _OBJ_SIZES
_LIN_SIZES += ([(EDGE_LATENT, W_HIDDEN)]
               + [(W_HIDDEN, W_HIDDEN)] * (W_L - 1)
               + [(W_HIDDEN, 1)])

_N_ENC_LIN = ENC_L + 1
_N_IN_LIN = 2 * (IN_MLP_L + 1)          # linears per GNN layer (rel + obj)
_NODE_ENC_LIN = 0
_EDGE_ENC_LIN = _N_ENC_LIN
def _rel_lin(layer): return 2 * _N_ENC_LIN + layer * _N_IN_LIN
def _obj_lin(layer): return 2 * _N_ENC_LIN + layer * _N_IN_LIN + (IN_MLP_L + 1)
_W_LIN = 2 * _N_ENC_LIN + L_GNN * _N_IN_LIN


def _build_layout(sizes):
    """Per-linear block: row `off` holds the bias (cols 0:fan_out, 8-aligned),
    rows [off+8, off+8+fan_in) hold the weight (also 8-aligned).
    Returns [(row_offset, fan_in, fan_out), ...], total_rows (multiple of 8)."""
    layout, off = [], 0
    for fi, fo in sizes:
        layout.append((off, fi, fo))
        off += 8 + (-(fi // -8)) * 8          # 8 bias rows + fan_in rounded up to 8
    return layout, off


_LIN_LAYOUT, _MAIN_ROWS = _build_layout(_LIN_SIZES)
# Column-stored copies of the final edge-weight-MLP biases (for the transposed
# epilogue): rows [_WBIAS_COL_OFF, _WBIAS_COL_OFF + fan_out), column = layer idx.
_WBIAS_COL_OFF = _MAIN_ROWS
_PACK_ROWS = _WBIAS_COL_OFF + (-(W_HIDDEN // -8)) * 8


# -------------------------------- kernel --------------------------------------
def edge_classifier_kernel(x_ref, ea_ref, sel_ref, p_ref, out_ref):
    n_edges = out_ref.shape[1]
    nl = NODE_LATENT

    def linear(h, lin_idx, relu):
        """Apply linear `lin_idx` from the packed buffer (loaded at the use site)."""
        off, fi, fo = _LIN_LAYOUT[lin_idx]
        b = p_ref[off:off + 1, 0:fo]
        w = p_ref[off + 8:off + 8 + fi, 0:fo]
        y = jnp.dot(h, w, preferred_element_type=jnp.float32) + b
        return jnp.maximum(y, 0.0) if relu else y

    def mlp(h, first_lin, n_lin):
        for i in range(n_lin):
            h = linear(h, first_lin + i, relu=(i < n_lin - 1))
        return h

    # --- encoders (activations stay f32 for all generations) ---
    node = mlp(x_ref[...], _NODE_ENC_LIN, _N_ENC_LIN)     # (N, NODE_LATENT) f32
    edge = mlp(ea_ref[...], _EDGE_ENC_LIN, _N_ENC_LIN)    # (E, EDGE_LATENT) f32

    # --- interaction-network layers ---
    for layer in range(L_GNN):
        rel0 = _rel_lin(layer)
        obj0 = _obj_lin(layer)

        # ---- gather + first relational linear, fused via per-node pre-projection.
        # gather(node) @ W_xi == gather(node @ W_xi): widens the E*N contraction's
        # output lanes from 8 to 32 (free on the MXU) and removes two per-edge
        # (E,8)@(8,32) matmuls per layer.
        off_r, fi_r, fo_r = _LIN_LAYOUT[rel0]              # fi_r = 2*nl + el
        b_r  = p_ref[off_r:off_r + 1, 0:fo_r]
        w_xi = p_ref[off_r + 8:off_r + 8 + nl, 0:fo_r]
        w_xj = p_ref[off_r + 8 + nl:off_r + 8 + 2 * nl, 0:fo_r]
        w_e  = p_ref[off_r + 8 + 2 * nl:off_r + 8 + fi_r, 0:fo_r]

        xi_p = jnp.dot(node, w_xi, preferred_element_type=jnp.float32).astype(jnp.bfloat16)  # (N, 32)
        xj_p = jnp.dot(node, w_xj, preferred_element_type=jnp.float32).astype(jnp.bfloat16)  # (N, 32)

        # bf16 selector slices straight off the input ref (never upcast); bf16 MXU
        # with f32 accumulation.
        h = (jnp.dot(sel_ref[0:n_edges, :], xi_p, preferred_element_type=jnp.float32)
             + jnp.dot(sel_ref[n_edges:2 * n_edges, :], xj_p, preferred_element_type=jnp.float32)
             + jnp.dot(edge, w_e, preferred_element_type=jnp.float32)
             + b_r)
        h = jnp.maximum(h, 0.0)
        edge = mlp(h, rel0 + 1, IN_MLP_L)                  # (E, EDGE_LATENT)

        # ---- scatter-add + first object linear, fused by pre-applying the aggr
        # block of the obj first weight to the per-edge messages (linearity), so
        # the E*N scatter contraction directly produces (N, 32).
        off_o, fi_o, fo_o = _LIN_LAYOUT[obj0]              # fi_o = nl + el
        b_o  = p_ref[off_o:off_o + 1, 0:fo_o]
        w_on = p_ref[off_o + 8:off_o + 8 + nl, 0:fo_o]
        w_oa = p_ref[off_o + 8 + nl:off_o + 8 + fi_o, 0:fo_o]

        edge_msg = jnp.dot(edge, w_oa, preferred_element_type=jnp.float32).astype(jnp.bfloat16)  # (E, 32)
        # Contract the E axis with the bf16 target one-hot as the dim-0-contracted
        # operand (same dimension-numbers pattern as flash-attention dK/dV).
        # TODO(synk): verify in the lowered MLIR that no transposed copy of the
        # (E, N) selector is materialized; if it is, swap operands and transpose
        # the small (32, N) result instead.
        aggr = lax.dot_general(sel_ref[0:n_edges, :], edge_msg,
                               (((0,), (0,)), ((), ())),
                               preferred_element_type=jnp.float32)            # (N, 32)

        h = jnp.dot(node, w_on, preferred_element_type=jnp.float32) + aggr + b_o
        h = jnp.maximum(h, 0.0)
        node = mlp(h, obj0 + 1, IN_MLP_L)                  # (N, NODE_LATENT)

    # --- final edge-weight MLP, computed transposed so the sigmoid output is a
    # lane-dense (1, E) store; biases come from the column-packed copies so they
    # are plain VPU broadcast adds (no K=1 bias matmuls). ---
    h_t = edge.T                                           # (EDGE_LATENT, E)
    for i in range(W_L + 1):
        off, fi, fo = _LIN_LAYOUT[_W_LIN + i]
        w = p_ref[off + 8:off + 8 + fi, 0:fo]              # (fi, fo)
        b_col = p_ref[_WBIAS_COL_OFF:_WBIAS_COL_OFF + fo, i:i + 1]   # (fo, 1)
        h_t = lax.dot_general(w, h_t, (((0,), (0,)), ((), ())),
                              preferred_element_type=jnp.float32) + b_col     # (fo, E)
        if i < W_L:
            h_t = jnp.maximum(h_t, 0.0)

    # numerically-stable sigmoid: EUP exp + approx reciprocal (EUP slot)
    z = h_t                                                # (1, E) logits
    ez = jnp.exp(-jnp.abs(z))
    inv = pl.reciprocal(1.0 + ez, approx=True)
    out_ref[...] = jnp.where(z >= 0, inv, ez * inv)


# ------------------------------ wrapper ----------------------------------------
def _vmem_limit_bytes():
    """Generation-aware VMEM budget: leave headroom below physical capacity."""
    try:
        kind = jax.devices()[0].device_kind.lower()
    except Exception:
        kind = ""
    if "v7" in kind:
        return 48 * 1024 * 1024       # 64 MiB physical on v7x
    return 100 * 1024 * 1024          # 128 MiB physical on v5e/v6e (and v4/v5p)


def edge_classifier_forward(packed_params, x, edge_attr, edge_index):
    n_nodes = x.shape[0]
    n_edges = edge_attr.shape[0]
    # Stacked selector matrix in bf16 (exact for 0/1): rows [0:E) target, [E:2E) source.
    sel = jnp.concatenate(
        [jax.nn.one_hot(edge_index[1], n_nodes, dtype=jnp.bfloat16),
         jax.nn.one_hot(edge_index[0], n_nodes, dtype=jnp.bfloat16)], axis=0)

    out = pl.pallas_call(
        edge_classifier_kernel,
        out_shape=jax.ShapeDtypeStruct((1, n_edges), jnp.float32),
        in_specs=[pl.BlockSpec(memory_space=pltpu.MemorySpace.VMEM)] * 4,
        out_specs=pl.BlockSpec(memory_space=pltpu.MemorySpace.VMEM),
        compiler_params=pltpu.CompilerParams(vmem_limit_bytes=_vmem_limit_bytes()),
    )(x, edge_attr, sel, packed_params)
    return out.reshape(n_edges, 1)      # module semantics: (E, 1) edge weights


# ----------------------------- parameter handling -------------------------------
def init_params(key):
    """Flat list [W0, b0, W1, b1, ...] in the canonical linear order."""
    keys = jax.random.split(key, len(_LIN_SIZES))
    flat = []
    for k, (fi, fo) in zip(keys, _LIN_SIZES):
        kw, kb = jax.random.split(k)
        bound = float(fi) ** -0.5
        flat.append(jax.random.uniform(kw, (fi, fo), jnp.float32, -bound, bound))
        flat.append(jax.random.uniform(kb, (1, fo), jnp.float32, -bound, bound))
    return flat


def pack_params(params_flat):
    """Pack all linears into one (rows, PACK_COLS) f32 buffer.
    Bias on the 8-aligned first row of each block, weights from row off+8;
    final edge-weight-MLP biases also stored column-wise for the transposed epilogue."""
    buf = jnp.zeros((_PACK_ROWS, PACK_COLS), jnp.float32)
    for idx, (off, fi, fo) in enumerate(_LIN_LAYOUT):
        w = params_flat[2 * idx].reshape(fi, fo)
        b = params_flat[2 * idx + 1].reshape(fo)
        buf = buf.at[off, 0:fo].set(b)
        buf = buf.at[off + 8:off + 8 + fi, 0:fo].set(w)
    for i in range(W_L + 1):
        _, _, fo = _LIN_LAYOUT[_W_LIN + i]
        b = params_flat[2 * (_W_LIN + i) + 1].reshape(fo)
        buf = buf.at[_WBIAS_COL_OFF:_WBIAS_COL_OFF + fo, i].set(b)
    return buf


# ----------------------------- pure-JAX reference -------------------------------
def reference_forward(params_flat, x, edge_attr, edge_index):
    def take(start, n):
        return [(params_flat[2 * i], params_flat[2 * i + 1]) for i in range(start, start + n)]

    def mlp(h, layers):
        for k, (w, b) in enumerate(layers):
            h = h @ w + b
            if k < len(layers) - 1:
                h = jax.nn.relu(h)
        return h

    node = mlp(x, take(_NODE_ENC_LIN, _N_ENC_LIN))
    edge = mlp(edge_attr, take(_EDGE_ENC_LIN, _N_ENC_LIN))
    n_nodes = x.shape[0]
    src, tgt = edge_index[0], edge_index[1]
    for layer in range(L_GNN):
        x_j = node[src]
        x_i = node[tgt]
        m = jnp.concatenate([x_i, x_j, edge], axis=1)
        edge = mlp(m, take(_rel_lin(layer), IN_MLP_L + 1))
        aggr = jax.ops.segment_sum(edge, tgt, num_segments=n_nodes)
        node = mlp(jnp.concatenate([node, aggr], axis=1), take(_obj_lin(layer), IN_MLP_L + 1))
    return jax.nn.sigmoid(mlp(edge, take(_W_LIN, W_L + 1)))


# ------------------------------------ main --------------------------------------
if __name__ == "__main__":
    key = jax.random.PRNGKey(0)
    k_param, k_x, k_ea, k_src, k_tgt = jax.random.split(key, 5)

    N, E = 64, 128
    x = jax.random.normal(k_x, (N, NODE_INDIM), jnp.float32)
    edge_attr = jax.random.normal(k_ea, (E, EDGE_INDIM), jnp.float32)
    edge_index = jnp.stack([
        jax.random.randint(k_src, (E,), 0, N, dtype=jnp.int32),
        jax.random.randint(k_tgt, (E,), 0, N, dtype=jnp.int32),
    ])

    params = init_params(k_param)
    packed = pack_params(params)

    out = jax.jit(edge_classifier_forward)(packed, x, edge_attr, edge_index)
    out = jax.block_until_ready(out)

    ref = reference_forward(params, x, edge_attr, edge_index)
    assert out.shape == (E, 1)
    assert bool(jnp.isfinite(out).all())
    # bf16 is used only on the big E*N gather/scatter operands (selector is exact
    # 0/1); 3e-2 leaves margin for 4 GNN layers of bf16 rounding + approx recip.
    assert bool(jnp.allclose(out, ref, atol=3e-2, rtol=3e-2))
    print("KERNEL_OK")
</pallas_src>

<mosaic_0001>
module attributes {stable_mosaic.version = 11 : i64} {
  func.func @edge_classifier_kernel(%arg0: memref<64x6xf32, #tpu.memory_space<vmem>>, %arg1: memref<128x4xf32, #tpu.memory_space<vmem>>, %arg2: memref<256x64xbf16, #tpu.memory_space<vmem>>, %arg3: memref<1560x128xf32, #tpu.memory_space<vmem>>, %arg4: memref<1x128xf32, #tpu.memory_space<vmem>>) attributes {dimension_semantics = [], scalar_prefetch = 0 : i64, scratch_operands = 0 : i64, tpu.core_type = #tpu.core_type<tc>} {
    %c0 = arith.constant 0 : index
    %c0_0 = arith.constant 0 : index
    %0 = vector.load %arg0[%c0, %c0_0] : memref<64x6xf32, #tpu.memory_space<vmem>>, vector<64x6xf32>
    %c0_1 = arith.constant 0 : index
    %c0_2 = arith.constant 0 : index
    %1 = vector.load %arg3[%c0_1, %c0_2] : memref<1560x128xf32, #tpu.memory_space<vmem>>, vector<1x64xf32>
    %c8 = arith.constant 8 : index
    %c0_3 = arith.constant 0 : index
    %2 = vector.load %arg3[%c8, %c0_3] : memref<1560x128xf32, #tpu.memory_space<vmem>>, vector<6x64xf32>
    %cst = arith.constant dense<0.000000e+00> : vector<64x64xf32>
    %3 = tpu.matmul %0, %2, %cst {dimension_numbers = #tpu.dot_dimension_numbers<[1], [0], [0], [1], [0, 0, 1, 1], [], []>} : vector<64x6xf32>, vector<6x64xf32>, vector<64x64xf32> -> vector<64x64xf32>
    %4 = vector.broadcast %1 : vector<1x64xf32> to vector<64x64xf32>
    %5 = arith.addf %3, %4 : vector<64x64xf32>
    %cst_4 = arith.constant 0.000000e+00 : f32
    %6 = vector.broadcast %cst_4 : f32 to vector<64x64xf32>
    %7 = arith.maximumf %5, %6 : vector<64x64xf32>
    %c16 = arith.constant 16 : index
    %c0_5 = arith.constant 0 : index
    %8 = vector.load %arg3[%c16, %c0_5] : memref<1560x128xf32, #tpu.memory_space<vmem>>, vector<1x8xf32>
    %c24 = arith.constant 24 : index
    %c0_6 = arith.constant 0 : index
    %9 = vector.load %arg3[%c24, %c0_6] : memref<1560x128xf32, #tpu.memory_space<vmem>>, vector<64x8xf32>
    %cst_7 = arith.constant dense<0.000000e+00> : vector<64x8xf32>
    %10 = tpu.matmul %7, %9, %cst_7 {dimension_numbers = #tpu.dot_dimension_numbers<[1], [0], [0], [1], [0, 0, 1, 1], [], []>} : vector<64x64xf32>, vector<64x8xf32>, vector<64x8xf32> -> vector<64x8xf32>
    %11 = vector.broadcast %8 : vector<1x8xf32> to vector<64x8xf32>
    %12 = arith.addf %10, %11 : vector<64x8xf32>
    %c0_8 = arith.constant 0 : index
    %c0_9 = arith.constant 0 : index
    %13 = vector.load %arg1[%c0_8, %c0_9] : memref<128x4xf32, #tpu.memory_space<vmem>>, vector<128x4xf32>
    %c88 = arith.constant 88 : index
    %c0_10 = arith.constant 0 : index
    %14 = vector.load %arg3[%c88, %c0_10] : memref<1560x128xf32, #tpu.memory_space<vmem>>, vector<1x64xf32>
    %c96 = arith.constant 96 : index
    %c0_11 = arith.constant 0 : index
    %15 = vector.load %arg3[%c96, %c0_11] : memref<1560x128xf32, #tpu.memory_space<vmem>>, vector<4x64xf32>
    %cst_12 = arith.constant dense<0.000000e+00> : vector<128x64xf32>
    %16 = tpu.matmul %13, %15, %cst_12 {dimension_numbers = #tpu.dot_dimension_numbers<[1], [0], [0], [1], [0, 0, 1, 1], [], []>} : vector<128x4xf32>, vector<4x64xf32>, vector<128x64xf32> -> vector<128x64xf32>
    %17 = vector.broadcast %14 : vector<1x64xf32> to vector<128x64xf32>
    %18 = arith.addf %16, %17 : vector<128x64xf32>
    %cst_13 = arith.constant 0.000000e+00 : f32
    %19 = vector.broadcast %cst_13 : f32 to vector<128x64xf32>
    %20 = arith.maximumf %18, %19 : vector<128x64xf32>
    %c104 = arith.constant 104 : index
    %c0_14 = arith.constant 0 : index
    %21 = vector.load %arg3[%c104, %c0_14] : memref<1560x128xf32, #tpu.memory_space<vmem>>, vector<1x12xf32>
    %c112 = arith.constant 112 : index
    %c0_15 = arith.constant 0 : index
    %22 = vector.load %arg3[%c112, %c0_15] : memref<1560x128xf32, #tpu.memory_space<vmem>>, vector<64x12xf32>
    %cst_16 = arith.constant dense<0.000000e+00> : vector<128x12xf32>
    %23 = tpu.matmul %20, %22, %cst_16 {dimension_numbers = #tpu.dot_dimension_numbers<[1], [0], [0], [1], [0, 0, 1, 1], [], []>} : vector<128x64xf32>, vector<64x12xf32>, vector<128x12xf32> -> vector<128x12xf32>
    %24 = vector.broadcast %21 : vector<1x12xf32> to vector<128x12xf32>
    %25 = arith.addf %23, %24 : vector<128x12xf32>
    %c176 = arith.constant 176 : index
    %c0_17 = arith.constant 0 : index
    %26 = vector.load %arg3[%c176, %c0_17] : memref<1560x128xf32, #tpu.memory_space<vmem>>, vector<1x32xf32>
    %c184 = arith.constant 184 : index
    %c0_18 = arith.constant 0 : index
    %27 = vector.load %arg3[%c184, %c0_18] : memref<1560x128xf32, #tpu.memory_space<vmem>>, vector<8x32xf32>
    %c192 = arith.constant 192 : index
    %c0_19 = arith.constant 0 : index
    %28 = vector.load %arg3[%c192, %c0_19] : memref<1560x128xf32, #tpu.memory_space<vmem>>, vector<8x32xf32>
    %c200 = arith.constant 200 : index
    %c0_20 = arith.constant 0 : index
    %29 = vector.load %arg3[%c200, %c0_20] : memref<1560x128xf32, #tpu.memory_space<vmem>>, vector<12x32xf32>
    %cst_21 = arith.constant dense<0.000000e+00> : vector<64x32xf32>
    %30 = tpu.matmul %12, %27, %cst_21 {dimension_numbers = #tpu.dot_dimension_numbers<[1], [0], [0], [1], [0, 0, 1, 1], [], []>} : vector<64x8xf32>, vector<8x32xf32>, vector<64x32xf32> -> vector<64x32xf32>
    %31 = arith.truncf %30 : vector<64x32xf32> to vector<64x32xbf16>
    %cst_22 = arith.constant dense<0.000000e+00> : vector<64x32xf32>
    %32 = tpu.matmul %12, %28, %cst_22 {dimension_numbers = #tpu.dot_dimension_numbers<[1], [0], [0], [1], [0, 0, 1, 1], [], []>} : vector<64x8xf32>, vector<8x32xf32>, vector<64x32xf32> -> vector<64x32xf32>
    %33 = arith.truncf %32 : vector<64x32xf32> to vector<64x32xbf16>
    %c0_23 = arith.constant 0 : index
    %c0_24 = arith.constant 0 : index
    %34 = vector.load %arg2[%c0_23, %c0_24] : memref<256x64xbf16, #tpu.memory_space<vmem>>, vector<128x64xbf16>
    %cst_25 = arith.constant dense<0.000000e+00> : vector<128x32xf32>
    %35 = tpu.matmul %34, %31, %cst_25 {dimension_numbers = #tpu.dot_dimension_numbers<[1], [0], [0], [1], [0, 0, 1, 1], [], []>} : vector<128x64xbf16>, vector<64x32xbf16>, vector<128x32xf32> -> vector<128x32xf32>
    %c128 = arith.constant 128 : index
    %c0_26 = arith.constant 0 : index
    %36 = vector.load %arg2[%c128, %c0_26] : memref<256x64xbf16, #tpu.memory_space<vmem>>, vector<128x64xbf16>
    %cst_27 = arith.constant dense<0.000000e+00> : vector<128x32xf32>
    %37 = tpu.matmul %36, %33, %cst_27 {dimension_numbers = #tpu.dot_dimension_numbers<[1], [0], [0], [1], [0, 0, 1, 1], [], []>} : vector<128x64xbf16>, vector<64x32xbf16>, vector<128x32xf32> -> vector<128x32xf32>
    %38 = arith.addf %35, %37 : vector<128x32xf32>
    %cst_28 = arith.constant dense<0.000000e+00> : vector<128x32xf32>
    %39 = tpu.matmul %25, %29, %cst_28 {dimension_numbers = #tpu.dot_dimension_numbers<[1], [0], [0], [1], [0, 0, 1, 1], [], []>} : vector<128x12xf32>, vector<12x32xf32>, vector<128x32xf32> -> vector<128x32xf32>
    %40 = arith.addf %38, %39 : vector<128x32xf32>
    %41 = vector.broadcast %26 : vector<1x32xf32> to vector<128x32xf32>
    %42 = arith.addf %40, %41 : vector<128x32xf32>
    %cst_29 = arith.constant 0.000000e+00 : f32
    %43 = vector.broadcast %cst_29 : f32 to vector<128x32xf32>
    %44 = arith.maximumf %42, %43 : vector<128x32xf32>
    %c216 = arith.constant 216 : index
    %c0_30 = arith.constant 0 : index
    %45 = vector.load %arg3[%c216, %c0_30] : memref<1560x128xf32, #tpu.memory_space<vmem>>, vector<1x32xf32>
    %c224 = arith.constant 224 : index
    %c0_31 = arith.constant 0 : index
    %46 = vector.load %arg3[%c224, %c0_31] : memref<1560x128xf32, #tpu.memory_space<vmem>>, vector<32x32xf32>
    %cst_32 = arith.constant dense<0.000000e+00> : vector<128x32xf32>
    %47 = tpu.matmul %44, %46, %cst_32 {dimension_numbers = #tpu.dot_dimension_numbers<[1], [0], [0], [1], [0, 0, 1, 1], [], []>} : vector<128x32xf32>, vector<32x32xf32>, vector<128x32xf32> -> vector<128x32xf32>
    %48 = vector.broadcast %45 : vector<1x32xf32> to vector<128x32xf32>
    %49 = arith.addf %47, %48 : vector<128x32xf32>
    %cst_33 = arith.constant 0.000000e+00 : f32
    %50 = vector.broadcast %cst_33 : f32 to vector<128x32xf32>
    %51 = arith.maximumf %49, %50 : vector<128x32xf32>
    %c256 = arith.constant 256 : index
    %c0_34 = arith.constant 0 : index
    %52 = vector.load %arg3[%c256, %c0_34] : memref<1560x128xf32, #tpu.memory_space<vmem>>, vector<1x32xf32>
    %c264 = arith.constant 264 : index
    %c0_35 = arith.constant 0 : index
    %53 = vector.load %arg3[%c264, %c0_35] : memref<1560x128xf32, #tpu.memory_space<vmem>>, vector<32x32xf32>
    %cst_36 = arith.constant dense<0.000000e+00> : vector<128x32xf32>
    %54 = tpu.matmul %51, %53, %cst_36 {dimension_numbers = #tpu.dot_dimension_numbers<[1], [0], [0], [1], [0, 0, 1, 1], [], []>} : vector<128x32xf32>, vector<32x32xf32>, vector<128x32xf32> -> vector<128x32xf32>
    %55 = vector.broadcast %52 : vector<1x32xf32> to vector<128x32xf32>
    %56 = arith.addf %54, %55 : vector<128x32xf32>
    %cst_37 = arith.constant 0.000000e+00 : f32
    %57 = vector.broadcast %cst_37 : f32 to vector<128x32xf32>
    %58 = arith.maximumf %56, %57 : vector<128x32xf32>
    %c296 = arith.constant 296 : index
    %c0_38 = arith.constant 0 : index
    %59 = vector.load %arg3[%c296, %c0_38] : memref<1560x128xf32, #tpu.memory_space<vmem>>, vector<1x12xf32>
    %c304 = arith.constant 304 : index
    %c0_39 = arith.constant 0 : index
    %60 = vector.load %arg3[%c304, %c0_39] : memref<1560x128xf32, #tpu.memory_space<vmem>>, vector<32x12xf32>
    %cst_40 = arith.constant dense<0.000000e+00> : vector<128x12xf32>
    %61 = tpu.matmul %58, %60, %cst_40 {dimension_numbers = #tpu.dot_dimension_numbers<[1], [0], [0], [1], [0, 0, 1, 1], [], []>} : vector<128x32xf32>, vector<32x12xf32>, vector<128x12xf32> -> vector<128x12xf32>
    %62 = vector.broadcast %59 : vector<1x12xf32> to vector<128x12xf32>
    %63 = arith.addf %61, %62 : vector<128x12xf32>
    %c336 = arith.constant 336 : index
    %c0_41 = arith.constant 0 : index
    %64 = vector.load %arg3[%c336, %c0_41] : memref<1560x128xf32, #tpu.memory_space<vmem>>, vector<1x32xf32>
    %c344 = arith.constant 344 : index
    %c0_42 = arith.constant 0 : index
    %65 = vector.load %arg3[%c344, %c0_42] : memref<1560x128xf32, #tpu.memory_space<vmem>>, vector<8x32xf32>
    %c352 = arith.constant 352 : index
    %c0_43 = arith.constant 0 : index
    %66 = vector.load %arg3[%c352, %c0_43] : memref<1560x128xf32, #tpu.memory_space<vmem>>, vector<12x32xf32>
    %cst_44 = arith.constant dense<0.000000e+00> : vector<128x32xf32>
    %67 = tpu.matmul %63, %66, %cst_44 {dimension_numbers = #tpu.dot_dimension_numbers<[1], [0], [0], [1], [0, 0, 1, 1], [], []>} : vector<128x12xf32>, vector<12x32xf32>, vector<128x32xf32> -> vector<128x32xf32>
    %68 = arith.truncf %67 : vector<128x32xf32> to vector<128x32xbf16>
    %c0_45 = arith.constant 0 : index
    %c0_46 = arith.constant 0 : index
    %69 = vector.load %arg2[%c0_45, %c0_46] : memref<256x64xbf16, #tpu.memory_space<vmem>>, vector<128x64xbf16>
    %cst_47 = arith.constant dense<0.000000e+00> : vector<64x32xf32>
    %70 = tpu.matmul %69, %68, %cst_47 {dimension_numbers = #tpu.dot_dimension_numbers<[0], [0], [1], [1], [0, 1, 1, 1], [], []>} : vector<128x64xbf16>, vector<128x32xbf16>, vector<64x32xf32> -> vector<64x32xf32>
    %cst_48 = arith.constant dense<0.000000e+00> : vector<64x32xf32>
    %71 = tpu.matmul %12, %65, %cst_48 {dimension_numbers = #tpu.dot_dimension_numbers<[1], [0], [0], [1], [0, 0, 1, 1], [], []>} : vector<64x8xf32>, vector<8x32xf32>, vector<64x32xf32> -> vector<64x32xf32>
    %72 = arith.addf %71, %70 : vector<64x32xf32>
    %73 = vector.broadcast %64 : vector<1x32xf32> to vector<64x32xf32>
    %74 = arith.addf %72, %73 : vector<64x32xf32>
    %cst_49 = arith.constant 0.000000e+00 : f32
    %75 = vector.broadcast %cst_49 : f32 to vector<64x32xf32>
    %76 = arith.maximumf %74, %75 : vector<64x32xf32>
    %c368 = arith.constant 368 : index
    %c0_50 = arith.constant 0 : index
    %77 = vector.load %arg3[%c368, %c0_50] : memref<1560x128xf32, #tpu.memory_space<vmem>>, vector<1x32xf32>
    %c376 = arith.constant 376 : index
    %c0_51 = arith.constant 0 : index
    %78 = vector.load %arg3[%c376, %c0_51] : memref<1560x128xf32, #tpu.memory_space<vmem>>, vector<32x32xf32>
    %cst_52 = arith.constant dense<0.000000e+00> : vector<64x32xf32>
    %79 = tpu.matmul %76, %78, %cst_52 {dimension_numbers = #tpu.dot_dimension_numbers<[1], [0], [0], [1], [0, 0, 1, 1], [], []>} : vector<64x32xf32>, vector<32x32xf32>, vector<64x32xf32> -> vector<64x32xf32>
    %80 = vector.broadcast %77 : vector<1x32xf32> to vector<64x32xf32>
    %81 = arith.addf %79, %80 : vector<64x32xf32>
    %cst_53 = arith.constant 0.000000e+00 : f32
    %82 = vector.broadcast %cst_53 : f32 to vector<64x32xf32>
    %83 = arith.maximumf %81, %82 : vector<64x32xf32>
    %c408 = arith.constant 408 : index
    %c0_54 = arith.constant 0 : index
    %84 = vector.load %arg3[%c408, %c0_54] : memref<1560x128xf32, #tpu.memory_space<vmem>>, vector<1x32xf32>
    %c416 = arith.constant 416 : index
    %c0_55 = arith.constant 0 : index
    %85 = vector.load %arg3[%c416, %c0_55] : memref<1560x128xf32, #tpu.memory_space<vmem>>, vector<32x32xf32>
    %cst_56 = arith.constant dense<0.000000e+00> : vector<64x32xf32>
    %86 = tpu.matmul %83, %85, %cst_56 {dimension_numbers = #tpu.dot_dimension_numbers<[1], [0], [0], [1], [0, 0, 1, 1], [], []>} : vector<64x32xf32>, vector<32x32xf32>, vector<64x32xf32> -> vector<64x32xf32>
    %87 = vector.broadcast %84 : vector<1x32xf32> to vector<64x32xf32>
    %88 = arith.addf %86, %87 : vector<64x32xf32>
    %cst_57 = arith.constant 0.000000e+00 : f32
    %89 = vector.broadcast %cst_57 : f32 to vector<64x32xf32>
    %90 = arith.maximumf %88, %89 : vector<64x32xf32>
    %c448 = arith.constant 448 : index
    %c0_58 = arith.constant 0 : index
    %91 = vector.load %arg3[%c448, %c0_58] : memref<1560x128xf32, #tpu.memory_space<vmem>>, vector<1x8xf32>
    %c456 = arith.constant 456 : index
    %c0_59 = arith.constant 0 : index
    %92 = vector.load %arg3[%c456, %c0_59] : memref<1560x128xf32, #tpu.memory_space<vmem>>, vector<32x8xf32>
    %cst_60 = arith.constant dense<0.000000e+00> : vector<64x8xf32>
    %93 = tpu.matmul %90, %92, %cst_60 {dimension_numbers = #tpu.dot_dimension_numbers<[1], [0], [0], [1], [0, 0, 1, 1], [], []>} : vector<64x32xf32>, vector<32x8xf32>, vector<64x8xf32> -> vector<64x8xf32>
    %94 = vector.broadcast %91 : vector<1x8xf32> to vector<64x8xf32>
    %95 = arith.addf %93, %94 : vector<64x8xf32>
    %c488 = arith.constant 488 : index
    %c0_61 = arith.constant 0 : index
    %96 = vector.load %arg3[%c488, %c0_61] : memref<1560x128xf32, #tpu.memory_space<vmem>>, vector<1x32xf32>
    %c496 = arith.constant 496 : index
    %c0_62 = arith.constant 0 : index
    %97 = vector.load %arg3[%c496, %c0_62] : memref<1560x128xf32, #tpu.memory_space<vmem>>, vector<8x32xf32>
    %c504 = arith.constant 504 : index
    %c0_63 = arith.constant 0 : index
    %98 = vector.load %arg3[%c504, %c0_63] : memref<1560x128xf32, #tpu.memory_space<vmem>>, vector<8x32xf32>
    %c512 = arith.constant 512 : index
    %c0_64 = arith.constant 0 : index
    %99 = vector.load %arg3[%c512, %c0_64] : memref<1560x128xf32, #tpu.memory_space<vmem>>, vector<12x32xf32>
    %cst_65 = arith.constant dense<0.000000e+00> : vector<64x32xf32>
    %100 = tpu.matmul %95, %97, %cst_65 {dimension_numbers = #tpu.dot_dimension_numbers<[1], [0], [0], [1], [0, 0, 1, 1], [], []>} : vector<64x8xf32>, vector<8x32xf32>, vector<64x32xf32> -> vector<64x32xf32>
    %101 = arith.truncf %100 : vector<64x32xf32> to vector<64x32xbf16>
    %cst_66 = arith.constant dense<0.000000e+00> : vector<64x32xf32>
    %102 = tpu.matmul %95, %98, %cst_66 {dimension_numbers = #tpu.dot_dimension_numbers<[1], [0], [0], [1], [0, 0, 1, 1], [], []>} : vector<64x8xf32>, vector<8x32xf32>, vector<64x32xf32> -> vector<64x32xf32>
    %103 = arith.truncf %102 : vector<64x32xf32> to vector<64x32xbf16>
    %c0_67 = arith.constant 0 : index
    %c0_68 = arith.constant 0 : index
    %104 = vector.load %arg2[%c0_67, %c0_68] : memref<256x64xbf16, #tpu.memory_space<vmem>>, vector<128x64xbf16>
    %cst_69 = arith.constant dense<0.000000e+00> : vector<128x32xf32>
    %105 = tpu.matmul %104, %101, %cst_69 {dimension_numbers = #tpu.dot_dimension_numbers<[1], [0], [0], [1], [0, 0, 1, 1], [], []>} : vector<128x64xbf16>, vector<64x32xbf16>, vector<128x32xf32> -> vector<128x32xf32>
    %c128_70 = arith.constant 128 : index
    %c0_71 = arith.constant 0 : index
    %106 = vector.load %arg2[%c128_70, %c0_71] : memref<256x64xbf16, #tpu.memory_space<vmem>>, vector<128x64xbf16>
    %cst_72 = arith.constant dense<0.000000e+00> : vector<128x32xf32>
    %107 = tpu.matmul %106, %103, %cst_72 {dimension_numbers = #tpu.dot_dimension_numbers<[1], [0], [0], [1], [0, 0, 1, 1], [], []>} : vector<128x64xbf16>, vector<64x32xbf16>, vector<128x32xf32> -> vector<128x32xf32>
    %108 = arith.addf %105, %107 : vector<128x32xf32>
    %cst_73 = arith.constant dense<0.000000e+00> : vector<128x32xf32>
    %109 = tpu.matmul %63, %99, %cst_73 {dimension_numbers = #tpu.dot_dimension_numbers<[1], [0], [0], [1], [0, 0, 1, 1], [], []>} : vector<128x12xf32>, vector<12x32xf32>, vector<128x32xf32> -> vector<128x32xf32>
    %110 = arith.addf %108, %109 : vector<128x32xf32>
    %111 = vector.broadcast %96 : vector<1x32xf32> to vector<128x32xf32>
    %112 = arith.addf %110, %111 : vector<128x32xf32>
    %cst_74 = arith.constant 0.000000e+00 : f32
    %113 = vector.broadcast %cst_74 : f32 to vector<128x32xf32>
    %114 = arith.maximumf %112, %113 : vector<128x32xf32>
    %c528 = arith.constant 528 : index
    %c0_75 = arith.constant 0 : index
    %115 = vector.load %arg3[%c528, %c0_75] : memref<1560x128xf32, #tpu.memory_space<vmem>>, vector<1x32xf32>
    %c536 = arith.constant 536 : index
    %c0_76 = arith.constant 0 : index
    %116 = vector.load %arg3[%c536, %c0_76] : memref<1560x128xf32, #tpu.memory_space<vmem>>, vector<32x32xf32>
    %cst_77 = arith.constant dense<0.000000e+00> : vector<128x32xf32>
    %117 = tpu.matmul %114, %116, %cst_77 {dimension_numbers = #tpu.dot_dimension_numbers<[1], [0], [0], [1], [0, 0, 1, 1], [], []>} : vector<128x32xf32>, vector<32x32xf32>, vector<128x32xf32> -> vector<128x32xf32>
    %118 = vector.broadcast %115 : vector<1x32xf32> to vector<128x32xf32>
    %119 = arith.addf %117, %118 : vector<128x32xf32>
    %cst_78 = arith.constant 0.000000e+00 : f32
    %120 = vector.broadcast %cst_78 : f32 to vector<128x32xf32>
    %121 = arith.maximumf %119, %120 : vector<128x32xf32>
    %c568 = arith.constant 568 : index
    %c0_79 = arith.constant 0 : index
    %122 = vector.load %arg3[%c568, %c0_79] : memref<1560x128xf32, #tpu.memory_space<vmem>>, vector<1x32xf32>
    %c576 = arith.constant 576 : index
    %c0_80 = arith.constant 0 : index
    %123 = vector.load %arg3[%c576, %c0_80] : memref<1560x128xf32, #tpu.memory_space<vmem>>, vector<32x32xf32>
    %cst_81 = arith.constant dense<0.000000e+00> : vector<128x32xf32>
    %124 = tpu.matmul %121, %123, %cst_81 {dimension_numbers = #tpu.dot_dimension_numbers<[1], [0], [0], [1], [0, 0, 1, 1], [], []>} : vector<128x32xf32>, vector<32x32xf32>, vector<128x32xf32> -> vector<128x32xf32>
    %125 = vector.broadcast %122 : vector<1x32xf32> to vector<128x32xf32>
    %126 = arith.addf %124, %125 : vector<128x32xf32>
    %cst_82 = arith.constant 0.000000e+00 : f32
    %127 = vector.broadcast %cst_82 : f32 to vector<128x32xf32>
    %128 = arith.maximumf %126, %127 : vector<128x32xf32>
    %c608 = arith.constant 608 : index
    %c0_83 = arith.constant 0 : index
    %129 = vector.load %arg3[%c608, %c0_83] : memref<1560x128xf32, #tpu.memory_space<vmem>>, vector<1x12xf32>
    %c616 = arith.constant 616 : index
    %c0_84 = arith.constant 0 : index
    %130 = vector.load %arg3[%c616, %c0_84] : memref<1560x128xf32, #tpu.memory_space<vmem>>, vector<32x12xf32>
    %cst_85 = arith.constant dense<0.000000e+00> : vector<128x12xf32>
    %131 = tpu.matmul %128, %130, %cst_85 {dimension_numbers = #tpu.dot_dimension_numbers<[1], [0], [0], [1], [0, 0, 1, 1], [], []>} : vector<128x32xf32>, vector<32x12xf32>, vector<128x12xf32> -> vector<128x12xf32>
    %132 = vector.broadcast %129 : vector<1x12xf32> to vector<128x12xf32>
    %133 = arith.addf %131, %132 : vector<128x12xf32>
    %c648 = arith.constant 648 : index
    %c0_86 = arith.constant 0 : index
    %134 = vector.load %arg3[%c648, %c0_86] : memref<1560x128xf32, #tpu.memory_space<vmem>>, vector<1x32xf32>
    %c656 = arith.constant 656 : index
    %c0_87 = arith.constant 0 : index
    %135 = vector.load %arg3[%c656, %c0_87] : memref<1560x128xf32, #tpu.memory_space<vmem>>, vector<8x32xf32>
    %c664 = arith.constant 664 : index
    %c0_88 = arith.constant 0 : index
    %136 = vector.load %arg3[%c664, %c0_88] : memref<1560x128xf32, #tpu.memory_space<vmem>>, vector<12x32xf32>
    %cst_89 = arith.constant dense<0.000000e+00> : vector<128x32xf32>
    %137 = tpu.matmul %133, %136, %cst_89 {dimension_numbers = #tpu.dot_dimension_numbers<[1], [0], [0], [1], [0, 0, 1, 1], [], []>} : vector<128x12xf32>, vector<12x32xf32>, vector<128x32xf32> -> vector<128x32xf32>
    %138 = arith.truncf %137 : vector<128x32xf32> to vector<128x32xbf16>
    %c0_90 = arith.constant 0 : index
    %c0_91 = arith.constant 0 : index
    %139 = vector.load %arg2[%c0_90, %c0_91] : memref<256x64xbf16, #tpu.memory_space<vmem>>, vector<128x64xbf16>
    %cst_92 = arith.constant dense<0.000000e+00> : vector<64x32xf32>
    %140 = tpu.matmul %139, %138, %cst_92 {dimension_numbers = #tpu.dot_dimension_numbers<[0], [0], [1], [1], [0, 1, 1, 1], [], []>} : vector<128x64xbf16>, vector<128x32xbf16>, vector<64x32xf32> -> vector<64x32xf32>
    %cst_93 = arith.constant dense<0.000000e+00> : vector<64x32xf32>
    %141 = tpu.matmul %95, %135, %cst_93 {dimension_numbers = #tpu.dot_dimension_numbers<[1], [0], [0], [1], [0, 0, 1, 1], [], []>} : vector<64x8xf32>, vector<8x32xf32>, vector<64x32xf32> -> vector<64x32xf32>
    %142 = arith.addf %141, %140 : vector<64x32xf32>
    %143 = vector.broadcast %134 : vector<1x32xf32> to vector<64x32xf32>
    %144 = arith.addf %142, %143 : vector<64x32xf32>
    %cst_94 = arith.constant 0.000000e+00 : f32
    %145 = vector.broadcast %cst_94 : f32 to vector<64x32xf32>
    %146 = arith.maximumf %144, %145 : vector<64x32xf32>
    %c680 = arith.constant 680 : index
    %c0_95 = arith.constant 0 : index
    %147 = vector.load %arg3[%c680, %c0_95] : memref<1560x128xf32, #tpu.memory_space<vmem>>, vector<1x32xf32>
    %c688 = arith.constant 688 : index
    %c0_96 = arith.constant 0 : index
    %148 = vector.load %arg3[%c688, %c0_96] : memref<1560x128xf32, #tpu.memory_space<vmem>>, vector<32x32xf32>
    %cst_97 = arith.constant dense<0.000000e+00> : vector<64x32xf32>
    %149 = tpu.matmul %146, %148, %cst_97 {dimension_numbers = #tpu.dot_dimension_numbers<[1], [0], [0], [1], [0, 0, 1, 1], [], []>} : vector<64x32xf32>, vector<32x32xf32>, vector<64x32xf32> -> vector<64x32xf32>
    %150 = vector.broadcast %147 : vector<1x32xf32> to vector<64x32xf32>
    %151 = arith.addf %149, %150 : vector<64x32xf32>
    %cst_98 = arith.constant 0.000000e+00 : f32
    %152 = vector.broadcast %cst_98 : f32 to vector<64x32xf32>
    %153 = arith.maximumf %151, %152 : vector<64x32xf32>
    %c720 = arith.constant 720 : index
    %c0_99 = arith.constant 0 : index
    %154 = vector.load %arg3[%c720, %c0_99] : memref<1560x128xf32, #tpu.memory_space<vmem>>, vector<1x32xf32>
    %c728 = arith.constant 728 : index
    %c0_100 = arith.constant 0 : index
    %155 = vector.load %arg3[%c728, %c0_100] : memref<1560x128xf32, #tpu.memory_space<vmem>>, vector<32x32xf32>
    %cst_101 = arith.constant dense<0.000000e+00> : vector<64x32xf32>
    %156 = tpu.matmul %153, %155, %cst_101 {dimension_numbers = #tpu.dot_dimension_numbers<[1], [0], [0], [1], [0, 0, 1, 1], [], []>} : vector<64x32xf32>, vector<32x32xf32>, vector<64x32xf32> -> vector<64x32xf32>
    %157 = vector.broadcast %154 : vector<1x32xf32> to vector<64x32xf32>
    %158 = arith.addf %156, %157 : vector<64x32xf32>
    %cst_102 = arith.constant 0.000000e+00 : f32
    %159 = vector.broadcast %cst_102 : f32 to vector<64x32xf32>
    %160 = arith.maximumf %158, %159 : vector<64x32xf32>
    %c760 = arith.constant 760 : index
    %c0_103 = arith.constant 0 : index
    %161 = vector.load %arg3[%c760, %c0_103] : memref<1560x128xf32, #tpu.memory_space<vmem>>, vector<1x8xf32>
    %c768 = arith.constant 768 : index
    %c0_104 = arith.constant 0 : index
    %162 = vector.load %arg3[%c768, %c0_104] : memref<1560x128xf32, #tpu.memory_space<vmem>>, vector<32x8xf32>
    %cst_105 = arith.constant dense<0.000000e+00> : vector<64x8xf32>
    %163 = tpu.matmul %160, %162, %cst_105 {dimension_numbers = #tpu.dot_dimension_numbers<[1], [0], [0], [1], [0, 0, 1, 1], [], []>} : vector<64x32xf32>, vector<32x8xf32>, vector<64x8xf32> -> vector<64x8xf32>
    %164 = vector.broadcast %161 : vector<1x8xf32> to vector<64x8xf32>
    %165 = arith.addf %163, %164 : vector<64x8xf32>
    %c800 = arith.constant 800 : index
    %c0_106 = arith.constant 0 : index
    %166 = vector.load %arg3[%c800, %c0_106] : memref<1560x128xf32, #tpu.memory_space<vmem>>, vector<1x32xf32>
    %c808 = arith.constant 808 : index
    %c0_107 = arith.constant 0 : index
    %167 = vector.load %arg3[%c808, %c0_107] : memref<1560x128xf32, #tpu.memory_space<vmem>>, vector<8x32xf32>
    %c816 = arith.constant 816 : index
    %c0_108 = arith.constant 0 : index
    %168 = vector.load %arg3[%c816, %c0_108] : memref<1560x128xf32, #tpu.memory_space<vmem>>, vector<8x32xf32>
    %c824 = arith.constant 824 : index
    %c0_109 = arith.constant 0 : index
    %169 = vector.load %arg3[%c824, %c0_109] : memref<1560x128xf32, #tpu.memory_space<vmem>>, vector<12x32xf32>
    %cst_110 = arith.constant dense<0.000000e+00> : vector<64x32xf32>
    %170 = tpu.matmul %165, %167, %cst_110 {dimension_numbers = #tpu.dot_dimension_numbers<[1], [0], [0], [1], [0, 0, 1, 1], [], []>} : vector<64x8xf32>, vector<8x32xf32>, vector<64x32xf32> -> vector<64x32xf32>
    %171 = arith.truncf %170 : vector<64x32xf32> to vector<64x32xbf16>
    %cst_111 = arith.constant dense<0.000000e+00> : vector<64x32xf32>
    %172 = tpu.matmul %165, %168, %cst_111 {dimension_numbers = #tpu.dot_dimension_numbers<[1], [0], [0], [1], [0, 0, 1, 1], [], []>} : vector<64x8xf32>, vector<8x32xf32>, vector<64x32xf32> -> vector<64x32xf32>
    %173 = arith.truncf %172 : vector<64x32xf32> to vector<64x32xbf16>
    %c0_112 = arith.constant 0 : index
    %c0_113 = arith.constant 0 : index
    %174 = vector.load %arg2[%c0_112, %c0_113] : memref<256x64xbf16, #tpu.memory_space<vmem>>, vector<128x64xbf16>
    %cst_114 = arith.constant dense<0.000000e+00> : vector<128x32xf32>
    %175 = tpu.matmul %174, %171, %cst_114 {dimension_numbers = #tpu.dot_dimension_numbers<[1], [0], [0], [1], [0, 0, 1, 1], [], []>} : vector<128x64xbf16>, vector<64x32xbf16>, vector<128x32xf32> -> vector<128x32xf32>
    %c128_115 = arith.constant 128 : index
    %c0_116 = arith.constant 0 : index
    %176 = vector.load %arg2[%c128_115, %c0_116] : memref<256x64xbf16, #tpu.memory_space<vmem>>, vector<128x64xbf16>
    %cst_117 = arith.constant dense<0.000000e+00> : vector<128x32xf32>
    %177 = tpu.matmul %176, %173, %cst_117 {dimension_numbers = #tpu.dot_dimension_numbers<[1], [0], [0], [1], [0, 0, 1, 1], [], []>} : vector<128x64xbf16>, vector<64x32xbf16>, vector<128x32xf32> -> vector<128x32xf32>
    %178 = arith.addf %175, %177 : vector<128x32xf32>
    %cst_118 = arith.constant dense<0.000000e+00> : vector<128x32xf32>
    %179 = tpu.matmul %133, %169, %cst_118 {dimension_numbers = #tpu.dot_dimension_numbers<[1], [0], [0], [1], [0, 0, 1, 1], [], []>} : vector<128x12xf32>, vector<12x32xf32>, vector<128x32xf32> -> vector<128x32xf32>
    %180 = arith.addf %178, %179 : vector<128x32xf32>
    %181 = vector.broadcast %166 : vector<1x32xf32> to vector<128x32xf32>
    %182 = arith.addf %180, %181 : vector<128x32xf32>
    %cst_119 = arith.constant 0.000000e+00 : f32
    %183 = vector.broadcast %cst_119 : f32 to vector<128x32xf32>
    %184 = arith.maximumf %182, %183 : vector<128x32xf32>
    %c840 = arith.constant 840 : index
    %c0_120 = arith.constant 0 : index
    %185 = vector.load %arg3[%c840, %c0_120] : memref<1560x128xf32, #tpu.memory_space<vmem>>, vector<1x32xf32>
    %c848 = arith.constant 848 : index
    %c0_121 = arith.constant 0 : index
    %186 = vector.load %arg3[%c848, %c0_121] : memref<1560x128xf32, #tpu.memory_space<vmem>>, vector<32x32xf32>
    %cst_122 = arith.constant dense<0.000000e+00> : vector<128x32xf32>
    %187 = tpu.matmul %184, %186, %cst_122 {dimension_numbers = #tpu.dot_dimension_numbers<[1], [0], [0], [1], [0, 0, 1, 1], [], []>} : vector<128x32xf32>, vector<32x32xf32>, vector<128x32xf32> -> vector<128x32xf32>
    %188 = vector.broadcast %185 : vector<1x32xf32> to vector<128x32xf32>
    %189 = arith.addf %187, %188 : vector<128x32xf32>
    %cst_123 = arith.constant 0.000000e+00 : f32
    %190 = vector.broadcast %cst_123 : f32 to vector<128x32xf32>
    %191 = arith.maximumf %189, %190 : vector<128x32xf32>
    %c880 = arith.constant 880 : index
    %c0_124 = arith.constant 0 : index
    %192 = vector.load %arg3[%c880, %c0_124] : memref<1560x128xf32, #tpu.memory_space<vmem>>, vector<1x32xf32>
    %c888 = arith.constant 888 : index
    %c0_125 = arith.constant 0 : index
    %193 = vector.load %arg3[%c888, %c0_125] : memref<1560x128xf32, #tpu.memory_space<vmem>>, vector<32x32xf32>
    %cst_126 = arith.constant dense<0.000000e+00> : vector<128x32xf32>
    %194 = tpu.matmul %191, %193, %cst_126 {dimension_numbers = #tpu.dot_dimension_numbers<[1], [0], [0], [1], [0, 0, 1, 1], [], []>} : vector<128x32xf32>, vector<32x32xf32>, vector<128x32xf32> -> vector<128x32xf32>
    %195 = vector.broadcast %192 : vector<1x32xf32> to vector<128x32xf32>
    %196 = arith.addf %194, %195 : vector<128x32xf32>
    %cst_127 = arith.constant 0.000000e+00 : f32
    %197 = vector.broadcast %cst_127 : f32 to vector<128x32xf32>
    %198 = arith.maximumf %196, %197 : vector<128x32xf32>
    %c920 = arith.constant 920 : index
    %c0_128 = arith.constant 0 : index
    %199 = vector.load %arg3[%c920, %c0_128] : memref<1560x128xf32, #tpu.memory_space<vmem>>, vector<1x12xf32>
    %c928 = arith.constant 928 : index
    %c0_129 = arith.constant 0 : index
    %200 = vector.load %arg3[%c928, %c0_129] : memref<1560x128xf32, #tpu.memory_space<vmem>>, vector<32x12xf32>
    %cst_130 = arith.constant dense<0.000000e+00> : vector<128x12xf32>
    %201 = tpu.matmul %198, %200, %cst_130 {dimension_numbers = #tpu.dot_dimension_numbers<[1], [0], [0], [1], [0, 0, 1, 1], [], []>} : vector<128x32xf32>, vector<32x12xf32>, vector<128x12xf32> -> vector<128x12xf32>
    %202 = vector.broadcast %199 : vector<1x12xf32> to vector<128x12xf32>
    %203 = arith.addf %201, %202 : vector<128x12xf32>
    %c960 = arith.constant 960 : index
    %c0_131 = arith.constant 0 : index
    %204 = vector.load %arg3[%c960, %c0_131] : memref<1560x128xf32, #tpu.memory_space<vmem>>, vector<1x32xf32>
    %c968 = arith.constant 968 : index
    %c0_132 = arith.constant 0 : index
    %205 = vector.load %arg3[%c968, %c0_132] : memref<1560x128xf32, #tpu.memory_space<vmem>>, vector<8x32xf32>
    %c976 = arith.constant 976 : index
    %c0_133 = arith.constant 0 : index
    %206 = vector.load %arg3[%c976, %c0_133] : memref<1560x128xf32, #tpu.memory_space<vmem>>, vector<12x32xf32>
    %cst_134 = arith.constant dense<0.000000e+00> : vector<128x32xf32>
    %207 = tpu.matmul %203, %206, %cst_134 {dimension_numbers = #tpu.dot_dimension_numbers<[1], [0], [0], [1], [0, 0, 1, 1], [], []>} : vector<128x12xf32>, vector<12x32xf32>, vector<128x32xf32> -> vector<128x32xf32>
    %208 = arith.truncf %207 : vector<128x32xf32> to vector<128x32xbf16>
    %c0_135 = arith.constant 0 : index
    %c0_136 = arith.constant 0 : index
    %209 = vector.load %arg2[%c0_135, %c0_136] : memref<256x64xbf16, #tpu.memory_space<vmem>>, vector<128x64xbf16>
    %cst_137 = arith.constant dense<0.000000e+00> : vector<64x32xf32>
    %210 = tpu.matmul %209, %208, %cst_137 {dimension_numbers = #tpu.dot_dimension_numbers<[0], [0], [1], [1], [0, 1, 1, 1], [], []>} : vector<128x64xbf16>, vector<128x32xbf16>, vector<64x32xf32> -> vector<64x32xf32>
    %cst_138 = arith.constant dense<0.000000e+00> : vector<64x32xf32>
    %211 = tpu.matmul %165, %205, %cst_138 {dimension_numbers = #tpu.dot_dimension_numbers<[1], [0], [0], [1], [0, 0, 1, 1], [], []>} : vector<64x8xf32>, vector<8x32xf32>, vector<64x32xf32> -> vector<64x32xf32>
    %212 = arith.addf %211, %210 : vector<64x32xf32>
    %213 = vector.broadcast %204 : vector<1x32xf32> to vector<64x32xf32>
    %214 = arith.addf %212, %213 : vector<64x32xf32>
    %cst_139 = arith.constant 0.000000e+00 : f32
    %215 = vector.broadcast %cst_139 : f32 to vector<64x32xf32>
    %216 = arith.maximumf %214, %215 : vector<64x32xf32>
    %c992 = arith.constant 992 : index
    %c0_140 = arith.constant 0 : index
    %217 = vector.load %arg3[%c992, %c0_140] : memref<1560x128xf32, #tpu.memory_space<vmem>>, vector<1x32xf32>
    %c1000 = arith.constant 1000 : index
    %c0_141 = arith.constant 0 : index
    %218 = vector.load %arg3[%c1000, %c0_141] : memref<1560x128xf32, #tpu.memory_space<vmem>>, vector<32x32xf32>
    %cst_142 = arith.constant dense<0.000000e+00> : vector<64x32xf32>
    %219 = tpu.matmul %216, %218, %cst_142 {dimension_numbers = #tpu.dot_dimension_numbers<[1], [0], [0], [1], [0, 0, 1, 1], [], []>} : vector<64x32xf32>, vector<32x32xf32>, vector<64x32xf32> -> vector<64x32xf32>
    %220 = vector.broadcast %217 : vector<1x32xf32> to vector<64x32xf32>
    %221 = arith.addf %219, %220 : vector<64x32xf32>
    %cst_143 = arith.constant 0.000000e+00 : f32
    %222 = vector.broadcast %cst_143 : f32 to vector<64x32xf32>
    %223 = arith.maximumf %221, %222 : vector<64x32xf32>
    %c1032 = arith.constant 1032 : index
    %c0_144 = arith.constant 0 : index
    %224 = vector.load %arg3[%c1032, %c0_144] : memref<1560x128xf32, #tpu.memory_space<vmem>>, vector<1x32xf32>
    %c1040 = arith.constant 1040 : index
    %c0_145 = arith.constant 0 : index
    %225 = vector.load %arg3[%c1040, %c0_145] : memref<1560x128xf32, #tpu.memory_space<vmem>>, vector<32x32xf32>
    %cst_146 = arith.constant dense<0.000000e+00> : vector<64x32xf32>
    %226 = tpu.matmul %223, %225, %cst_146 {dimension_numbers = #tpu.dot_dimension_numbers<[1], [0], [0], [1], [0, 0, 1, 1], [], []>} : vector<64x32xf32>, vector<32x32xf32>, vector<64x32xf32> -> vector<64x32xf32>
    %227 = vector.broadcast %224 : vector<1x32xf32> to vector<64x32xf32>
    %228 = arith.addf %226, %227 : vector<64x32xf32>
    %cst_147 = arith.constant 0.000000e+00 : f32
    %229 = vector.broadcast %cst_147 : f32 to vector<64x32xf32>
    %230 = arith.maximumf %228, %229 : vector<64x32xf32>
    %c1072 = arith.constant 1072 : index
    %c0_148 = arith.constant 0 : index
    %231 = vector.load %arg3[%c1072, %c0_148] : memref<1560x128xf32, #tpu.memory_space<vmem>>, vector<1x8xf32>
    %c1080 = arith.constant 1080 : index
    %c0_149 = arith.constant 0 : index
    %232 = vector.load %arg3[%c1080, %c0_149] : memref<1560x128xf32, #tpu.memory_space<vmem>>, vector<32x8xf32>
    %cst_150 = arith.constant dense<0.000000e+00> : vector<64x8xf32>
    %233 = tpu.matmul %230, %232, %cst_150 {dimension_numbers = #tpu.dot_dimension_numbers<[1], [0], [0], [1], [0, 0, 1, 1], [], []>} : vector<64x32xf32>, vector<32x8xf32>, vector<64x8xf32> -> vector<64x8xf32>
    %234 = vector.broadcast %231 : vector<1x8xf32> to vector<64x8xf32>
    %235 = arith.addf %233, %234 : vector<64x8xf32>
    %c1112 = arith.constant 1112 : index
    %c0_151 = arith.constant 0 : index
    %236 = vector.load %arg3[%c1112, %c0_151] : memref<1560x128xf32, #tpu.memory_space<vmem>>, vector<1x32xf32>
    %c1120 = arith.constant 1120 : index
    %c0_152 = arith.constant 0 : index
    %237 = vector.load %arg3[%c1120, %c0_152] : memref<1560x128xf32, #tpu.memory_space<vmem>>, vector<8x32xf32>
    %c1128 = arith.constant 1128 : index
    %c0_153 = arith.constant 0 : index
    %238 = vector.load %arg3[%c1128, %c0_153] : memref<1560x128xf32, #tpu.memory_space<vmem>>, vector<8x32xf32>
    %c1136 = arith.constant 1136 : index
    %c0_154 = arith.constant 0 : index
    %239 = vector.load %arg3[%c1136, %c0_154] : memref<1560x128xf32, #tpu.memory_space<vmem>>, vector<12x32xf32>
    %cst_155 = arith.constant dense<0.000000e+00> : vector<64x32xf32>
    %240 = tpu.matmul %235, %237, %cst_155 {dimension_numbers = #tpu.dot_dimension_numbers<[1], [0], [0], [1], [0, 0, 1, 1], [], []>} : vector<64x8xf32>, vector<8x32xf32>, vector<64x32xf32> -> vector<64x32xf32>
    %241 = arith.truncf %240 : vector<64x32xf32> to vector<64x32xbf16>
    %cst_156 = arith.constant dense<0.000000e+00> : vector<64x32xf32>
    %242 = tpu.matmul %235, %238, %cst_156 {dimension_numbers = #tpu.dot_dimension_numbers<[1], [0], [0], [1], [0, 0, 1, 1], [], []>} : vector<64x8xf32>, vector<8x32xf32>, vector<64x32xf32> -> vector<64x32xf32>
    %243 = arith.truncf %242 : vector<64x32xf32> to vector<64x32xbf16>
    %c0_157 = arith.constant 0 : index
    %c0_158 = arith.constant 0 : index
    %244 = vector.load %arg2[%c0_157, %c0_158] : memref<256x64xbf16, #tpu.memory_space<vmem>>, vector<128x64xbf16>
    %cst_159 = arith.constant dense<0.000000e+00> : vector<128x32xf32>
    %245 = tpu.matmul %244, %241, %cst_159 {dimension_numbers = #tpu.dot_dimension_numbers<[1], [0], [0], [1], [0, 0, 1, 1], [], []>} : vector<128x64xbf16>, vector<64x32xbf16>, vector<128x32xf32> -> vector<128x32xf32>
    %c128_160 = arith.constant 128 : index
    %c0_161 = arith.constant 0 : index
    %246 = vector.load %arg2[%c128_160, %c0_161] : memref<256x64xbf16, #tpu.memory_space<vmem>>, vector<128x64xbf16>
    %cst_162 = arith.constant dense<0.000000e+00> : vector<128x32xf32>
    %247 = tpu.matmul %246, %243, %cst_162 {dimension_numbers = #tpu.dot_dimension_numbers<[1], [0], [0], [1], [0, 0, 1, 1], [], []>} : vector<128x64xbf16>, vector<64x32xbf16>, vector<128x32xf32> -> vector<128x32xf32>
    %248 = arith.addf %245, %247 : vector<128x32xf32>
    %cst_163 = arith.constant dense<0.000000e+00> : vector<128x32xf32>
    %249 = tpu.matmul %203, %239, %cst_163 {dimension_numbers = #tpu.dot_dimension_numbers<[1], [0], [0], [1], [0, 0, 1, 1], [], []>} : vector<128x12xf32>, vector<12x32xf32>, vector<128x32xf32> -> vector<128x32xf32>
    %250 = arith.addf %248, %249 : vector<128x32xf32>
    %251 = vector.broadcast %236 : vector<1x32xf32> to vector<128x32xf32>
    %252 = arith.addf %250, %251 : vector<128x32xf32>
    %cst_164 = arith.constant 0.000000e+00 : f32
    %253 = vector.broadcast %cst_164 : f32 to vector<128x32xf32>
    %254 = arith.maximumf %252, %253 : vector<128x32xf32>
    %c1152 = arith.constant 1152 : index
    %c0_165 = arith.constant 0 : index
    %255 = vector.load %arg3[%c1152, %c0_165] : memref<1560x128xf32, #tpu.memory_space<vmem>>, vector<1x32xf32>
    %c1160 = arith.constant 1160 : index
    %c0_166 = arith.constant 0 : index
    %256 = vector.load %arg3[%c1160, %c0_166] : memref<1560x128xf32, #tpu.memory_space<vmem>>, vector<32x32xf32>
    %cst_167 = arith.constant dense<0.000000e+00> : vector<128x32xf32>
    %257 = tpu.matmul %254, %256, %cst_167 {dimension_numbers = #tpu.dot_dimension_numbers<[1], [0], [0], [1], [0, 0, 1, 1], [], []>} : vector<128x32xf32>, vector<32x32xf32>, vector<128x32xf32> -> vector<128x32xf32>
    %258 = vector.broadcast %255 : vector<1x32xf32> to vector<128x32xf32>
    %259 = arith.addf %257, %258 : vector<128x32xf32>
    %cst_168 = arith.constant 0.000000e+00 : f32
    %260 = vector.broadcast %cst_168 : f32 to vector<128x32xf32>
    %261 = arith.maximumf %259, %260 : vector<128x32xf32>
    %c1192 = arith.constant 1192 : index
    %c0_169 = arith.constant 0 : index
    %262 = vector.load %arg3[%c1192, %c0_169] : memref<1560x128xf32, #tpu.memory_space<vmem>>, vector<1x32xf32>
    %c1200 = arith.constant 1200 : index
    %c0_170 = arith.constant 0 : index
    %263 = vector.load %arg3[%c1200, %c0_170] : memref<1560x128xf32, #tpu.memory_space<vmem>>, vector<32x32xf32>
    %cst_171 = arith.constant dense<0.000000e+00> : vector<128x32xf32>
    %264 = tpu.matmul %261, %263, %cst_171 {dimension_numbers = #tpu.dot_dimension_numbers<[1], [0], [0], [1], [0, 0, 1, 1], [], []>} : vector<128x32xf32>, vector<32x32xf32>, vector<128x32xf32> -> vector<128x32xf32>
    %265 = vector.broadcast %262 : vector<1x32xf32> to vector<128x32xf32>
    %266 = arith.addf %264, %265 : vector<128x32xf32>
    %cst_172 = arith.constant 0.000000e+00 : f32
    %267 = vector.broadcast %cst_172 : f32 to vector<128x32xf32>
    %268 = arith.maximumf %266, %267 : vector<128x32xf32>
    %c1232 = arith.constant 1232 : index
    %c0_173 = arith.constant 0 : index
    %269 = vector.load %arg3[%c1232, %c0_173] : memref<1560x128xf32, #tpu.memory_space<vmem>>, vector<1x12xf32>
    %c1240 = arith.constant 1240 : index
    %c0_174 = arith.constant 0 : index
    %270 = vector.load %arg3[%c1240, %c0_174] : memref<1560x128xf32, #tpu.memory_space<vmem>>, vector<32x12xf32>
    %cst_175 = arith.constant dense<0.000000e+00> : vector<128x12xf32>
    %271 = tpu.matmul %268, %270, %cst_175 {dimension_numbers = #tpu.dot_dimension_numbers<[1], [0], [0], [1], [0, 0, 1, 1], [], []>} : vector<128x32xf32>, vector<32x12xf32>, vector<128x12xf32> -> vector<128x12xf32>
    %272 = vector.broadcast %269 : vector<1x12xf32> to vector<128x12xf32>
    %273 = arith.addf %271, %272 : vector<128x12xf32>
    %274 = tpu.transpose %273, [1, 0] : vector<128x12xf32> -> vector<12x128xf32>
    %c1432 = arith.constant 1432 : index
    %c0_176 = arith.constant 0 : index
    %275 = vector.load %arg3[%c1432, %c0_176] : memref<1560x128xf32, #tpu.memory_space<vmem>>, vector<12x32xf32>
    %c1528 = arith.constant 1528 : index
    %c0_177 = arith.constant 0 : index
    %276 = vector.load %arg3[%c1528, %c0_177] : memref<1560x128xf32, #tpu.memory_space<vmem>>, vector<32x1xf32>
    %cst_178 = arith.constant dense<0.000000e+00> : vector<32x128xf32>
    %277 = tpu.matmul %275, %274, %cst_178 {dimension_numbers = #tpu.dot_dimension_numbers<[0], [0], [1], [1], [0, 1, 1, 1], [], []>} : vector<12x32xf32>, vector<12x128xf32>, vector<32x128xf32> -> vector<32x128xf32>
    %278 = vector.broadcast %276 : vector<32x1xf32> to vector<32x128xf32>
    %279 = arith.addf %277, %278 : vector<32x128xf32>
    %cst_179 = arith.constant 0.000000e+00 : f32
    %280 = vector.broadcast %cst_179 : f32 to vector<32x128xf32>
    %281 = arith.maximumf %279, %280 : vector<32x128xf32>
    %c1456 = arith.constant 1456 : index
    %c0_180 = arith.constant 0 : index
    %282 = vector.load %arg3[%c1456, %c0_180] : memref<1560x128xf32, #tpu.memory_space<vmem>>, vector<32x32xf32>
    %c1528_181 = arith.constant 1528 : index
    %c1 = arith.constant 1 : index
    %283 = vector.load %arg3[%c1528_181, %c1] : memref<1560x128xf32, #tpu.memory_space<vmem>>, vector<32x1xf32>
    %cst_182 = arith.constant dense<0.000000e+00> : vector<32x128xf32>
    %284 = tpu.matmul %282, %281, %cst_182 {dimension_numbers = #tpu.dot_dimension_numbers<[0], [0], [1], [1], [0, 1, 1, 1], [], []>} : vector<32x32xf32>, vector<32x128xf32>, vector<32x128xf32> -> vector<32x128xf32>
    %285 = vector.broadcast %283 : vector<32x1xf32> to vector<32x128xf32>
    %286 = arith.addf %284, %285 : vector<32x128xf32>
    %cst_183 = arith.constant 0.000000e+00 : f32
    %287 = vector.broadcast %cst_183 : f32 to vector<32x128xf32>
    %288 = arith.maximumf %286, %287 : vector<32x128xf32>
    %c1496 = arith.constant 1496 : index
    %c0_184 = arith.constant 0 : index
    %289 = vector.load %arg3[%c1496, %c0_184] : memref<1560x128xf32, #tpu.memory_space<vmem>>, vector<32x1xf32>
    %c1528_185 = arith.constant 1528 : index
    %c2 = arith.constant 2 : index
    %290 = vector.load %arg3[%c1528_185, %c2] : memref<1560x128xf32, #tpu.memory_space<vmem>>, vector<1x1xf32>
    %cst_186 = arith.constant dense<0.000000e+00> : vector<1x128xf32>
    %291 = tpu.matmul %289, %288, %cst_186 {dimension_numbers = #tpu.dot_dimension_numbers<[0], [0], [1], [1], [0, 1, 1, 1], [], []>} : vector<32x1xf32>, vector<32x128xf32>, vector<1x128xf32> -> vector<1x128xf32>
    %292 = vector.broadcast %290 : vector<1x1xf32> to vector<1x128xf32>
    %293 = arith.addf %291, %292 : vector<1x128xf32>
    %294 = math.absf %293 : vector<1x128xf32>
    %cst_187 = arith.constant 0.000000e+00 : f32
    %295 = vector.broadcast %cst_187 : f32 to vector<1x128xf32>
    %296 = arith.subf %295, %294 : vector<1x128xf32>
    %297 = math.exp %296 : vector<1x128xf32>
    %cst_188 = arith.constant 1.000000e+00 : f32
    %298 = vector.broadcast %cst_188 : f32 to vector<1x128xf32>
    %299 = arith.addf %298, %297 : vector<1x128xf32>
    %300 = tpu.reciprocal %299 {approx = true} : vector<1x128xf32> -> vector<1x128xf32>
    %cst_189 = arith.constant 0.000000e+00 : f32
    %301 = vector.broadcast %cst_189 : f32 to vector<1x128xf32>
    %302 = arith.cmpf oge, %293, %301 : vector<1x128xf32>
    %303 = arith.mulf %297, %300 : vector<1x128xf32>
    %304 = arith.select %302, %300, %303 : vector<1x128xi1>, vector<1x128xf32>
    %c0_190 = arith.constant 0 : index
    %c0_191 = arith.constant 0 : index
    %305 = vector.load %arg4[%c0_190, %c0_191] : memref<1x128xf32, #tpu.memory_space<vmem>>, vector<1x128xf32>
    tpu.vector_store %arg4[%c0_190, %c0_191], %304 {strides = array<i32>} : memref<1x128xf32, #tpu.memory_space<vmem>>, vector<1x128xf32>,
    return
  }
}

</mosaic_0001>

<bundles_post_ra>
// kernel: edge_classifier_forward.1
= control target key start
LH: loop header
LB: loop body
LE: loop exit
PB: predicated region body
PF: predicated region fallthrough
CT: control target
= control target key end

     0   :  { %9 = vsyncpa [#allocation3], 0  ;;  %s13971_s0 = inlined_call_operand.hbm [shape: f32[64,6], index: 0, kind: input, shape index: {}]   ;;  %s13972_s1 = inlined_call_operand.hbm [shape: f32[128,4], index: 1, kind: input, shape index: {}]   ;;  %s13973_s2 = inlined_call_operand.hbm [shape: bf16[256,64], index: 2, kind: input, shape index: {}]   ;;  %s13974_s3 = inlined_call_operand.hbm [shape: f32[1560,128], index: 3, kind: input, shape index: {}]   ;;  %s13975_s4 = inlined_call_operand.hbm [shape: f32[1,128], index: 4, kind: output, shape index: {}]  }
   0x1   :  { %10 = vsyncpa [#allocation6], 0 }
   0x2   :  { %11 = vsyncpa [#allocation9], 0 }
   0x3   :  { %12 = vsyncpa [#allocation4], 0  ;;  %s12546_s15 = smov [#allocation5]   ;;  %s12547_s17 = smov [#allocation2]  }
   0x4   :  { %s30_s16 = sshll.u32 %s12546_s15, 4  ;;  %s18_s18 = sshll.u32 %s12547_s17, 4  ;;  %s31_s16 = int_to_ptr.vmem [resolvable:$true] %s30_s16  ;;  %s12587_s18 = int_to_ptr.vmem [resolvable:$true] %s18_s18 }
   0x5   :  { %s12428_s21 = scalar_lea.hbm %s13972_s1, 2048 }
   0x6   :  { %p12429_p0 = scmp.ne.s32.totalorder %s13972_s1, %s12428_s21  ;;  %p12432_p1 = scmp.lt.u32.totalorder %s12428_s21, %s13972_s1 }
   0x8   :  { %p12434_p2 = pnand %p12432_p1, %p12429_p0 }
   0xa   :  { %12437 = shalt.err (!%p12434_p2)
}
   0xb   :  { %s12438_s26 = scalar_lea.vmem %s31_s16, 2048  ;;  %p12443_p4 = scmp.lt.s32.totalorder %s31_s16, %s31_s16 }
   0xc   :  { %p12439_p3 = scmp.ne.s32.totalorder %s31_s16, %s12438_s26  ;;  %p12444_p5 = scmp.lt.s32.totalorder %s12438_s26, %s12438_s26 }
   0xe   :  { %p12445_p6 = por %p12444_p5, %p12443_p4 }
  0x10   :  { %p12446_p7 = pnand %p12445_p6, %p12439_p3 }
  0x12   :  { %12449 = shalt.err (!%p12446_p7)
}
  0x13   :  { %s12548_s27 = smov 128   ;;  %s12549_s28 = smov 8  }
  0x14   :  { %36 = dma.hbm_to_vmem [thread:$0]  %s13972_s1, 2048, %s31_s16, [#allocation6], %s12548_s27, %s12548_s27, %s12549_s28  }
  0x15   :  { %s12450_s7 = scalar_lea.hbm %s13971_s0, 1024 }
  0x16   :  { %p12451_p8 = scmp.ne.s32.totalorder %s13971_s0, %s12450_s7  ;;  %p12454_p9 = scmp.lt.u32.totalorder %s12450_s7, %s13971_s0 }
  0x18   :  { %p12456_p10 = pnand %p12454_p9, %p12451_p8 }
  0x1a   :  { %12459 = shalt.err (!%p12456_p10)
}
  0x1b   :  { %s12460_s12 = scalar_lea.vmem %s12587_s18, 1024  ;;  %p12465_p12 = scmp.lt.s32.totalorder %s12587_s18, %s12587_s18 }
  0x1c   :  { %p12461_p11 = scmp.ne.s32.totalorder %s12587_s18, %s12460_s12  ;;  %p12466_p13 = scmp.lt.s32.totalorder %s12460_s12, %s12460_s12 }
  0x1e   :  { %p12467_p0 = por %p12466_p13, %p12465_p12 }
  0x20   :  { %p12468_p1 = pnand %p12467_p0, %p12461_p11 }
  0x22   :  { %12471 = shalt.err (!%p12468_p1)
}
  0x23   :  { %24 = dma.hbm_to_vmem [thread:$0]  %s13971_s0, 1024, %s12587_s18, [#allocation3], %s12548_s27, %s12548_s27, %s12549_s28  }
  0x24   :  { %s12550_s14 = smov [#allocation7]   ;;  %s12472_s19 = scalar_lea.hbm %s13973_s2, 2048 }
  0x25   :  { %s42_s15 = sshll.u32 %s12550_s14, 4  ;;  %p12473_p2 = scmp.ne.s32.totalorder %s13973_s2, %s12472_s19  ;;  %s43_s15 = int_to_ptr.vmem [resolvable:$true] %s42_s15 }
  0x26   :  { %p12476_p3 = scmp.lt.u32.totalorder %s12472_s19, %s13973_s2 }
  0x28   :  { %p12478_p4 = pnand %p12476_p3, %p12473_p2 }
  0x2a   :  { %12481 = shalt.err (!%p12478_p4)
}
  0x2b   :  { %s12482_s24 = scalar_lea.vmem %s43_s15, 2048  ;;  %p12487_p6 = scmp.lt.s32.totalorder %s43_s15, %s43_s15 }
  0x2c   :  { %p12483_p5 = scmp.ne.s32.totalorder %s43_s15, %s12482_s24  ;;  %p12488_p7 = scmp.lt.s32.totalorder %s12482_s24, %s12482_s24 }
  0x2e   :  { %p12489_p8 = por %p12488_p7, %p12487_p6 }
  0x30   :  { %p12490_p9 = pnand %p12489_p8, %p12483_p5 }
  0x32   :  { %12493 = shalt.err (!%p12490_p9)
}
  0x33   :  { %s12551_s0 = smov 64   ;;  %s12552_s18 = smov 4  }
  0x34   :  { %48 = dma.hbm_to_vmem [thread:$0]  %s13973_s2, 2048, %s43_s15, [#allocation6], %s12551_s0, %s12551_s0, %s12552_s18  }
  0x35   :  { %s12553_s29 = smov [#allocation8]   ;;  %s12494_s7 = scalar_lea.hbm %s13974_s3, 24960 }
  0x36   :  { %s54_s30 = sshll.u32 %s12553_s29, 4  ;;  %p12495_p10 = scmp.ne.s32.totalorder %s13974_s3, %s12494_s7  ;;  %s55_s30 = int_to_ptr.vmem [resolvable:$true] %s54_s30 }
  0x37   :  { %p12498_p11 = scmp.lt.u32.totalorder %s12494_s7, %s13974_s3 }
  0x39   :  { %p12500_p12 = pnand %p12498_p11, %p12495_p10 }
  0x3b   :  { %12503 = shalt.err (!%p12500_p12)
}
  0x3c   :  { %s12504_s12 = scalar_lea.vmem %s55_s30, 24960  ;;  %p12509_p0 = scmp.lt.s32.totalorder %s55_s30, %s55_s30 }
  0x3d   :  { %p12505_p13 = scmp.ne.s32.totalorder %s55_s30, %s12504_s12  ;;  %p12510_p1 = scmp.lt.s32.totalorder %s12504_s12, %s12504_s12 }
  0x3f   :  { %p12511_p2 = por %p12510_p1, %p12509_p0 }
  0x41   :  { %p12512_p3 = pnand %p12511_p2, %p12505_p13 }
  0x43   :  { %12515 = shalt.err (!%p12512_p3)
}
  0x44   :  { %60 = dma.hbm_to_vmem [thread:$0]  %s13974_s3, 24960, %s55_s30, [#allocation9], %s12548_s27, %s12548_s27, %s12549_s28  }
  0x45   :  { %12538 = dma.done.wait [#allocation3], 1024  }
  0x46   :  { %12539 = vsyncadd [#allocation3], 4294966272 }
  0x47   :  { %12540 = dma.done.wait [#allocation6], 4096  }
  0x48   :  { %12541 = vsyncadd [#allocation6], 4294963200 }
  0x49   :  { %12542 = dma.done.wait [#allocation9], 24960  }
  0x4a   :  { %12543 = vsyncadd [#allocation9], 4294942336  ;;  %vm113_vm0 = vcmask 1045504   ;;  %vm88_vm1 = vcmask 48128   ;;  %v83_v0 = vld [vmem:[#allocation8 + $0x8] sm:$0x3f] }
  0x4b   :  { %v74_v1 = vld [vmem:[#allocation2] sm:$0xff]  ;;  %v75_v2 = vld [vmem:[#allocation2 + $0x8] sm:$0xff]  ;;  %10614 = vmatprep.subr.msk.mxu0 %vm113_vm0, %v83_v0  ;;  %v76_v3 = vld [vmem:[#allocation2 + $0x10] sm:$0xff]  ;;  %vm444_vm2 = vcmask 1043456   ;;  %vm395_vm3 = vcmask 31744   ;;  %vm243_vm4 = vcmask 523264  }
  0x4c   :  { %10616 = vmatprep.mubr.msk.f32.mxu0 %vm88_vm1, %v74_v1  ;;  %10615 = vmatpush3.msk.msra.mxu0 %vm113_vm0, %v83_v0  ;;  %v390_v4 = vld [vmem:[#allocation8 + $0x60] sm:$0xf]  ;;  %v77_v5 = vld [vmem:[#allocation2 + $0x18] sm:$0xff]  ;;  %v79_v9 = vld [vmem:[#allocation2 + $0x28] sm:$0xff]  ;;  %vm12554_vm5 = vmmov 1   ;;  %vm820_vm7 = vcmask 64512  }
  0x4d   :  { %10617 = vmatmul.mubr.msk.f32.vlgmr.msra.gmra.mrb[0].mxu0 %vm88_vm1, %v75_v2  ;;  %10656 = vmatprep.subr.msk.mxu0 %vm444_vm2, %v390_v4  ;;  %v78_v6 = vld [vmem:[#allocation2 + $0x20] sm:$0xff]  ;;  %v231_v7 = vld [vmem:[#allocation8 + $0x18] sm:$0xff]  ;;  %v233_v11 = vld [vmem:[#allocation8 + $0x28] sm:$0xff]  ;;  %vm1417_vm8 = vcmask 97280   ;;  %vm1675_vm9 = vcmask 261120   ;;  %vm12558_vm11 = vmmov 0  }
  0x4e   :  { %10619 = vmatprep.mubr.msk.f32.mxu0 %vm88_vm1, %v76_v3  ;;  %10657 = vmatpush3.msk.msra.mxu0 %vm444_vm2, %v390_v4  ;;  %v232_v8 = vld [vmem:[#allocation8 + $0x20] sm:$0xff]  ;;  %v80_v12 = vld [vmem:[#allocation2 + $0x30] sm:$0xff]  ;;  %v81_v14 = vld [vmem:[#allocation2 + $0x38] sm:$0xff]  ;;  %s12561_s3 = smov [#allocation10]  }
  0x4f   :  { %v11963_v10 = vpack.c.bf16 %v232_v8, %v231_v7  ;;  %v234_v13 = vld [vmem:[#allocation8 + $0x30] sm:$0xff]  ;;  %v235_v16 = vld [vmem:[#allocation8 + $0x38] sm:$0xff]  ;;  %v236_v17 = vld [vmem:[#allocation8 + $0x40] sm:$0xff]  ;;  %s9141_s27 = sshll.u32 %s12561_s3, 4  ;;  %s9142_s27 = int_to_ptr.vmem [resolvable:$true] %s9141_s27 }
  0x50   :  { %v11967_v15 = vpack.c.bf16 %v234_v13, %v233_v11  ;;  %v373_v18 = vld [vmem:[#allocation5] sm:$0xff]  ;;  %v11971_v19 = vpack.c.bf16 %v236_v17, %v235_v16  ;;  %v374_v20 = vld [vmem:[#allocation5 + $0x8] sm:$0xff]  ;;  %v375_v21 = vld [vmem:[#allocation5 + $0x10] sm:$0xff]  ;;  %s12516_s28 = scalar_lea.vmem %s9142_s27, 16  ;;  %s12520_s13 = scalar_lea.vmem %s9142_s27, 32 }
  0x51   :  { %10620 = vmatmul.mubr.msk.f32.gmra.mrb[2].mxu0 %vm88_vm1, %v77_v5  ;;  %11964 = vmatprep.subr.bf16.mxu1 %v11963_v10  ;;  %v376_v22 = vld [vmem:[#allocation5 + $0x18] sm:$0xff]  ;;  %v377_v23 = vld [vmem:[#allocation5 + $0x20] sm:$0xff]  ;;  %v378_v24 = vld [vmem:[#allocation5 + $0x28] sm:$0xff]  ;;  %p12517_p4 = scmp.ne.s32.totalorder %s9142_s27, %s12516_s28  ;;  %p12521_p5 = scmp.lt.s32.totalorder %s9142_s27, %s9142_s27 }
  0x52   :  { %10622 = vmatprep.mubr.msk.f32.mxu0 %vm88_vm1, %v78_v6  ;;  %11966 = vmatpush3.bf16.msra.mxu1 %v11963_v10  ;;  %v379_v25 = vld [vmem:[#allocation5 + $0x30] sm:$0xff]  ;;  %v380_v26 = vld [vmem:[#allocation5 + $0x38] sm:$0xff]  ;;  %v381_v27 = vld [vmem:[#allocation5 + $0x40] sm:$0xff]  ;;  %p12522_p6 = scmp.lt.s32.totalorder %s12520_s13, %s12516_s28 }
  0x53   :  { %11968 = vmatprep.subr.bf16.mxu1 %v11967_v15  ;;  %v382_v28 = vld [vmem:[#allocation5 + $0x48] sm:$0xff]  ;;  %v383_v29 = vld [vmem:[#allocation5 + $0x50] sm:$0xff]  ;;  %v384_v30 = vld [vmem:[#allocation5 + $0x58] sm:$0xff] }
  0x54   :  { %v385_v31 = vld [vmem:[#allocation5 + $0x60] sm:$0xff]  ;;  %v386_v32 = vld [vmem:[#allocation5 + $0x68] sm:$0xff]  ;;  %v387_v33 = vld [vmem:[#allocation5 + $0x70] sm:$0xff]  ;;  %p12523_p7 = por %p12522_p6, %p12521_p5 }
  0x55   :  { %10623 = vmatmul.mubr.msk.f32.gmra.mrb[4].mxu0 %vm88_vm1, %v79_v9  ;;  %v388_v34 = vld [vmem:[#allocation5 + $0x78] sm:$0xff]  ;;  %v237_v35 = vld [vmem:[#allocation8 + $0x48] sm:$0xff]  ;;  %v238_v36 = vld [vmem:[#allocation8 + $0x50] sm:$0xff] }
  0x56   :  { %10625 = vmatprep.mubr.msk.f32.mxu0 %vm88_vm1, %v80_v12  ;;  %11970 = vmatpush3.bf16.msra.mxu1 %v11967_v15  ;;  %v11975_v37 = vpack.c.bf16 %v238_v36, %v237_v35  ;;  %v610_v38 = vld [vmem:[#allocation8 + $0x70] sm:$0xff]  ;;  %v611_v39 = vld [vmem:[#allocation8 + $0x78] sm:$0xff]  ;;  %v612_v40 = vld [vmem:[#allocation8 + $0x80] sm:$0xff]  ;;  %p12524_p8 = pnand %p12523_p7, %p12517_p4 }
  0x57   :  { %11972 = vmatprep.subr.bf16.mxu1 %v11971_v19  ;;  %v11979_v41 = vpack.c.bf16 %v611_v39, %v610_v38  ;;  %v613_v42 = vld [vmem:[#allocation8 + $0x88] sm:$0xff]  ;;  %v614_v44 = vld [vmem:[#allocation8 + $0x90] sm:$0xff]  ;;  %v615_v45 = vld [vmem:[#allocation8 + $0x98] sm:$0xff] }
  0x58   :  { %v11983_v43 = vpack.c.bf16 %v613_v42, %v612_v40  ;;  %v11987_v46 = vpack.c.bf16 %v615_v45, %v614_v44  ;;  %v616_v47 = vld [vmem:[#allocation8 + $0xa0] sm:$0xff]  ;;  %v617_v48 = vld [vmem:[#allocation8 + $0xa8] sm:$0xff]  ;;  %v12682_v9 = vld [vmem:[#allocation8 + $0x58] ss:$0 sm:$0xff] }
  0x59   :  { %10626 = vmatmul.mubr.msk.f32.gmra.mrb[6].mxu0 %vm88_vm1, %v81_v14  ;;  %11980 = vmatprep.subr.bf16.mxu0 %v11979_v41  ;;  %v11991_v49 = vpack.c.bf16 %v617_v48, %v616_v47  ;;  %v9152_v50 = vld [vmem:[#allocation8] ss:$0 sm:$0xff]  ;;  %vm12720_vm6 = vmpackc.low %vm444_vm2, %vm12554_vm5 }
  0x5a   :  { %10658 = vmatprep.mubr.msk.f32.mxu0 %vm395_vm3, %v373_v18  ;;  %11974 = vmatpush3.bf16.msra.mxu1 %v11971_v19  ;;  %vm13911_vm10 = vmpackc.low %vm1417_vm8, %vm1417_vm8 }
  0x5b   :  { %11976 = vmatprep.subr.bf16.mxu1 %v11975_v37 }
  0x5d   :  { %10659 = vmatmul.mubr.msk.f32.vlgmr.msra.gmra.mrb[8].mxu0 %vm395_vm3, %v374_v20 }
  0x5e   :  { %10661 = vmatprep.mubr.msk.f32.mxu0 %vm395_vm3, %v375_v21  ;;  %11978 = vmatpush3.bf16.msra.mxu1 %v11975_v37 }
  0x5f   :  { %12267 = vmatprep.subr.bf16.mxu1 %v11979_v41  ;;  %11982 = vmatpush3.bf16.msra.mxu0 %v11979_v41 }
  0x60   :  { %11984 = vmatprep.subr.bf16.mxu0 %v11983_v43 }
  0x61   :  { %10662 = vmatmul.mubr.msk.f32.gmra.mrb[10].mxu0 %vm395_vm3, %v376_v22 }
  0x62   :  { %10664 = vmatprep.mubr.msk.f32.mxu0 %vm395_vm3, %v377_v23 }
  0x63   :  { %11986 = vmatpush3.bf16.msra.mxu0 %v11983_v43 }
  0x64   :  { %11988 = vmatprep.subr.bf16.mxu0 %v11987_v46 }
  0x65   :  { %10665 = vmatmul.mubr.msk.f32.gmra.mrb[12].mxu0 %vm395_vm3, %v378_v24 }
  0x66   :  { %10667 = vmatprep.mubr.msk.f32.mxu0 %vm395_vm3, %v379_v25 }
  0x67   :  { %11990 = vmatpush3.bf16.msra.mxu0 %v11987_v46 }
  0x68   :  { %11992 = vmatprep.subr.bf16.mxu0 %v11991_v49 }
  0x69   :  { %10668 = vmatmul.mubr.msk.f32.gmra.mrb[14].mxu0 %vm395_vm3, %v380_v26 }
  0x6a   :  { %10670 = vmatprep.mubr.msk.f32.mxu0 %vm395_vm3, %v381_v27 }
  0x6b   :  { %11994 = vmatpush3.bf16.msra.mxu0 %v11991_v49 }
  0x6d   :  { %10671 = vmatmul.mubr.msk.f32.gmra.mrb[16].mxu0 %vm395_vm3, %v382_v28 }
  0x6e   :  { %10673 = vmatprep.mubr.msk.f32.mxu0 %vm395_vm3, %v383_v29 }
  0x71   :  { %10674 = vmatmul.mubr.msk.f32.gmra.mrb[18].mxu0 %vm395_vm3, %v384_v30 }
  0x72   :  { %10676 = vmatprep.mubr.msk.f32.mxu0 %vm395_vm3, %v385_v31 }
  0x75   :  { %10677 = vmatmul.mubr.msk.f32.gmra.mrb[20].mxu0 %vm395_vm3, %v386_v32 }
  0x76   :  { %10679 = vmatprep.mubr.msk.f32.mxu0 %vm395_vm3, %v387_v33 }
  0x79   :  { %10680 = vmatmul.mubr.msk.f32.gmra.mrb[22].mxu0 %vm395_vm3, %v388_v34 }
 0x120   :  { %v10618_v51 = vpop.f32.mrb[0].mxu0 }
 0x121   :  { %v189_v52 = vadd.f32 %v10618_v51, %v9152_v50  ;;  %v183_v53 = vpop.f32.mrb[1].mxu0 }
 0x122   :  { %v184_v54 = vadd.f32 %v9152_v50, %v183_v53 }
 0x123   :  { %v223_v57 = vmax.f32 %v189_v52, 0.0 }
 0x124   :  { %v10621_v55 = vpop.f32.mrb[2].mxu0  ;;  %v222_v56 = vmax.f32 %v184_v54, 0.0 }
 0x125   :  { %v199_v58 = vadd.f32 %v10621_v55, %v9152_v50  ;;  %v193_v59 = vpop.f32.mrb[3].mxu0 }
 0x126   :  { %v194_v60 = vadd.f32 %v9152_v50, %v193_v59  ;;  %10644 = vmatprep.mubr.msk.f32.mxu1 %vm243_vm4, %v222_v56 }
 0x127   :  { %10645 = vmatmul.mubr.msk.f32.vlgmr.msra.gmra.mrb[0].mxu1 %vm243_vm4, %v223_v57  ;;  %v225_v63 = vmax.f32 %v199_v58, 0.0 }
 0x128   :  { %v224_v61 = vmax.f32 %v194_v60, 0.0  ;;  %v10624_v62 = vpop.f32.mrb[4].mxu0  ;;  %12271 = vmatpush3.bf16.msra.mxu1 %v11979_v41  ;;  %v816_v60 = vld [vmem:[#allocation8 + $0xb8] sm:$0xff] }
 0x129   :  { %v209_v0 = vadd.f32 %v10624_v62, %v9152_v50  ;;  %v203_v1 = vpop.f32.mrb[5].mxu0  ;;  %12268 = vmatprep.subr.bf16.mxu1 %v11983_v43  ;;  %10722 = vmatprep.subr.mxu0 %v816_v60 }
 0x12a   :  { %v204_v2 = vadd.f32 %v9152_v50, %v203_v1  ;;  %10647 = vmatprep.mubr.msk.f32.mxu1 %vm243_vm4, %v224_v61  ;;  %v817_v61 = vld [vmem:[#allocation8 + $0xc0] sm:$0xff] }
 0x12b   :  { %10648 = vmatmul.mubr.msk.f32.gmra.mrb[2].mxu1 %vm243_vm4, %v225_v63  ;;  %v227_v5 = vmax.f32 %v209_v0, 0.0  ;;  %v818_v63 = vld [vmem:[#allocation8 + $0xc8] sm:$0xff]  ;;  %v819_v0 = vld [vmem:[#allocation8 + $0xd0] sm:$0xf] }
 0x12c   :  { %v226_v3 = vmax.f32 %v204_v2, 0.0  ;;  %v10627_v4 = vpop.f32.mrb[6].mxu0  ;;  %12272 = vmatpush3.bf16.msra.mxu1 %v11983_v43  ;;  %v11995_v1 = vpack.c.bf16 %v819_v0, %v818_v63  ;;  %v9162_v2 = vld [vmem:[#allocation8 + $0x10] ss:$0 sm:$0xff] }
 0x12d   :  { %v219_v6 = vadd.f32 %v10627_v4, %v9152_v50  ;;  %v213_v7 = vpop.f32.mrb[7].mxu0  ;;  %12269 = vmatprep.subr.bf16.mxu1 %v11987_v46 }
 0x12e   :  { %v214_v8 = vadd.f32 %v9152_v50, %v213_v7  ;;  %10650 = vmatprep.mubr.msk.f32.mxu1 %vm243_vm4, %v226_v3 }
 0x12f   :  { %10651 = vmatmul.mubr.msk.f32.gmra.mrb[4].mxu1 %vm243_vm4, %v227_v5  ;;  %v229_v12 = vmax.f32 %v219_v6, 0.0 }
 0x130   :  { %v228_v10 = vmax.f32 %v214_v8, 0.0  ;;  %v10660_v11 = vpop.f32.mrb[8].mxu0  ;;  %12273 = vmatpush3.bf16.msra.mxu1 %v11987_v46 }
 0x131   :  { %v520_v13 = vadd.f32 %v10660_v11, %v12682_v9  ;;  %v514_v14 = vpop.f32.mrb[9].mxu0  ;;  %12270 = vmatprep.subr.bf16.mxu1 %v11991_v49 }
 0x132   :  { %10653 = vmatprep.mubr.msk.f32.mxu1 %vm243_vm4, %v228_v10  ;;  %v515_v15 = vadd.f32 %v12682_v9, %v514_v14 }
 0x133   :  { %10654 = vmatmul.mubr.msk.f32.gmra.mrb[6].mxu1 %vm243_vm4, %v229_v12  ;;  %v594_v16 = vmax.f32 %v520_v13, 0.0 }
 0x134   :  { %v593_v17 = vmax.f32 %v515_v15, 0.0  ;;  %v10663_v18 = vpop.f32.mrb[10].mxu0  ;;  %12274 = vmatpush3.bf16.msra.mxu1 %v11991_v49 }
 0x135   :  { %v530_v19 = vadd.f32 %v10663_v18, %v12682_v9  ;;  %v524_v20 = vpop.f32.mrb[11].mxu0  ;;  %10736 = vmatprep.subr.mxu1 %v817_v61  ;;  %v9189_v18 = vld [vmem:[#allocation8 + $0x68] ss:$0 sm:$0xff] }
 0x136   :  { %v525_v21 = vadd.f32 %v12682_v9, %v524_v20  ;;  %10698 = vmatprep.mubr.msk.f32.mxu0 %vm243_vm4, %v593_v17 }
 0x137   :  { %v596_v22 = vmax.f32 %v530_v19, 0.0  ;;  %10699 = vmatmul.mubr.msk.f32.vlgmr.msra.gmra.mrb[24].mxu0 %vm243_vm4, %v594_v16 }
 0x138   :  { %v595_v23 = vmax.f32 %v525_v21, 0.0  ;;  %v10666_v24 = vpop.f32.mrb[12].mxu0  ;;  %10723 = vmatpush3.msra.mxu0 %v816_v60  ;;  %v12814_v60 = vld [vmem:[#allocation7 + $0x38] sm:$0xff]  }
 0x139   :  { %v540_v25 = vadd.f32 %v10666_v24, %v12682_v9  ;;  %v534_v26 = vpop.f32.mrb[13].mxu0 }
 0x13a   :  { %v535_v27 = vadd.f32 %v12682_v9, %v534_v26  ;;  %10701 = vmatprep.mubr.msk.f32.mxu0 %vm243_vm4, %v595_v23 }
 0x13b   :  { %v598_v28 = vmax.f32 %v540_v25, 0.0  ;;  %10702 = vmatmul.mubr.msk.f32.gmra.mrb[26].mxu0 %vm243_vm4, %v596_v22 }
 0x13c   :  { %v597_v29 = vmax.f32 %v535_v27, 0.0  ;;  %v10669_v30 = vpop.f32.mrb[14].mxu0 }
 0x13d   :  { %v550_v31 = vadd.f32 %v10669_v30, %v12682_v9  ;;  %v544_v32 = vpop.f32.mrb[15].mxu0 }
 0x13e   :  { %v545_v33 = vadd.f32 %v12682_v9, %v544_v32  ;;  %10704 = vmatprep.mubr.msk.f32.mxu0 %vm243_vm4, %v597_v29 }
 0x13f   :  { %v600_v34 = vmax.f32 %v550_v31, 0.0  ;;  %10705 = vmatmul.mubr.msk.f32.gmra.mrb[28].mxu0 %vm243_vm4, %v598_v28 }
 0x140   :  { %v599_v35 = vmax.f32 %v545_v33, 0.0  ;;  %v10672_v36 = vpop.f32.mrb[16].mxu0 }
 0x141   :  { %v560_v37 = vadd.f32 %v10672_v36, %v12682_v9  ;;  %v554_v38 = vpop.f32.mrb[17].mxu0 }
 0x142   :  { %v555_v39 = vadd.f32 %v12682_v9, %v554_v38  ;;  %10707 = vmatprep.mubr.msk.f32.mxu1 %vm243_vm4, %v599_v35 }
 0x143   :  { %v602_v40 = vmax.f32 %v560_v37, 0.0  ;;  %10708 = vmatmul.mubr.msk.f32.vlgmr.msra.gmra.mrb[8].mxu1 %vm243_vm4, %v600_v34 }
 0x144   :  { %v601_v41 = vmax.f32 %v555_v39, 0.0  ;;  %v10675_v42 = vpop.f32.mrb[18].mxu0  ;;  %10737 = vmatpush3.msra.mxu1 %v817_v61 }
 0x145   :  { %v570_v43 = vadd.f32 %v10675_v42, %v12682_v9  ;;  %v564_v44 = vpop.f32.mrb[19].mxu0  ;;  %11997 = vmatprep.subr.msk.bf16.mxu1 %vm12720_vm6, %v11995_v1 }
 0x146   :  { %v565_v45 = vadd.f32 %v12682_v9, %v564_v44  ;;  %10710 = vmatprep.mubr.msk.f32.mxu1 %vm243_vm4, %v601_v41 }
 0x147   :  { %v604_v46 = vmax.f32 %v570_v43, 0.0  ;;  %10711 = vmatmul.mubr.msk.f32.gmra.mrb[10].mxu1 %vm243_vm4, %v602_v40 }
 0x148   :  { %v603_v47 = vmax.f32 %v565_v45, 0.0  ;;  %v10678_v48 = vpop.f32.mrb[20].mxu0 }
 0x149   :  { %v580_v49 = vadd.f32 %v10678_v48, %v12682_v9  ;;  %v574_v50 = vpop.f32.mrb[21].mxu0 }
 0x14a   :  { %v575_v51 = vadd.f32 %v12682_v9, %v574_v50  ;;  %10713 = vmatprep.mubr.msk.f32.mxu1 %vm243_vm4, %v603_v47 }
 0x14b   :  { %v606_v52 = vmax.f32 %v580_v49, 0.0  ;;  %10714 = vmatmul.mubr.msk.f32.gmra.mrb[12].mxu1 %vm243_vm4, %v604_v46 }
 0x14c   :  { %v605_v53 = vmax.f32 %v575_v51, 0.0  ;;  %v10681_v54 = vpop.f32.mrb[22].mxu0 }
 0x14d   :  { %v590_v55 = vadd.f32 %v10681_v54, %v12682_v9  ;;  %v584_v56 = vpop.f32.mrb[23].mxu0  ;;  %v12796_v54 = vld [vmem:[#allocation7 + $0x8] sm:$0xff]  }
 0x14e   :  { %v585_v57 = vadd.f32 %v12682_v9, %v584_v56  ;;  %10716 = vmatprep.mubr.msk.f32.mxu1 %vm243_vm4, %v605_v53  ;;  %v12793_v53 = vld [vmem:[#allocation7] sm:$0xff]   ;;  %v12802_v56 = vld [vmem:[#allocation7 + $0x18] sm:$0xff]  }
 0x14f   :  { %v608_v58 = vmax.f32 %v590_v55, 0.0  ;;  %10717 = vmatmul.mubr.msk.f32.gmra.mrb[14].mxu1 %vm243_vm4, %v606_v52  ;;  %v12360_v52 = vld [vmem:[#allocation7 + $0x40] sm:$0xff]   ;;  %2521 = vxpose.xlu0.c.b16.start [1/8] (narrow) %v12793_v53, 64  ;;  %v12799_v55 = vld [vmem:[#allocation7 + $0x10] sm:$0xff]  }
 0x150   :  { %v607_v59 = vmax.f32 %v585_v57, 0.0  ;;  %v12805_v57 = vld [vmem:[#allocation7 + $0x20] sm:$0xff]  }
 0x152   :  { %10719 = vmatprep.mubr.msk.f32.mxu1 %vm243_vm4, %v607_v59  ;;  %v12811_v59 = vld [vmem:[#allocation7 + $0x30] sm:$0xff]  }
 0x153   :  { %10720 = vmatmul.mubr.msk.f32.gmra.mrb[16].mxu1 %vm243_vm4, %v608_v58  ;;  %2522 = vxpose.xlu0.c.b16.cont [2/8] (narrow) %v12796_v54, 64  ;;  %v12808_v58 = vld [vmem:[#allocation7 + $0x28] sm:$0xff]  }
 0x157   :  { %2523 = vxpose.xlu0.c.b16.cont [3/8] (narrow) %v12799_v55, 64 }
 0x15b   :  { %2524 = vxpose.xlu0.c.b16.cont [4/8] (narrow) %v12802_v56, 64 }
 0x15f   :  { %2525 = vxpose.xlu0.c.b16.cont [5/8] (narrow) %v12805_v57, 64 }
 0x163   :  { %2526 = vxpose.xlu0.c.b16.cont [6/8] (narrow) %v12808_v58, 64 }
 0x167   :  { %2527 = vxpose.xlu0.c.b16.cont [7/8] (narrow) %v12811_v59, 64 }
 0x16b   :  { %2528 = vxpose.xlu0.c.b16.end [8/8] (narrow) %v12814_v60, 64 }
 0x1fa   :  { %v10646_v3 = vpop.f32.mrb[0].mxu1 }
 0x1fb   :  { %v334_v4 = vpop.f32.mrb[1].mxu1  ;;  %v12728_v6 = vadd.f32 %v10646_v3, %v9162_v2 }
 0x1fc   :  { %v12726_v5 = vadd.f32 %v9162_v2, %v334_v4 }
 0x1fe   :  { %v10649_v7 = vpop.f32.mrb[2].mxu1  ;;  %10724 = vmatprep.mubr.msk.f32.mxu0 %vm820_vm7, %v12726_v5  ;;  %10738 = vmatprep.mubr.msk.f32.mxu1 %vm820_vm7, %v12726_v5 }
 0x1ff   :  { %v344_v8 = vpop.f32.mrb[3].mxu1  ;;  %10725 = vmatmul.mubr.msk.f32.vlgmr.msra.gmra.mrb[30].mxu0 %vm820_vm7, %v12728_v6  ;;  %10739 = vmatmul.mubr.msk.f32.vlgmr.msra.gmra.mrb[18].mxu1 %vm820_vm7, %v12728_v6  ;;  %v12742_v10 = vadd.f32 %v10649_v7, %v9162_v2 }
 0x200   :  { %v12738_v9 = vadd.f32 %v9162_v2, %v344_v8  ;;  %12000 = vmatpush3.bf16.msk.msra.mxu1 %vm12720_vm6, %v11995_v1 }
 0x202   :  { %v10652_v11 = vpop.f32.mrb[4].mxu1  ;;  %10727 = vmatprep.mubr.msk.f32.mxu0 %vm820_vm7, %v12738_v9  ;;  %10741 = vmatprep.mubr.msk.f32.mxu1 %vm820_vm7, %v12738_v9 }
 0x203   :  { %v354_v12 = vpop.f32.mrb[5].mxu1  ;;  %10728 = vmatmul.mubr.msk.f32.gmra.mrb[32].mxu0 %vm820_vm7, %v12742_v10  ;;  %10742 = vmatmul.mubr.msk.f32.gmra.mrb[20].mxu1 %vm820_vm7, %v12742_v10  ;;  %v12754_v14 = vadd.f32 %v10652_v11, %v9162_v2 }
 0x204   :  { %v12752_v13 = vadd.f32 %v9162_v2, %v354_v12 }
 0x206   :  { %v10655_v15 = vpop.f32.mrb[6].mxu1  ;;  %10730 = vmatprep.mubr.msk.f32.mxu0 %vm820_vm7, %v12752_v13  ;;  %10744 = vmatprep.mubr.msk.f32.mxu1 %vm820_vm7, %v12752_v13 }
 0x207   :  { %v364_v16 = vpop.f32.mrb[7].mxu1  ;;  %10731 = vmatmul.mubr.msk.f32.gmra.mrb[34].mxu0 %vm820_vm7, %v12754_v14  ;;  %10745 = vmatmul.mubr.msk.f32.gmra.mrb[22].mxu1 %vm820_vm7, %v12754_v14  ;;  %v12766_v19 = vadd.f32 %v10655_v15, %v9162_v2 }
 0x208   :  { %v12764_v17 = vadd.f32 %v9162_v2, %v364_v16 }
 0x20a   :  { %10733 = vmatprep.mubr.msk.f32.mxu0 %vm820_vm7, %v12764_v17  ;;  %10747 = vmatprep.mubr.msk.f32.mxu1 %vm820_vm7, %v12764_v17  ;;  %v10700_v20 = vpop.f32.mrb[24].mxu0 }
 0x20b   :  { %10734 = vmatmul.mubr.msk.f32.gmra.mrb[36].mxu0 %vm820_vm7, %v12766_v19  ;;  %10748 = vmatmul.mubr.msk.f32.gmra.mrb[24].mxu1 %vm820_vm7, %v12766_v19  ;;  %v742_v21 = vadd.f32 %v10700_v20, %v9189_v18  ;;  %v736_v22 = vpop.f32.mrb[25].mxu0 }
 0x20c   :  { %v737_v23 = vadd.f32 %v9189_v18, %v736_v22  ;;  %10758 = vmatprep.mubr.msk.bf16.mxu0 %vm243_vm4, %v12360_v52 }
 0x20e   :  { %v10703_v24 = vpop.f32.mrb[26].mxu0  ;;  %10802 = vmatprep.mubr.msk.f32.mxu1 %vm1417_vm8, %v737_v23 }
 0x20f   :  { %v752_v25 = vadd.f32 %v10703_v24, %v9189_v18  ;;  %v746_v26 = vpop.f32.mrb[27].mxu0  ;;  %10803 = vmatmul.mubr.msk.f32.vlgmr.msra.gmra.mrb[26].mxu1 %vm1417_vm8, %v742_v21 }
 0x210   :  { %v747_v27 = vadd.f32 %v9189_v18, %v746_v26 }
 0x212   :  { %v10706_v28 = vpop.f32.mrb[28].mxu0  ;;  %10805 = vmatprep.mubr.msk.f32.mxu1 %vm1417_vm8, %v747_v27 }
 0x213   :  { %v762_v29 = vadd.f32 %v10706_v28, %v9189_v18  ;;  %v756_v30 = vpop.f32.mrb[29].mxu0  ;;  %10806 = vmatmul.mubr.msk.f32.gmra.mrb[28].mxu1 %vm1417_vm8, %v752_v25 }
 0x214   :  { %v757_v31 = vadd.f32 %v9189_v18, %v756_v30  ;;  %v12361_v30 = vld [vmem:[#allocation7 + $0x48] sm:$0xff]  }
 0x216   :  { %v10709_v32 = vpop.f32.mrb[8].mxu1  ;;  %10808 = vmatprep.mubr.msk.f32.mxu1 %vm1417_vm8, %v757_v31 }
 0x217   :  { %v772_v33 = vadd.f32 %v10709_v32, %v9189_v18  ;;  %v766_v34 = vpop.f32.mrb[9].mxu1  ;;  %10809 = vmatmul.mubr.msk.f32.gmra.mrb[30].mxu1 %vm1417_vm8, %v762_v29  ;;  %v12362_v32 = vld [vmem:[#allocation7 + $0x50] sm:$0xff]  }
 0x218   :  { %v767_v35 = vadd.f32 %v9189_v18, %v766_v34 }
 0x21a   :  { %v10712_v36 = vpop.f32.mrb[10].mxu1  ;;  %10811 = vmatprep.mubr.msk.f32.mxu1 %vm1417_vm8, %v767_v35 }
 0x21b   :  { %v782_v37 = vadd.f32 %v10712_v36, %v9189_v18  ;;  %v776_v38 = vpop.f32.mrb[11].mxu1  ;;  %10812 = vmatmul.mubr.msk.f32.gmra.mrb[32].mxu1 %vm1417_vm8, %v772_v33  ;;  %v12363_v36 = vld [vmem:[#allocation7 + $0x58] sm:$0xff]  }
 0x21c   :  { %v777_v39 = vadd.f32 %v9189_v18, %v776_v38  ;;  %v12364_v38 = vld [vmem:[#allocation7 + $0x60] sm:$0xff]  }
 0x21e   :  { %v10715_v40 = vpop.f32.mrb[12].mxu1  ;;  %10814 = vmatprep.mubr.msk.f32.mxu1 %vm1417_vm8, %v777_v39 }
 0x21f   :  { %v792_v41 = vadd.f32 %v10715_v40, %v9189_v18  ;;  %v786_v42 = vpop.f32.mrb[13].mxu1  ;;  %10815 = vmatmul.mubr.msk.f32.gmra.mrb[34].mxu1 %vm1417_vm8, %v782_v37 }
 0x220   :  { %v787_v43 = vadd.f32 %v9189_v18, %v786_v42  ;;  %v12365_v42 = vld [vmem:[#allocation7 + $0x68] sm:$0xff]  }
 0x222   :  { %v10718_v44 = vpop.f32.mrb[14].mxu1  ;;  %10817 = vmatprep.mubr.msk.f32.mxu1 %vm1417_vm8, %v787_v43 }
 0x223   :  { %v802_v45 = vadd.f32 %v10718_v44, %v9189_v18  ;;  %v796_v46 = vpop.f32.mrb[15].mxu1  ;;  %10818 = vmatmul.mubr.msk.f32.gmra.mrb[36].mxu1 %vm1417_vm8, %v792_v41  ;;  %v12366_v44 = vld [vmem:[#allocation7 + $0x70] sm:$0xff]  }
 0x224   :  { %v797_v47 = vadd.f32 %v9189_v18, %v796_v46 }
 0x226   :  { %v10721_v48 = vpop.f32.mrb[16].mxu1  ;;  %10820 = vmatprep.mubr.msk.f32.mxu1 %vm1417_vm8, %v797_v47 }
 0x227   :  { %v812_v49 = vadd.f32 %v10721_v48, %v9189_v18  ;;  %v806_v50 = vpop.f32.mrb[17].mxu1  ;;  %10821 = vmatmul.mubr.msk.f32.gmra.mrb[38].mxu1 %vm1417_vm8, %v802_v45  ;;  %v12367_v48 = vld [vmem:[#allocation7 + $0x78] sm:$0xff]  }
 0x228   :  { %v807_v51 = vadd.f32 %v9189_v18, %v806_v50 }
 0x22a   :  { %10823 = vmatprep.mubr.msk.f32.mxu1 %vm1417_vm8, %v807_v51 }
 0x22b   :  { %10824 = vmatmul.mubr.msk.f32.gmra.mrb[40].mxu1 %vm1417_vm8, %v812_v49 }
 0x2d2   :  { %v10726_v61 = vpop.f32.mrb[30].mxu0  ;;  %v10740_v63 = vpop.f32.mrb[18].mxu1 }
 0x2d3   :  { %v911_v0 = vpop.f32.mrb[31].mxu0  ;;  %v1020_v1 = vpop.f32.mrb[19].mxu1 }
 0x2d4   :  { %v950_v2 = vpack.c.bf16 %v10726_v61, %v911_v0  ;;  %v1059_v3 = vpack.c.bf16 %v10740_v63, %v1020_v1  ;;  %v1670_v63 = vld [vmem:[#allocation8 + $0xf8] sm:$0xff]  ;;  %v1887_v0 = vld [vmem:[#allocation8 + $0x110] sm:$0xff] }
 0x2d6   :  { %v10729_v4 = vpop.f32.mrb[32].mxu0  ;;  %v10743_v7 = vpop.f32.mrb[20].mxu1  ;;  %10750 = vmatprep.subr.bf16.mxu0 %v1059_v3 }
 0x2d7   :  { %v921_v8 = vpop.f32.mrb[33].mxu0  ;;  %v1030_v11 = vpop.f32.mrb[21].mxu1  ;;  %10751 = vmatpush3.bf16.msra.mxu0 %v1059_v3 }
 0x2d8   :  { %v951_v12 = vpack.c.bf16 %v10729_v4, %v921_v8  ;;  %v1060_v15 = vpack.c.bf16 %v10743_v7, %v1030_v11 }
 0x2da   :  { %v10732_v16 = vpop.f32.mrb[34].mxu0  ;;  %v10746_v18 = vpop.f32.mrb[22].mxu1  ;;  %10752 = vmatprep.subr.bf16.mxu0 %v1060_v15 }
 0x2db   :  { %v931_v20 = vpop.f32.mrb[35].mxu0  ;;  %v1040_v21 = vpop.f32.mrb[23].mxu1  ;;  %10753 = vmatpush3.bf16.msra.mxu0 %v1060_v15 }
 0x2dc   :  { %v952_v22 = vpack.c.bf16 %v10732_v16, %v931_v20  ;;  %v1061_v23 = vpack.c.bf16 %v10746_v18, %v1040_v21 }
 0x2de   :  { %v10735_v24 = vpop.f32.mrb[36].mxu0  ;;  %v10749_v25 = vpop.f32.mrb[24].mxu1  ;;  %10754 = vmatprep.subr.bf16.mxu0 %v1061_v23 }
 0x2df   :  { %v941_v26 = vpop.f32.mrb[37].mxu0  ;;  %v1050_v27 = vpop.f32.mrb[25].mxu1  ;;  %10755 = vmatpush3.bf16.msra.mxu0 %v1061_v23 }
 0x2e0   :  { %v953_v28 = vpack.c.bf16 %v10735_v24, %v941_v26  ;;  %v1062_v29 = vpack.c.bf16 %v10749_v25, %v1050_v27 }
 0x2e2   :  { %10756 = vmatprep.subr.bf16.mxu0 %v1062_v29  ;;  %v12817_v31 = vpop.f32.mrb[26].mxu1 }
 0x2e3   :  { %10757 = vmatpush3.bf16.msra.mxu0 %v1062_v29  ;;  %v1535_v33 = vpop.f32.mrb[27].mxu1 }
 0x2e4   :  { %10774 = vmatprep.subr.bf16.mxu0 %v950_v2 }
 0x2e6   :  { %10759 = vmatmul.mubr.msk.bf16.vlgmr.msra.gmra.mrb[40].mxu0 %vm243_vm4, %v12361_v30  ;;  %v10807_v34 = vpop.f32.mrb[28].mxu1 }
 0x2e7   :  { %10775 = vmatpush3.bf16.msra.mxu0 %v950_v2  ;;  %10762 = vmatprep.mubr.msk.bf16.mxu0 %vm243_vm4, %v12362_v32  ;;  %v1545_v35 = vpop.f32.mrb[29].mxu1 }
 0x2e8   :  { %10776 = vmatprep.subr.bf16.mxu0 %v951_v12 }
 0x2ea   :  { %v12821_v37 = vpop.f32.mrb[30].mxu1 }
 0x2eb   :  { %10777 = vmatpush3.bf16.msra.mxu0 %v951_v12  ;;  %v12823_v39 = vpop.f32.mrb[31].mxu1 }
 0x2ec   :  { %10778 = vmatprep.subr.bf16.mxu0 %v952_v22 }
 0x2ee   :  { %10763 = vmatmul.mubr.msk.bf16.gmra.mrb[44].mxu0 %vm243_vm4, %v12363_v36  ;;  %v12826_v40 = vpop.f32.mrb[32].mxu1 }
 0x2ef   :  { %10779 = vmatpush3.bf16.msra.mxu0 %v952_v22  ;;  %10766 = vmatprep.mubr.msk.bf16.mxu0 %vm243_vm4, %v12364_v38  ;;  %v1565_v41 = vpop.f32.mrb[33].mxu1 }
 0x2f0   :  { %10780 = vmatprep.subr.bf16.mxu0 %v953_v28 }
 0x2f2   :  { %v12829_v43 = vpop.f32.mrb[34].mxu1 }
 0x2f3   :  { %10781 = vmatpush3.bf16.msra.mxu0 %v953_v28  ;;  %v12831_v45 = vpop.f32.mrb[35].mxu1 }
 0x2f6   :  { %10767 = vmatmul.mubr.msk.bf16.gmra.mrb[48].mxu0 %vm243_vm4, %v12365_v42  ;;  %v12834_v46 = vpop.f32.mrb[36].mxu1 }
 0x2f7   :  { %10770 = vmatprep.mubr.msk.bf16.mxu0 %vm243_vm4, %v12366_v44  ;;  %v12837_v47 = vpop.f32.mrb[37].mxu1 }
 0x2fa   :  { %v12839_v49 = vpop.f32.mrb[38].mxu1 }
 0x2fb   :  { %v12841_v50 = vpop.f32.mrb[39].mxu1 }
 0x2fe   :  { %10771 = vmatmul.mubr.msk.bf16.gmra.mrb[52].mxu0 %vm243_vm4, %v12367_v48  ;;  %v12844_v51 = vpop.f32.mrb[40].mxu1 }
 0x2ff   :  { %10782 = vmatprep.mubr.msk.bf16.mxu0 %vm243_vm4, %v12793_v53  ;;  %v12848_v52 = vpop.f32.mrb[41].mxu1  ;;  %v1667_v53 = vld [vmem:[#allocation8 + $0xe0] sm:$0xff] }
 0x306   :  { %10783 = vmatmul.mubr.msk.bf16.vlgmr.msra.gmra.mrb[40].mxu0 %vm243_vm4, %v12796_v54  ;;  %v1668_v54 = vld [vmem:[#allocation8 + $0xe8] sm:$0xff] }
 0x307   :  { %10786 = vmatprep.mubr.msk.bf16.mxu0 %vm243_vm4, %v12799_v55  ;;  %v12001_v61 = vpack.c.bf16 %v1668_v54, %v1667_v53  ;;  %v1669_v55 = vld [vmem:[#allocation8 + $0xf0] sm:$0xff] }
 0x309   :  { %12002 = vmatprep.subr.bf16.mxu1 %v12001_v61 }
 0x30a   :  { %12004 = vmatpush3.bf16.msra.mxu1 %v12001_v61 }
 0x30e   :  { %10787 = vmatmul.mubr.msk.bf16.gmra.mrb[44].mxu0 %vm243_vm4, %v12802_v56  ;;  %v12005_v56 = vpack.c.bf16 %v1670_v63, %v1669_v55 }
 0x30f   :  { %10790 = vmatprep.mubr.msk.bf16.mxu0 %vm243_vm4, %v12805_v57  ;;  %v1886_v57 = vld [vmem:[#allocation8 + $0x108] sm:$0xff] }
 0x310   :  { %12006 = vmatprep.subr.bf16.mxu1 %v12005_v56  ;;  %v12009_v1 = vpack.c.bf16 %v1887_v0, %v1886_v57 }
 0x311   :  { %12008 = vmatpush3.bf16.msra.mxu1 %v12005_v56 }
 0x312   :  { %12010 = vmatprep.subr.bf16.mxu0 %v12009_v1 }
 0x313   :  { %12012 = vmatpush3.bf16.msra.mxu0 %v12009_v1 }
 0x316   :  { %10791 = vmatmul.mubr.msk.bf16.gmra.mrb[48].mxu0 %vm243_vm4, %v12808_v58 }
 0x317   :  { %10794 = vmatprep.mubr.msk.bf16.mxu0 %vm243_vm4, %v12811_v59  ;;  %v12864_v59 = vld [vmem:[#allocation8 + $0xb0] ss:$0 sm:$0xff] }
 0x31e   :  { %10795 = vmatmul.mubr.msk.bf16.gmra.mrb[52].mxu0 %vm243_vm4, %v12814_v60 }
 0x3d9   :  { %v10784_v58 = vpop.f32.mrb[40].mxu0 }
 0x3da   :  { %v1616_v2 = vadd.f32 %v10784_v58, %v1545_v35  ;;  %v1354_v60 = vpop.f32.mrb[41].mxu0 }
 0x3db   :  { %v1614_v3 = vadd.f32 %v1535_v33, %v1354_v60  ;;  %v10785_v4 = vpop.f32.mrb[42].mxu0 }
 0x3dc   :  { %v1617_v7 = vadd.f32 %v10807_v34, %v10785_v4  ;;  %v1357_v8 = vpop.f32.mrb[43].mxu0  ;;  %v1636_v15 = vadd.f32 %v12864_v59, %v1616_v2 }
 0x3dd   :  { %v1634_v11 = vadd.f32 %v12864_v59, %v1614_v3  ;;  %v1615_v12 = vadd.f32 %v12817_v31, %v1357_v8 }
 0x3de   :  { %v1637_v20 = vadd.f32 %v12864_v59, %v1617_v7  ;;  %v1652_v23 = vmax.f32 %v1636_v15, 0.0 }
 0x3df   :  { %v1650_v16 = vmax.f32 %v1634_v11, 0.0  ;;  %v1635_v18 = vadd.f32 %v12864_v59, %v1615_v12 }
 0x3e0   :  { %v1653_v30 = vmax.f32 %v1637_v20, 0.0 }
 0x3e1   :  { %v1651_v21 = vmax.f32 %v1635_v18, 0.0  ;;  %v10788_v22 = vpop.f32.mrb[44].mxu0  ;;  %10834 = vmatprep.mubr.msk.f32.mxu1 %vm1675_vm9, %v1650_v16  ;;  %v1889_v18 = vld [vmem:[#allocation8 + $0x120] sm:$0xff] }
 0x3e2   :  { %v1620_v24 = vadd.f32 %v10788_v22, %v1565_v41  ;;  %v1370_v25 = vpop.f32.mrb[45].mxu0  ;;  %v2105_v22 = vld [vmem:[#allocation8 + $0x138] sm:$0xff] }
 0x3e3   :  { %v1618_v26 = vadd.f32 %v12823_v39, %v1370_v25  ;;  %v10789_v27 = vpop.f32.mrb[46].mxu0  ;;  %10835 = vmatmul.mubr.msk.f32.vlgmr.msra.gmra.mrb[42].mxu1 %vm1675_vm9, %v1651_v21  ;;  %v2104_v21 = vld [vmem:[#allocation8 + $0x130] sm:$0xff] }
 0x3e4   :  { %v1621_v28 = vadd.f32 %v12826_v40, %v10789_v27  ;;  %v1373_v29 = vpop.f32.mrb[47].mxu0  ;;  %10837 = vmatprep.mubr.msk.f32.mxu1 %vm1675_vm9, %v1652_v23  ;;  %v1640_v33 = vadd.f32 %v12864_v59, %v1620_v24  ;;  %v12017_v23 = vpack.c.bf16 %v2105_v22, %v2104_v21  ;;  %v2307_v21 = vld [vmem:[#allocation8 + $0x160] sm:$0xff]  ;;  %v2308_v22 = vld [vmem:[#allocation8 + $0x168] sm:$0xf] }
 0x3e5   :  { %v1638_v31 = vadd.f32 %v12864_v59, %v1618_v26  ;;  %v1619_v32 = vadd.f32 %v12821_v37, %v1373_v29 }
 0x3e6   :  { %v1641_v36 = vadd.f32 %v12864_v59, %v1621_v28  ;;  %v1656_v40 = vmax.f32 %v1640_v33, 0.0  ;;  %12018 = vmatprep.subr.bf16.mxu1 %v12017_v23 }
 0x3e7   :  { %v1654_v34 = vmax.f32 %v1638_v31, 0.0  ;;  %v1639_v35 = vadd.f32 %v12864_v59, %v1619_v32  ;;  %10838 = vmatmul.mubr.msk.f32.gmra.mrb[44].mxu1 %vm1675_vm9, %v1653_v30 }
 0x3e8   :  { %v1657_v54 = vmax.f32 %v1641_v36, 0.0  ;;  %12020 = vmatpush3.bf16.msra.mxu1 %v12017_v23  ;;  %v12025_v23 = vpack.c.bf16 %v2308_v22, %v2307_v21 }
 0x3e9   :  { %v1655_v38 = vmax.f32 %v1639_v35, 0.0  ;;  %v10792_v39 = vpop.f32.mrb[48].mxu0  ;;  %10840 = vmatprep.mubr.msk.f32.mxu1 %vm1675_vm9, %v1654_v34 }
 0x3ea   :  { %v1624_v41 = vadd.f32 %v10792_v39, %v12837_v47  ;;  %v1386_v42 = vpop.f32.mrb[49].mxu0 }
 0x3eb   :  { %v1622_v44 = vadd.f32 %v12831_v45, %v1386_v42  ;;  %v10793_v37 = vpop.f32.mrb[50].mxu0  ;;  %10841 = vmatmul.mubr.msk.f32.gmra.mrb[46].mxu1 %vm1675_vm9, %v1655_v38 }
 0x3ec   :  { %v1625_v48 = vadd.f32 %v12834_v46, %v10793_v37  ;;  %v1389_v53 = vpop.f32.mrb[51].mxu0  ;;  %10843 = vmatprep.mubr.msk.f32.mxu1 %vm1675_vm9, %v1656_v40  ;;  %v1644_v63 = vadd.f32 %v12864_v59, %v1624_v41 }
 0x3ed   :  { %v1642_v61 = vadd.f32 %v12864_v59, %v1622_v44  ;;  %v1623_v55 = vadd.f32 %v12829_v43, %v1389_v53 }
 0x3ee   :  { %v1645_v45 = vadd.f32 %v12864_v59, %v1625_v48  ;;  %v1660_v46 = vmax.f32 %v1644_v63, 0.0 }
 0x3ef   :  { %v1658_v56 = vmax.f32 %v1642_v61, 0.0  ;;  %v1643_v47 = vadd.f32 %v12864_v59, %v1623_v55  ;;  %10844 = vmatmul.mubr.msk.f32.gmra.mrb[48].mxu1 %vm1675_vm9, %v1657_v54 }
 0x3f0   :  { %v1661_v4 = vmax.f32 %v1645_v45, 0.0 }
 0x3f1   :  { %v1659_v57 = vmax.f32 %v1643_v47, 0.0  ;;  %v10796_v0 = vpop.f32.mrb[52].mxu0  ;;  %10846 = vmatprep.mubr.msk.f32.mxu1 %vm1675_vm9, %v1658_v56 }
 0x3f2   :  { %v1628_v1 = vadd.f32 %v10796_v0, %v12848_v52  ;;  %v1402_v58 = vpop.f32.mrb[53].mxu0 }
 0x3f3   :  { %v1626_v2 = vadd.f32 %v12841_v50, %v1402_v58  ;;  %v10797_v43 = vpop.f32.mrb[54].mxu0  ;;  %10847 = vmatmul.mubr.msk.f32.gmra.mrb[50].mxu1 %vm1675_vm9, %v1659_v57 }
 0x3f4   :  { %v1629_v60 = vadd.f32 %v12844_v51, %v10797_v43  ;;  %v1405_v3 = vpop.f32.mrb[55].mxu0  ;;  %10849 = vmatprep.mubr.msk.f32.mxu1 %vm1675_vm9, %v1660_v46  ;;  %v1648_v11 = vadd.f32 %v12864_v59, %v1628_v1 }
 0x3f5   :  { %v1646_v7 = vadd.f32 %v12864_v59, %v1626_v2  ;;  %v1627_v8 = vadd.f32 %v12839_v49, %v1405_v3  ;;  %v1888_v49 = vld [vmem:[#allocation8 + $0x118] sm:$0xff] }
 0x3f6   :  { %v1649_v50 = vadd.f32 %v12864_v59, %v1629_v60  ;;  %v1664_v51 = vmax.f32 %v1648_v11, 0.0  ;;  %v12013_v20 = vpack.c.bf16 %v1889_v18, %v1888_v49  ;;  %v2106_v49 = vld [vmem:[#allocation8 + $0x140] sm:$0xff]  ;;  %v2107_v18 = vld [vmem:[#allocation8 + $0x148] sm:$0xff] }
 0x3f7   :  { %v1662_v12 = vmax.f32 %v1646_v7, 0.0  ;;  %v1647_v52 = vadd.f32 %v12864_v59, %v1627_v8  ;;  %10850 = vmatmul.mubr.msk.f32.gmra.mrb[52].mxu1 %vm1675_vm9, %v1661_v4  ;;  %v9272_v59 = vld [vmem:[#allocation8 + $0xd8] ss:$0 sm:$0xff] }
 0x3f8   :  { %v1665_v16 = vmax.f32 %v1649_v50, 0.0  ;;  %12014 = vmatprep.subr.bf16.mxu0 %v12013_v20 }
 0x3f9   :  { %v1663_v15 = vmax.f32 %v1647_v52, 0.0  ;;  %10852 = vmatprep.mubr.msk.f32.mxu1 %vm1675_vm9, %v1662_v12  ;;  %12016 = vmatpush3.bf16.msra.mxu0 %v12013_v20  ;;  %v12021_v20 = vpack.c.bf16 %v2107_v18, %v2106_v49  ;;  %v9306_v49 = vld [vmem:[#allocation8 + $0x128] ss:$0 sm:$0xff] }
 0x3fa   :  { %12027 = vmatprep.subr.msk.bf16.mxu0 %vm12720_vm6, %v12025_v23 }
 0x3fb   :  { %10853 = vmatmul.mubr.msk.f32.gmra.mrb[54].mxu1 %vm1675_vm9, %v1663_v15  ;;  %12022 = vmatprep.subr.bf16.mxu1 %v12021_v20 }
 0x3fc   :  { %10855 = vmatprep.mubr.msk.f32.mxu1 %vm1675_vm9, %v1664_v51  ;;  %12024 = vmatpush3.bf16.msra.mxu1 %v12021_v20 }
 0x3ff   :  { %10856 = vmatmul.mubr.msk.f32.gmra.mrb[56].mxu1 %vm1675_vm9, %v1665_v16 }
 0x4b6   :  { %v10836_v24 = vpop.f32.mrb[42].mxu1 }
 0x4b7   :  { %v1796_v25 = vadd.f32 %v10836_v24, %v9272_v59  ;;  %v1790_v26 = vpop.f32.mrb[43].mxu1 }
 0x4b8   :  { %v1791_v27 = vadd.f32 %v9272_v59, %v1790_v26 }
 0x4b9   :  { %v1870_v30 = vmax.f32 %v1796_v25, 0.0 }
 0x4ba   :  { %v1869_v28 = vmax.f32 %v1791_v27, 0.0  ;;  %v10839_v29 = vpop.f32.mrb[44].mxu1 }
 0x4bb   :  { %v1806_v31 = vadd.f32 %v10839_v29, %v9272_v59  ;;  %v1800_v32 = vpop.f32.mrb[45].mxu1 }
 0x4bc   :  { %v1801_v33 = vadd.f32 %v9272_v59, %v1800_v32  ;;  %10866 = vmatprep.mubr.msk.f32.mxu0 %vm1675_vm9, %v1869_v28 }
 0x4bd   :  { %10867 = vmatmul.mubr.msk.f32.vlgmr.msra.gmra.mrb[38].mxu0 %vm1675_vm9, %v1870_v30  ;;  %v1872_v36 = vmax.f32 %v1806_v31, 0.0 }
 0x4be   :  { %v1871_v34 = vmax.f32 %v1801_v33, 0.0  ;;  %v10842_v35 = vpop.f32.mrb[46].mxu1  ;;  %12030 = vmatpush3.bf16.msk.msra.mxu0 %vm12720_vm6, %v12025_v23 }
 0x4bf   :  { %v1816_v38 = vadd.f32 %v10842_v35, %v9272_v59  ;;  %v1810_v39 = vpop.f32.mrb[47].mxu1 }
 0x4c0   :  { %v1811_v40 = vadd.f32 %v9272_v59, %v1810_v39  ;;  %10869 = vmatprep.mubr.msk.f32.mxu0 %vm1675_vm9, %v1871_v34 }
 0x4c1   :  { %10870 = vmatmul.mubr.msk.f32.gmra.mrb[56].mxu0 %vm1675_vm9, %v1872_v36  ;;  %v1874_v44 = vmax.f32 %v1816_v38, 0.0 }
 0x4c2   :  { %v1873_v41 = vmax.f32 %v1811_v40, 0.0  ;;  %v10845_v42 = vpop.f32.mrb[48].mxu1 }
 0x4c3   :  { %v1826_v37 = vadd.f32 %v10845_v42, %v9272_v59  ;;  %v1820_v48 = vpop.f32.mrb[49].mxu1 }
 0x4c4   :  { %v1821_v53 = vadd.f32 %v9272_v59, %v1820_v48  ;;  %10872 = vmatprep.mubr.msk.f32.mxu0 %vm1675_vm9, %v1873_v41 }
 0x4c5   :  { %10873 = vmatmul.mubr.msk.f32.gmra.mrb[58].mxu0 %vm1675_vm9, %v1874_v44  ;;  %v1876_v55 = vmax.f32 %v1826_v37, 0.0 }
 0x4c6   :  { %v1875_v54 = vmax.f32 %v1821_v53, 0.0  ;;  %v10848_v61 = vpop.f32.mrb[50].mxu1 }
 0x4c7   :  { %v1836_v63 = vadd.f32 %v10848_v61, %v9272_v59  ;;  %v1830_v56 = vpop.f32.mrb[51].mxu1 }
 0x4c8   :  { %v1831_v47 = vadd.f32 %v9272_v59, %v1830_v56  ;;  %10875 = vmatprep.mubr.msk.f32.mxu0 %vm1675_vm9, %v1875_v54 }
 0x4c9   :  { %10876 = vmatmul.mubr.msk.f32.gmra.mrb[60].mxu0 %vm1675_vm9, %v1876_v55  ;;  %v1878_v0 = vmax.f32 %v1836_v63, 0.0 }
 0x4ca   :  { %v1877_v45 = vmax.f32 %v1831_v47, 0.0  ;;  %v10851_v57 = vpop.f32.mrb[52].mxu1 }
 0x4cb   :  { %v1846_v46 = vadd.f32 %v10851_v57, %v9272_v59  ;;  %v1840_v1 = vpop.f32.mrb[53].mxu1 }
 0x4cc   :  { %v1841_v58 = vadd.f32 %v9272_v59, %v1840_v1  ;;  %10878 = vmatprep.mubr.msk.f32.mxu0 %vm1675_vm9, %v1877_v45 }
 0x4cd   :  { %10879 = vmatmul.mubr.msk.f32.gmra.mrb[62].mxu0 %vm1675_vm9, %v1878_v0  ;;  %v1880_v60 = vmax.f32 %v1846_v46, 0.0 }
 0x4ce   :  { %v1879_v2 = vmax.f32 %v1841_v58, 0.0  ;;  %v10854_v43 = vpop.f32.mrb[54].mxu1 }
 0x4cf   :  { %v1856_v3 = vadd.f32 %v10854_v43, %v9272_v59  ;;  %v1850_v4 = vpop.f32.mrb[55].mxu1 }
 0x4d0   :  { %v1851_v7 = vadd.f32 %v9272_v59, %v1850_v4  ;;  %10881 = vmatprep.mubr.msk.f32.mxu0 %vm1675_vm9, %v1879_v2 }
 0x4d1   :  { %10882 = vmatmul.mubr.msk.f32.gmra.mrb[64].mxu0 %vm1675_vm9, %v1880_v60  ;;  %v1882_v12 = vmax.f32 %v1856_v3, 0.0 }
 0x4d2   :  { %v1881_v8 = vmax.f32 %v1851_v7, 0.0  ;;  %v10857_v11 = vpop.f32.mrb[56].mxu1 }
 0x4d3   :  { %v1866_v52 = vadd.f32 %v10857_v11, %v9272_v59  ;;  %v1860_v50 = vpop.f32.mrb[57].mxu1 }
 0x4d4   :  { %v1861_v15 = vadd.f32 %v9272_v59, %v1860_v50  ;;  %10884 = vmatprep.mubr.msk.f32.mxu0 %vm1675_vm9, %v1881_v8  ;;  %v9289_v59 = vld [vmem:[#allocation8 + $0x100] ss:$0 sm:$0xff] }
 0x4d5   :  { %10885 = vmatmul.mubr.msk.f32.gmra.mrb[66].mxu0 %vm1675_vm9, %v1882_v12  ;;  %v1884_v16 = vmax.f32 %v1866_v52, 0.0 }
 0x4d6   :  { %v1883_v51 = vmax.f32 %v1861_v15, 0.0 }
 0x4d8   :  { %10887 = vmatprep.mubr.msk.f32.mxu0 %vm1675_vm9, %v1883_v51 }
 0x4d9   :  { %10888 = vmatmul.mubr.msk.f32.gmra.mrb[68].mxu0 %vm1675_vm9, %v1884_v16 }
 0x590   :  { %v10868_v24 = vpop.f32.mrb[38].mxu0 }
 0x591   :  { %v2014_v25 = vadd.f32 %v10868_v24, %v9289_v59  ;;  %v2008_v26 = vpop.f32.mrb[39].mxu0 }
 0x592   :  { %v2009_v27 = vadd.f32 %v9289_v59, %v2008_v26 }
 0x593   :  { %v2088_v30 = vmax.f32 %v2014_v25, 0.0 }
 0x594   :  { %v2087_v28 = vmax.f32 %v2009_v27, 0.0  ;;  %v10871_v29 = vpop.f32.mrb[56].mxu0 }
 0x595   :  { %v2024_v31 = vadd.f32 %v10871_v29, %v9289_v59  ;;  %v2018_v32 = vpop.f32.mrb[57].mxu0 }
 0x596   :  { %v2019_v33 = vadd.f32 %v9289_v59, %v2018_v32  ;;  %10898 = vmatprep.mubr.msk.f32.mxu1 %vm1675_vm9, %v2087_v28 }
 0x597   :  { %10899 = vmatmul.mubr.msk.f32.vlgmr.msra.gmra.mrb[58].mxu1 %vm1675_vm9, %v2088_v30  ;;  %v2090_v36 = vmax.f32 %v2024_v31, 0.0 }
 0x598   :  { %v2089_v34 = vmax.f32 %v2019_v33, 0.0  ;;  %v10874_v35 = vpop.f32.mrb[58].mxu0 }
 0x599   :  { %v2034_v38 = vadd.f32 %v10874_v35, %v9289_v59  ;;  %v2028_v39 = vpop.f32.mrb[59].mxu0 }
 0x59a   :  { %v2029_v40 = vadd.f32 %v9289_v59, %v2028_v39  ;;  %10901 = vmatprep.mubr.msk.f32.mxu1 %vm1675_vm9, %v2089_v34 }
 0x59b   :  { %10902 = vmatmul.mubr.msk.f32.gmra.mrb[60].mxu1 %vm1675_vm9, %v2090_v36  ;;  %v2092_v44 = vmax.f32 %v2034_v38, 0.0 }
 0x59c   :  { %v2091_v41 = vmax.f32 %v2029_v40, 0.0  ;;  %v10877_v42 = vpop.f32.mrb[60].mxu0 }
 0x59d   :  { %v2044_v37 = vadd.f32 %v10877_v42, %v9289_v59  ;;  %v2038_v48 = vpop.f32.mrb[61].mxu0 }
 0x59e   :  { %v2039_v53 = vadd.f32 %v9289_v59, %v2038_v48  ;;  %10904 = vmatprep.mubr.msk.f32.mxu1 %vm1675_vm9, %v2091_v41 }
 0x59f   :  { %10905 = vmatmul.mubr.msk.f32.gmra.mrb[62].mxu1 %vm1675_vm9, %v2092_v44  ;;  %v2094_v55 = vmax.f32 %v2044_v37, 0.0 }
 0x5a0   :  { %v2093_v54 = vmax.f32 %v2039_v53, 0.0  ;;  %v10880_v61 = vpop.f32.mrb[62].mxu0 }
 0x5a1   :  { %v2054_v63 = vadd.f32 %v10880_v61, %v9289_v59  ;;  %v2048_v56 = vpop.f32.mrb[63].mxu0 }
 0x5a2   :  { %v2049_v47 = vadd.f32 %v9289_v59, %v2048_v56  ;;  %10907 = vmatprep.mubr.msk.f32.mxu1 %vm1675_vm9, %v2093_v54  ;;  %v13010_v56 = vpop.trf.xlu0 }
 0x5a3   :  { %10908 = vmatmul.mubr.msk.f32.gmra.mrb[64].mxu1 %vm1675_vm9, %v2094_v55  ;;  %v2096_v0 = vmax.f32 %v2054_v63, 0.0 }
 0x5a4   :  { %v2095_v45 = vmax.f32 %v2049_v47, 0.0  ;;  %v10883_v57 = vpop.f32.mrb[64].mxu0 }
 0x5a5   :  { %v2064_v46 = vadd.f32 %v10883_v57, %v9289_v59  ;;  %v2058_v1 = vpop.f32.mrb[65].mxu0 }
 0x5a6   :  { %v2059_v58 = vadd.f32 %v9289_v59, %v2058_v1  ;;  %10910 = vmatprep.mubr.msk.f32.mxu1 %vm1675_vm9, %v2095_v45 }
 0x5a7   :  { %10911 = vmatmul.mubr.msk.f32.gmra.mrb[66].mxu1 %vm1675_vm9, %v2096_v0  ;;  %v2098_v60 = vmax.f32 %v2064_v46, 0.0 }
 0x5a8   :  { %v2097_v2 = vmax.f32 %v2059_v58, 0.0  ;;  %v10886_v43 = vpop.f32.mrb[66].mxu0 }
 0x5a9   :  { %v2074_v3 = vadd.f32 %v10886_v43, %v9289_v59  ;;  %v2068_v4 = vpop.f32.mrb[67].mxu0 }
 0x5aa   :  { %v2069_v7 = vadd.f32 %v9289_v59, %v2068_v4  ;;  %10913 = vmatprep.mubr.msk.f32.mxu1 %vm1675_vm9, %v2097_v2 }
 0x5ab   :  { %10914 = vmatmul.mubr.msk.f32.gmra.mrb[68].mxu1 %vm1675_vm9, %v2098_v60  ;;  %v2100_v12 = vmax.f32 %v2074_v3, 0.0 }
 0x5ac   :  { %v2099_v8 = vmax.f32 %v2069_v7, 0.0  ;;  %v10889_v11 = vpop.f32.mrb[68].mxu0 }
 0x5ad   :  { %v2084_v52 = vadd.f32 %v10889_v11, %v9289_v59  ;;  %v2078_v50 = vpop.f32.mrb[69].mxu0 }
 0x5ae   :  { %v2079_v15 = vadd.f32 %v9289_v59, %v2078_v50  ;;  %10916 = vmatprep.mubr.msk.f32.mxu1 %vm1675_vm9, %v2099_v8 }
 0x5af   :  { %10917 = vmatmul.mubr.msk.f32.gmra.mrb[70].mxu1 %vm1675_vm9, %v2100_v12  ;;  %v2102_v16 = vmax.f32 %v2084_v52, 0.0 }
 0x5b0   :  { %v2101_v51 = vmax.f32 %v2079_v15, 0.0 }
 0x5b2   :  { %10919 = vmatprep.mubr.msk.f32.mxu1 %vm1675_vm9, %v2101_v51 }
 0x5b3   :  { %10920 = vmatmul.mubr.msk.f32.gmra.mrb[72].mxu1 %vm1675_vm9, %v2102_v16 }
 0x5b4   :  { %10966 = vmatprep.mubr.bf16.mxu1 %v13010_v56 }
 0x66a   :  { %v10900_v18 = vpop.f32.mrb[58].mxu1 }
 0x66b   :  { %v2226_v20 = vpop.f32.mrb[59].mxu1  ;;  %v12948_v22 = vadd.f32 %v10900_v18, %v9306_v49  ;;  %v13013_v18 = vpop.trf.xlu0 }
 0x66c   :  { %v12946_v21 = vadd.f32 %v9306_v49, %v2226_v20 }
 0x66e   :  { %v10903_v23 = vpop.f32.mrb[60].mxu1  ;;  %10926 = vmatprep.mubr.msk.f32.mxu0 %vm1417_vm8, %v12946_v21 }
 0x66f   :  { %v2236_v59 = vpop.f32.mrb[61].mxu1  ;;  %10927 = vmatmul.mubr.msk.f32.vlgmr.msra.gmra.mrb[70].mxu0 %vm1417_vm8, %v12948_v22  ;;  %v12956_v25 = vadd.f32 %v10903_v23, %v9306_v49 }
 0x670   :  { %v12954_v24 = vadd.f32 %v9306_v49, %v2236_v59  ;;  %v2306_v59 = vld [vmem:[#allocation8 + $0x158] sm:$0xff] }
 0x672   :  { %v10906_v26 = vpop.f32.mrb[62].mxu1  ;;  %10929 = vmatprep.mubr.msk.f32.mxu0 %vm1417_vm8, %v12954_v24 }
 0x673   :  { %v2246_v27 = vpop.f32.mrb[63].mxu1  ;;  %10930 = vmatmul.mubr.msk.f32.gmra.mrb[72].mxu0 %vm1417_vm8, %v12956_v25  ;;  %v12964_v29 = vadd.f32 %v10906_v26, %v9306_v49  ;;  %v13015_v26 = vpop.trf.xlu0 }
 0x674   :  { %v12962_v28 = vadd.f32 %v9306_v49, %v2246_v27 }
 0x676   :  { %v10909_v30 = vpop.f32.mrb[64].mxu1  ;;  %10932 = vmatprep.mubr.msk.f32.mxu0 %vm1417_vm8, %v12962_v28 }
 0x677   :  { %v2256_v31 = vpop.f32.mrb[65].mxu1  ;;  %10933 = vmatmul.mubr.msk.f32.gmra.mrb[74].mxu0 %vm1417_vm8, %v12964_v29  ;;  %v12972_v33 = vadd.f32 %v10909_v30, %v9306_v49  ;;  %v13019_v27 = vpop.trf.xlu0 }
 0x678   :  { %v12970_v32 = vadd.f32 %v9306_v49, %v2256_v31  ;;  %v2731_v31 = vld [vmem:[#allocation8 + $0x190] sm:$0xff] }
 0x67a   :  { %v10912_v34 = vpop.f32.mrb[66].mxu1  ;;  %10935 = vmatprep.mubr.msk.f32.mxu0 %vm1417_vm8, %v12970_v32 }
 0x67b   :  { %v2266_v35 = vpop.f32.mrb[67].mxu1  ;;  %10936 = vmatmul.mubr.msk.f32.gmra.mrb[76].mxu0 %vm1417_vm8, %v12972_v33  ;;  %v12980_v38 = vadd.f32 %v10912_v34, %v9306_v49  ;;  %v2875_v34 = vld [vmem:[#allocation8 + $0x1a8] sm:$0xff] }
 0x67c   :  { %v12978_v36 = vadd.f32 %v9306_v49, %v2266_v35 }
 0x67e   :  { %v10915_v39 = vpop.f32.mrb[68].mxu1  ;;  %10938 = vmatprep.mubr.msk.f32.mxu0 %vm1417_vm8, %v12978_v36 }
 0x67f   :  { %v2276_v40 = vpop.f32.mrb[69].mxu1  ;;  %10939 = vmatmul.mubr.msk.f32.gmra.mrb[78].mxu0 %vm1417_vm8, %v12980_v38  ;;  %v12988_v42 = vadd.f32 %v10915_v39, %v9306_v49 }
 0x680   :  { %v12986_v41 = vadd.f32 %v9306_v49, %v2276_v40 }
 0x682   :  { %v10918_v44 = vpop.f32.mrb[70].mxu1  ;;  %10941 = vmatprep.mubr.msk.f32.mxu0 %vm1417_vm8, %v12986_v41 }
 0x683   :  { %v2286_v37 = vpop.f32.mrb[71].mxu1  ;;  %10942 = vmatmul.mubr.msk.f32.gmra.mrb[80].mxu0 %vm1417_vm8, %v12988_v42  ;;  %v12996_v53 = vadd.f32 %v10918_v44, %v9306_v49 }
 0x684   :  { %v12994_v48 = vadd.f32 %v9306_v49, %v2286_v37 }
 0x686   :  { %v10921_v54 = vpop.f32.mrb[72].mxu1  ;;  %10944 = vmatprep.mubr.msk.f32.mxu0 %vm1417_vm8, %v12994_v48 }
 0x687   :  { %v2296_v61 = vpop.f32.mrb[73].mxu1  ;;  %10945 = vmatmul.mubr.msk.f32.gmra.mrb[82].mxu0 %vm1417_vm8, %v12996_v53  ;;  %v13004_v63 = vadd.f32 %v10921_v54, %v9306_v49 }
 0x688   :  { %v13002_v55 = vadd.f32 %v9306_v49, %v2296_v61  ;;  %v9348_v61 = vld [vmem:[#allocation8 + $0x150] ss:$0 sm:$0xff] }
 0x68a   :  { %10947 = vmatprep.mubr.msk.f32.mxu0 %vm1417_vm8, %v13002_v55 }
 0x68b   :  { %10948 = vmatmul.mubr.msk.f32.gmra.mrb[84].mxu0 %vm1417_vm8, %v13004_v63 }
 0x742   :  { %v10928_v47 = vpop.f32.mrb[70].mxu0 }
 0x743   :  { %v2426_v45 = vpop.f32.mrb[71].mxu0 }
 0x744   :  { %v2505_v57 = vpack.c.bf16 %v10928_v47, %v2426_v45 }
 0x746   :  { %v10931_v0 = vpop.f32.mrb[72].mxu0  ;;  %10950 = vmatprep.subr.bf16.mxu1 %v2505_v57 }
 0x747   :  { %v2436_v46 = vpop.f32.mrb[73].mxu0  ;;  %10951 = vmatpush3.bf16.msra.mxu1 %v2505_v57 }
 0x748   :  { %v2506_v1 = vpack.c.bf16 %v10931_v0, %v2436_v46 }
 0x74a   :  { %v10934_v58 = vpop.f32.mrb[74].mxu0  ;;  %10952 = vmatprep.subr.bf16.mxu1 %v2506_v1 }
 0x74b   :  { %v2446_v2 = vpop.f32.mrb[75].mxu0  ;;  %10953 = vmatpush3.bf16.msra.mxu1 %v2506_v1 }
 0x74c   :  { %v2507_v43 = vpack.c.bf16 %v10934_v58, %v2446_v2 }
 0x74e   :  { %v10937_v60 = vpop.f32.mrb[76].mxu0  ;;  %10954 = vmatprep.subr.bf16.mxu1 %v2507_v43 }
 0x74f   :  { %v2456_v3 = vpop.f32.mrb[77].mxu0  ;;  %10955 = vmatpush3.bf16.msra.mxu1 %v2507_v43 }
 0x750   :  { %v2508_v4 = vpack.c.bf16 %v10937_v60, %v2456_v3 }
 0x752   :  { %v10940_v7 = vpop.f32.mrb[78].mxu0  ;;  %10956 = vmatprep.subr.bf16.mxu1 %v2508_v4 }
 0x753   :  { %v2466_v8 = vpop.f32.mrb[79].mxu0  ;;  %10957 = vmatpush3.bf16.msra.mxu1 %v2508_v4 }
 0x754   :  { %v2509_v11 = vpack.c.bf16 %v10940_v7, %v2466_v8 }
 0x756   :  { %v10943_v12 = vpop.f32.mrb[80].mxu0  ;;  %10958 = vmatprep.subr.bf16.mxu1 %v2509_v11 }
 0x757   :  { %v2476_v52 = vpop.f32.mrb[81].mxu0  ;;  %10959 = vmatpush3.bf16.msra.mxu1 %v2509_v11 }
 0x758   :  { %v2510_v50 = vpack.c.bf16 %v10943_v12, %v2476_v52 }
 0x75a   :  { %v10946_v15 = vpop.f32.mrb[82].mxu0  ;;  %10960 = vmatprep.subr.bf16.mxu1 %v2510_v50 }
 0x75b   :  { %v2486_v51 = vpop.f32.mrb[83].mxu0  ;;  %10961 = vmatpush3.bf16.msra.mxu1 %v2510_v50 }
 0x75c   :  { %v2511_v16 = vpack.c.bf16 %v10946_v15, %v2486_v51 }
 0x75e   :  { %v10949_v49 = vpop.f32.mrb[84].mxu0  ;;  %10962 = vmatprep.subr.bf16.mxu1 %v2511_v16 }
 0x75f   :  { %v2496_v20 = vpop.f32.mrb[85].mxu0  ;;  %10963 = vmatpush3.bf16.msra.mxu1 %v2511_v16 }
 0x760   :  { %v2512_v23 = vpack.c.bf16 %v10949_v49, %v2496_v20 }
 0x762   :  { %10964 = vmatprep.subr.bf16.mxu1 %v2512_v23 }
 0x763   :  { %10965 = vmatpush3.bf16.msra.mxu1 %v2512_v23 }
 0x764   :  { %10974 = vmatprep.subr.mxu1 %v2306_v59 }
 0x766   :  { %10967 = vmatmul.mubr.bf16.vlgmr.msra.gmra.mrb[76].mxu1 %v13013_v18 }
 0x767   :  { %10970 = vmatprep.mubr.bf16.mxu1 %v13015_v26  ;;  %10975 = vmatpush3.msra.mxu1 %v2306_v59 }
 0x76e   :  { %10971 = vmatmul.mubr.bf16.gmra.mrb[80].mxu1 %v13019_v27 }
 0x76f   :  { %10976 = vmatprep.mubr.msk.f32.mxu1 %vm820_vm7, %v12726_v5  ;;  %v2728_v5 = vld [vmem:[#allocation8 + $0x178] sm:$0xff] }
 0x776   :  { %10977 = vmatmul.mubr.msk.f32.vlgmr.msra.gmra.mrb[74].mxu1 %vm820_vm7, %v12728_v6  ;;  %v2729_v6 = vld [vmem:[#allocation8 + $0x180] sm:$0xff] }
 0x777   :  { %10979 = vmatprep.mubr.msk.f32.mxu1 %vm820_vm7, %v12738_v9  ;;  %v12031_v30 = vpack.c.bf16 %v2729_v6, %v2728_v5  ;;  %v2730_v9 = vld [vmem:[#allocation8 + $0x188] sm:$0xff] }
 0x779   :  { %12032 = vmatprep.subr.bf16.mxu0 %v12031_v30 }
 0x77a   :  { %10980 = vmatmul.mubr.msk.f32.gmra.mrb[84].mxu1 %vm820_vm7, %v12742_v10  ;;  %12034 = vmatpush3.bf16.msra.mxu0 %v12031_v30  ;;  %v12035_v10 = vpack.c.bf16 %v2731_v31, %v2730_v9 }
 0x77b   :  { %10982 = vmatprep.mubr.msk.f32.mxu1 %vm820_vm7, %v12752_v13  ;;  %v2874_v13 = vld [vmem:[#allocation8 + $0x1a0] sm:$0xff] }
 0x77c   :  { %12036 = vmatprep.subr.bf16.mxu0 %v12035_v10  ;;  %v12039_v35 = vpack.c.bf16 %v2875_v34, %v2874_v13  ;;  %v2876_v34 = vld [vmem:[#allocation8 + $0x1b0] sm:$0xff] }
 0x77e   :  { %10983 = vmatmul.mubr.msk.f32.gmra.mrb[86].mxu1 %vm820_vm7, %v12754_v14  ;;  %12038 = vmatpush3.bf16.msra.mxu0 %v12035_v10 }
 0x77f   :  { %10985 = vmatprep.mubr.msk.f32.mxu1 %vm820_vm7, %v12764_v17  ;;  %12040 = vmatprep.subr.bf16.mxu1 %v12039_v35 }
 0x780   :  { %12042 = vmatpush3.bf16.msra.mxu1 %v12039_v35  ;;  %v2877_v35 = vld [vmem:[#allocation8 + $0x1b8] sm:$0xff] }
 0x782   :  { %10986 = vmatmul.mubr.msk.f32.gmra.mrb[88].mxu1 %vm820_vm7, %v12766_v19 }
 0x839   :  { %v10968_v14 = vpop.f32.mrb[76].mxu1 }
 0x83a   :  { %v2571_v17 = vpop.f32.mrb[77].mxu1 }
 0x83b   :  { %v10969_v39 = vpop.f32.mrb[78].mxu1 }
 0x83c   :  { %v2574_v40 = vpop.f32.mrb[79].mxu1 }
 0x841   :  { %v10972_v19 = vpop.f32.mrb[80].mxu1 }
 0x842   :  { %v2587_v44 = vpop.f32.mrb[81].mxu1 }
 0x843   :  { %v10973_v37 = vpop.f32.mrb[82].mxu1 }
 0x844   :  { %v2590_v54 = vpop.f32.mrb[83].mxu1 }
 0x849   :  { %v10978_v47 = vpop.f32.mrb[74].mxu1 }
 0x84a   :  { %v2674_v45 = vadd.f32 %v10978_v47, %v2574_v40  ;;  %v2668_v57 = vpop.f32.mrb[75].mxu1 }
 0x84b   :  { %v2669_v0 = vadd.f32 %v2668_v57, %v2571_v17  ;;  %v3020_v17 = vld [vmem:[#allocation8 + $0x1c8] sm:$0xff] }
 0x84c   :  { %v2712_v46 = vadd.f32 %v9348_v61, %v2674_v45 }
 0x84d   :  { %v2711_v1 = vadd.f32 %v9348_v61, %v2669_v0  ;;  %v10981_v58 = vpop.f32.mrb[84].mxu1 }
 0x84e   :  { %v2684_v2 = vadd.f32 %v10981_v58, %v10969_v39  ;;  %v2678_v43 = vpop.f32.mrb[85].mxu1  ;;  %v2720_v4 = vmax.f32 %v2712_v46, 0.0  ;;  %v3021_v39 = vld [vmem:[#allocation8 + $0x1d0] sm:$0xff] }
 0x84f   :  { %v2719_v60 = vmax.f32 %v2711_v1, 0.0  ;;  %v2679_v3 = vadd.f32 %v10968_v14, %v2678_v43  ;;  %v12043_v14 = vpack.c.bf16 %v2877_v35, %v2876_v34  ;;  %v12047_v40 = vpack.c.bf16 %v3021_v39, %v3020_v17 }
 0x850   :  { %v2714_v7 = vadd.f32 %v9348_v61, %v2684_v2 }
 0x851   :  { %v2713_v8 = vadd.f32 %v9348_v61, %v2679_v3  ;;  %v10984_v11 = vpop.f32.mrb[86].mxu1  ;;  %10996 = vmatprep.mubr.msk.f32.mxu0 %vm1675_vm9, %v2719_v60  ;;  %12044 = vmatprep.subr.bf16.mxu1 %v12043_v14 }
 0x852   :  { %v2694_v12 = vadd.f32 %v10984_v11, %v2590_v54  ;;  %v2688_v52 = vpop.f32.mrb[87].mxu1  ;;  %10997 = vmatmul.mubr.msk.f32.vlgmr.msra.gmra.mrb[86].mxu0 %vm1675_vm9, %v2720_v4  ;;  %v2722_v51 = vmax.f32 %v2714_v7, 0.0  ;;  %12046 = vmatpush3.bf16.msra.mxu1 %v12043_v14 }
 0x853   :  { %v2721_v50 = vmax.f32 %v2713_v8, 0.0  ;;  %v2689_v15 = vadd.f32 %v2688_v52, %v2587_v44  ;;  %12048 = vmatprep.subr.bf16.mxu0 %v12047_v40 }
 0x854   :  { %v2716_v16 = vadd.f32 %v9348_v61, %v2694_v12  ;;  %12050 = vmatpush3.bf16.msra.mxu0 %v12047_v40 }
 0x855   :  { %v2715_v49 = vadd.f32 %v9348_v61, %v2689_v15  ;;  %v10987_v20 = vpop.f32.mrb[88].mxu1  ;;  %10999 = vmatprep.mubr.msk.f32.mxu0 %vm1675_vm9, %v2721_v50 }
 0x856   :  { %v2704_v23 = vadd.f32 %v10987_v20, %v10973_v37  ;;  %v2698_v59 = vpop.f32.mrb[89].mxu1  ;;  %11000 = vmatmul.mubr.msk.f32.gmra.mrb[88].mxu0 %vm1675_vm9, %v2722_v51  ;;  %v2724_v30 = vmax.f32 %v2716_v16, 0.0  ;;  %v3022_v16 = vld [vmem:[#allocation8 + $0x1d8] sm:$0xff] }
 0x857   :  { %v2723_v5 = vmax.f32 %v2715_v49, 0.0  ;;  %v2699_v6 = vadd.f32 %v10972_v19, %v2698_v59  ;;  %v9349_v19 = vld [vmem:[#allocation8 + $0x170] ss:$0 sm:$0xff]  ;;  %v3023_v49 = vld [vmem:[#allocation8 + $0x1e0] sm:$0xff] }
 0x858   :  { %v2718_v9 = vadd.f32 %v9348_v61, %v2704_v23  ;;  %v12051_v20 = vpack.c.bf16 %v3023_v49, %v3022_v16  ;;  %v9358_v23 = vld [vmem:[#allocation8 + $0x198] ss:$0 sm:$0xff] }
 0x859   :  { %v2717_v31 = vadd.f32 %v9348_v61, %v2699_v6  ;;  %11002 = vmatprep.mubr.msk.f32.mxu0 %vm1675_vm9, %v2723_v5 }
 0x85a   :  { %11003 = vmatmul.mubr.msk.f32.gmra.mrb[90].mxu0 %vm1675_vm9, %v2724_v30  ;;  %v2726_v13 = vmax.f32 %v2718_v9, 0.0  ;;  %12052 = vmatprep.subr.bf16.mxu0 %v12051_v20 }
 0x85b   :  { %v2725_v10 = vmax.f32 %v2717_v31, 0.0  ;;  %12054 = vmatpush3.bf16.msra.mxu0 %v12051_v20 }
 0x85d   :  { %11005 = vmatprep.mubr.msk.f32.mxu0 %vm1675_vm9, %v2725_v10 }
 0x85e   :  { %11006 = vmatmul.mubr.msk.f32.gmra.mrb[92].mxu0 %vm1675_vm9, %v2726_v13 }
 0x925   :  { %v10998_v44 = vpop.f32.mrb[86].mxu0 }
 0x926   :  { %v2832_v37 = vadd.f32 %v10998_v44, %v9349_v19  ;;  %v2826_v54 = vpop.f32.mrb[87].mxu0 }
 0x927   :  { %v2827_v61 = vadd.f32 %v9349_v19, %v2826_v54 }
 0x928   :  { %v2866_v57 = vmax.f32 %v2832_v37, 0.0 }
 0x929   :  { %v2865_v47 = vmax.f32 %v2827_v61, 0.0  ;;  %v11001_v45 = vpop.f32.mrb[88].mxu0 }
 0x92a   :  { %v2842_v0 = vadd.f32 %v11001_v45, %v9349_v19  ;;  %v2836_v46 = vpop.f32.mrb[89].mxu0 }
 0x92b   :  { %v2837_v1 = vadd.f32 %v9349_v19, %v2836_v46  ;;  %11016 = vmatprep.mubr.msk.f32.mxu1 %vm1675_vm9, %v2865_v47 }
 0x92c   :  { %11017 = vmatmul.mubr.msk.f32.vlgmr.msra.gmra.mrb[90].mxu1 %vm1675_vm9, %v2866_v57  ;;  %v2868_v43 = vmax.f32 %v2842_v0, 0.0 }
 0x92d   :  { %v2867_v58 = vmax.f32 %v2837_v1, 0.0  ;;  %v11004_v2 = vpop.f32.mrb[90].mxu0  ;;  %v3158_v1 = vld [vmem:[#allocation8 + $0x1f0] sm:$0xff] }
 0x92e   :  { %v2852_v60 = vadd.f32 %v11004_v2, %v9349_v19  ;;  %v2846_v3 = vpop.f32.mrb[91].mxu0  ;;  %11048 = vmatprep.subr.mxu1 %v3158_v1  ;;  %v3160_v2 = vld [vmem:[#allocation8 + $0x200] sm:$0xff] }
 0x92f   :  { %v2847_v4 = vadd.f32 %v9349_v19, %v2846_v3  ;;  %11019 = vmatprep.mubr.msk.f32.mxu1 %vm1675_vm9, %v2867_v58  ;;  %v3159_v58 = vld [vmem:[#allocation8 + $0x1f8] sm:$0xff]  ;;  %11049 = vmatpush3.msra.mxu1 %v3158_v1  ;;  %v9367_v3 = vld [vmem:[#allocation8 + $0x1c0] ss:$0 sm:$0xff] }
 0x930   :  { %11020 = vmatmul.mubr.msk.f32.gmra.mrb[92].mxu1 %vm1675_vm9, %v2868_v43  ;;  %v2870_v11 = vmax.f32 %v2852_v60, 0.0  ;;  %11062 = vmatprep.subr.mxu0 %v3159_v58  ;;  %v3161_v43 = vld [vmem:[#allocation8 + $0x208] sm:$0xf] }
 0x931   :  { %v2869_v7 = vmax.f32 %v2847_v4, 0.0  ;;  %v11007_v8 = vpop.f32.mrb[92].mxu0  ;;  %v12055_v60 = vpack.c.bf16 %v3161_v43, %v3160_v2  ;;  %v12385_v2 = vld [vmem:[#allocation7 + $0x68] sm:$0xff]  }
 0x932   :  { %v2862_v12 = vadd.f32 %v11007_v8, %v9349_v19  ;;  %v2856_v52 = vpop.f32.mrb[93].mxu0 }
 0x933   :  { %v2857_v50 = vadd.f32 %v9349_v19, %v2856_v52  ;;  %11022 = vmatprep.mubr.msk.f32.mxu1 %vm1675_vm9, %v2869_v7 }
 0x934   :  { %11023 = vmatmul.mubr.msk.f32.gmra.mrb[94].mxu1 %vm1675_vm9, %v2870_v11  ;;  %v2872_v51 = vmax.f32 %v2862_v12, 0.0 }
 0x935   :  { %v2871_v15 = vmax.f32 %v2857_v50, 0.0 }
 0x937   :  { %11025 = vmatprep.mubr.msk.f32.mxu1 %vm1675_vm9, %v2871_v15 }
 0x938   :  { %11026 = vmatmul.mubr.msk.f32.gmra.mrb[96].mxu1 %vm1675_vm9, %v2872_v51 }
 0x9ff   :  { %v11018_v59 = vpop.f32.mrb[90].mxu1 }
 0xa00   :  { %v2978_v5 = vadd.f32 %v11018_v59, %v9358_v23  ;;  %v2972_v6 = vpop.f32.mrb[91].mxu1 }
 0xa01   :  { %v2973_v30 = vadd.f32 %v9358_v23, %v2972_v6 }
 0xa02   :  { %v3012_v10 = vmax.f32 %v2978_v5, 0.0 }
 0xa03   :  { %v3011_v9 = vmax.f32 %v2973_v30, 0.0  ;;  %v11021_v31 = vpop.f32.mrb[92].mxu1  ;;  %v12380_v30 = vld [vmem:[#allocation7 + $0x40] sm:$0xff]  }
 0xa04   :  { %v2988_v13 = vadd.f32 %v11021_v31, %v9358_v23  ;;  %v2982_v34 = vpop.f32.mrb[93].mxu1 }
 0xa05   :  { %v2983_v35 = vadd.f32 %v9358_v23, %v2982_v34  ;;  %11036 = vmatprep.mubr.msk.f32.mxu0 %vm1675_vm9, %v3011_v9 }
 0xa06   :  { %11037 = vmatmul.mubr.msk.f32.vlgmr.msra.gmra.mrb[94].mxu0 %vm1675_vm9, %v3012_v10  ;;  %v3014_v39 = vmax.f32 %v2988_v13, 0.0 }
 0xa07   :  { %v3013_v14 = vmax.f32 %v2983_v35, 0.0  ;;  %v11024_v17 = vpop.f32.mrb[94].mxu1  ;;  %11063 = vmatpush3.msra.mxu0 %v3159_v58 }
 0xa08   :  { %v2998_v40 = vadd.f32 %v11024_v17, %v9358_v23  ;;  %v2992_v19 = vpop.f32.mrb[95].mxu1  ;;  %12057 = vmatprep.subr.msk.bf16.mxu0 %vm12720_vm6, %v12055_v60 }
 0xa09   :  { %v2993_v44 = vadd.f32 %v9358_v23, %v2992_v19  ;;  %11039 = vmatprep.mubr.msk.f32.mxu0 %vm1675_vm9, %v3013_v14  ;;  %v12381_v19 = vld [vmem:[#allocation7 + $0x48] sm:$0xff]  }
 0xa0a   :  { %11040 = vmatmul.mubr.msk.f32.gmra.mrb[96].mxu0 %vm1675_vm9, %v3014_v39  ;;  %v3016_v61 = vmax.f32 %v2998_v40, 0.0 }
 0xa0b   :  { %v3015_v37 = vmax.f32 %v2993_v44, 0.0  ;;  %v11027_v54 = vpop.f32.mrb[96].mxu1 }
 0xa0c   :  { %v3008_v47 = vadd.f32 %v11027_v54, %v9358_v23  ;;  %v3002_v45 = vpop.f32.mrb[97].mxu1  ;;  %v12382_v54 = vld [vmem:[#allocation7 + $0x50] sm:$0xff]  }
 0xa0d   :  { %v3003_v57 = vadd.f32 %v9358_v23, %v3002_v45  ;;  %11042 = vmatprep.mubr.msk.f32.mxu0 %vm1675_vm9, %v3015_v37  ;;  %v12383_v45 = vld [vmem:[#allocation7 + $0x58] sm:$0xff]  }
 0xa0e   :  { %11043 = vmatmul.mubr.msk.f32.gmra.mrb[98].mxu0 %vm1675_vm9, %v3016_v61  ;;  %v3018_v46 = vmax.f32 %v3008_v47, 0.0 }
 0xa0f   :  { %v3017_v0 = vmax.f32 %v3003_v57, 0.0 }
 0xa11   :  { %11045 = vmatprep.mubr.msk.f32.mxu0 %vm1675_vm9, %v3017_v0 }
 0xa12   :  { %11046 = vmatmul.mubr.msk.f32.gmra.mrb[100].mxu0 %vm1675_vm9, %v3018_v46  ;;  %v12384_v46 = vld [vmem:[#allocation7 + $0x60] sm:$0xff]  }
 0xad9   :  { %v11038_v4 = vpop.f32.mrb[94].mxu0 }
 0xada   :  { %v3118_v7 = vpop.f32.mrb[95].mxu0  ;;  %v13066_v11 = vadd.f32 %v11038_v4, %v9367_v3 }
 0xadb   :  { %v13064_v8 = vadd.f32 %v9367_v3, %v3118_v7 }
 0xadd   :  { %v11041_v12 = vpop.f32.mrb[96].mxu0  ;;  %11050 = vmatprep.mubr.msk.f32.mxu1 %vm820_vm7, %v13064_v8  ;;  %11064 = vmatprep.mubr.msk.f32.mxu0 %vm820_vm7, %v13064_v8 }
 0xade   :  { %v3128_v52 = vpop.f32.mrb[97].mxu0  ;;  %11051 = vmatmul.mubr.msk.f32.vlgmr.msra.gmra.mrb[98].mxu1 %vm820_vm7, %v13066_v11  ;;  %11065 = vmatmul.mubr.msk.f32.vlgmr.msra.gmra.mrb[102].mxu0 %vm820_vm7, %v13066_v11  ;;  %v13080_v15 = vadd.f32 %v11041_v12, %v9367_v3  ;;  %v12387_v12 = vld [vmem:[#allocation7 + $0x78] sm:$0xff]  }
 0xadf   :  { %v13076_v50 = vadd.f32 %v9367_v3, %v3128_v52  ;;  %12060 = vmatpush3.bf16.msk.msra.mxu0 %vm12720_vm6, %v12055_v60 }
 0xae1   :  { %v11044_v51 = vpop.f32.mrb[98].mxu0  ;;  %11053 = vmatprep.mubr.msk.f32.mxu1 %vm820_vm7, %v13076_v50  ;;  %11067 = vmatprep.mubr.msk.f32.mxu0 %vm820_vm7, %v13076_v50 }
 0xae2   :  { %v3138_v16 = vpop.f32.mrb[99].mxu0  ;;  %11054 = vmatmul.mubr.msk.f32.gmra.mrb[100].mxu1 %vm820_vm7, %v13080_v15  ;;  %11068 = vmatmul.mubr.msk.f32.gmra.mrb[104].mxu0 %vm820_vm7, %v13080_v15  ;;  %v13092_v20 = vadd.f32 %v11044_v51, %v9367_v3 }
 0xae3   :  { %v13090_v49 = vadd.f32 %v9367_v3, %v3138_v16  ;;  %v12388_v16 = vld [vmem:[#allocation7] sm:$0xff]  }
 0xae5   :  { %v11047_v23 = vpop.f32.mrb[100].mxu0  ;;  %11056 = vmatprep.mubr.msk.f32.mxu1 %vm820_vm7, %v13090_v49  ;;  %11070 = vmatprep.mubr.msk.f32.mxu0 %vm820_vm7, %v13090_v49 }
 0xae6   :  { %v3148_v59 = vpop.f32.mrb[101].mxu0  ;;  %11057 = vmatmul.mubr.msk.f32.gmra.mrb[102].mxu1 %vm820_vm7, %v13092_v20  ;;  %11071 = vmatmul.mubr.msk.f32.gmra.mrb[106].mxu0 %vm820_vm7, %v13092_v20  ;;  %v13104_v6 = vadd.f32 %v11047_v23, %v9367_v3  ;;  %v12389_v23 = vld [vmem:[#allocation7 + $0x8] sm:$0xff]  }
 0xae7   :  { %v13102_v5 = vadd.f32 %v9367_v3, %v3148_v59  ;;  %v12386_v3 = vld [vmem:[#allocation7 + $0x70] sm:$0xff]  }
 0xae8   :  { %v12390_v59 = vld [vmem:[#allocation7 + $0x10] sm:$0xff]  }
 0xae9   :  { %11059 = vmatprep.mubr.msk.f32.mxu1 %vm820_vm7, %v13102_v5  ;;  %11073 = vmatprep.mubr.msk.f32.mxu0 %vm820_vm7, %v13102_v5 }
 0xaea   :  { %11060 = vmatmul.mubr.msk.f32.gmra.mrb[104].mxu1 %vm820_vm7, %v13104_v6  ;;  %11074 = vmatmul.mubr.msk.f32.gmra.mrb[108].mxu0 %vm820_vm7, %v13104_v6 }
 0xaeb   :  { %11128 = vmatprep.mubr.msk.f32.mxu0 %vm1417_vm8, %v12946_v21  ;;  %11084 = vmatprep.mubr.msk.bf16.mxu1 %vm243_vm4, %v12380_v30  ;;  %v12391_v30 = vld [vmem:[#allocation7 + $0x18] sm:$0xff]  }
 0xaee   :  { %11129 = vmatmul.mubr.msk.f32.vlgmr.msra.gmra.mrb[110].mxu0 %vm1417_vm8, %v12948_v22 }
 0xaef   :  { %11131 = vmatprep.mubr.msk.f32.mxu0 %vm1417_vm8, %v12954_v24 }
 0xaf2   :  { %11132 = vmatmul.mubr.msk.f32.gmra.mrb[112].mxu0 %vm1417_vm8, %v12956_v25 }
 0xaf3   :  { %11134 = vmatprep.mubr.msk.f32.mxu0 %vm1417_vm8, %v12962_v28 }
 0xaf6   :  { %11135 = vmatmul.mubr.msk.f32.gmra.mrb[114].mxu0 %vm1417_vm8, %v12964_v29 }
 0xaf7   :  { %11137 = vmatprep.mubr.msk.f32.mxu0 %vm1417_vm8, %v12970_v32 }
 0xafa   :  { %11138 = vmatmul.mubr.msk.f32.gmra.mrb[116].mxu0 %vm1417_vm8, %v12972_v33 }
 0xafb   :  { %11140 = vmatprep.mubr.msk.f32.mxu0 %vm1417_vm8, %v12978_v36 }
 0xafe   :  { %11141 = vmatmul.mubr.msk.f32.gmra.mrb[118].mxu0 %vm1417_vm8, %v12980_v38 }
 0xaff   :  { %11143 = vmatprep.mubr.msk.f32.mxu0 %vm1417_vm8, %v12986_v41 }
 0xb02   :  { %11144 = vmatmul.mubr.msk.f32.gmra.mrb[120].mxu0 %vm1417_vm8, %v12988_v42 }
 0xb03   :  { %11146 = vmatprep.mubr.msk.f32.mxu0 %vm1417_vm8, %v12994_v48 }
 0xb06   :  { %11147 = vmatmul.mubr.msk.f32.gmra.mrb[122].mxu0 %vm1417_vm8, %v12996_v53 }
 0xb07   :  { %11149 = vmatprep.mubr.msk.f32.mxu0 %vm1417_vm8, %v13002_v55 }
 0xb0a   :  { %11150 = vmatmul.mubr.msk.f32.gmra.mrb[124].mxu0 %vm1417_vm8, %v13004_v63 }
 0xbb1   :  { %v11052_v21 = vpop.f32.mrb[98].mxu1  ;;  %v11066_v22 = vpop.f32.mrb[102].mxu0 }
 0xbb2   :  { %v3252_v24 = vpop.f32.mrb[99].mxu1  ;;  %v3361_v25 = vpop.f32.mrb[103].mxu0 }
 0xbb3   :  { %v3291_v28 = vpack.c.bf16 %v11052_v21, %v3252_v24  ;;  %v3400_v29 = vpack.c.bf16 %v11066_v22, %v3361_v25  ;;  %v12392_v21 = vld [vmem:[#allocation7 + $0x20] sm:$0xff]   ;;  %v12393_v22 = vld [vmem:[#allocation7 + $0x28] sm:$0xff]   ;;  %v12394_v24 = vld [vmem:[#allocation7 + $0x30] sm:$0xff]  }
 0xbb4   :  { %v12395_v25 = vld [vmem:[#allocation7 + $0x38] sm:$0xff]  }
 0xbb5   :  { %v11055_v32 = vpop.f32.mrb[100].mxu1  ;;  %v11069_v33 = vpop.f32.mrb[104].mxu0  ;;  %11076 = vmatprep.subr.bf16.mxu1 %v3400_v29 }
 0xbb6   :  { %v3262_v36 = vpop.f32.mrb[101].mxu1  ;;  %v3371_v38 = vpop.f32.mrb[105].mxu0  ;;  %11077 = vmatpush3.bf16.msra.mxu1 %v3400_v29  ;;  %v3800_v29 = vld [vmem:[#allocation8 + $0x220] sm:$0xff] }
 0xbb7   :  { %v3292_v41 = vpack.c.bf16 %v11055_v32, %v3262_v36  ;;  %v3401_v42 = vpack.c.bf16 %v11069_v33, %v3371_v38  ;;  %v3801_v33 = vld [vmem:[#allocation8 + $0x228] sm:$0xff]  ;;  %v3802_v36 = vld [vmem:[#allocation8 + $0x230] sm:$0xff] }
 0xbb8   :  { %v12065_v38 = vpack.c.bf16 %v3802_v36, %v3801_v33 }
 0xbb9   :  { %v11058_v48 = vpop.f32.mrb[102].mxu1  ;;  %v11072_v53 = vpop.f32.mrb[106].mxu0  ;;  %11078 = vmatprep.subr.bf16.mxu1 %v3401_v42 }
 0xbba   :  { %v3272_v55 = vpop.f32.mrb[103].mxu1  ;;  %v3381_v9 = vpop.f32.mrb[107].mxu0  ;;  %11079 = vmatpush3.bf16.msra.mxu1 %v3401_v42  ;;  %v4018_v42 = vld [vmem:[#allocation8 + $0x248] sm:$0xff] }
 0xbbb   :  { %v3293_v63 = vpack.c.bf16 %v11058_v48, %v3272_v55  ;;  %v3402_v31 = vpack.c.bf16 %v11072_v53, %v3381_v9  ;;  %v13194_v55 = vld [vmem:[#allocation8 + $0x1e8] ss:$0 sm:$0xff] }
 0xbbd   :  { %v11061_v10 = vpop.f32.mrb[104].mxu1  ;;  %v11075_v13 = vpop.f32.mrb[108].mxu0  ;;  %11080 = vmatprep.subr.bf16.mxu1 %v3402_v31 }
 0xbbe   :  { %v3282_v34 = vpop.f32.mrb[105].mxu1  ;;  %v3391_v35 = vpop.f32.mrb[109].mxu0  ;;  %11081 = vmatpush3.bf16.msra.mxu1 %v3402_v31 }
 0xbbf   :  { %v3294_v14 = vpack.c.bf16 %v11061_v10, %v3282_v34  ;;  %v3403_v17 = vpack.c.bf16 %v11075_v13, %v3391_v35 }
 0xbc1   :  { %11082 = vmatprep.subr.bf16.mxu1 %v3403_v17  ;;  %v13147_v39 = vpop.f32.mrb[110].mxu0 }
 0xbc2   :  { %11083 = vmatpush3.bf16.msra.mxu1 %v3403_v17  ;;  %v13149_v40 = vpop.f32.mrb[111].mxu0 }
 0xbc3   :  { %11100 = vmatprep.subr.bf16.mxu1 %v3291_v28 }
 0xbc5   :  { %11085 = vmatmul.mubr.msk.bf16.vlgmr.msra.gmra.mrb[108].mxu1 %vm243_vm4, %v12381_v19  ;;  %v13152_v44 = vpop.f32.mrb[112].mxu0 }
 0xbc6   :  { %11101 = vmatpush3.bf16.msra.mxu1 %v3291_v28  ;;  %v13154_v37 = vpop.f32.mrb[113].mxu0  ;;  %11088 = vmatprep.mubr.msk.bf16.mxu1 %vm243_vm4, %v12382_v54  ;;  %v3799_v28 = vld [vmem:[#allocation8 + $0x218] sm:$0xff] }
 0xbc7   :  { %11102 = vmatprep.subr.bf16.mxu1 %v3292_v41  ;;  %v12061_v32 = vpack.c.bf16 %v3800_v29, %v3799_v28 }
 0xbc9   :  { %v13157_v61 = vpop.f32.mrb[114].mxu0  ;;  %12062 = vmatprep.subr.bf16.mxu0 %v12061_v32 }
 0xbca   :  { %11103 = vmatpush3.bf16.msra.mxu1 %v3292_v41  ;;  %v13159_v47 = vpop.f32.mrb[115].mxu0  ;;  %12064 = vmatpush3.bf16.msra.mxu0 %v12061_v32  ;;  %v4017_v41 = vld [vmem:[#allocation8 + $0x240] sm:$0xff] }
 0xbcb   :  { %11104 = vmatprep.subr.bf16.mxu1 %v3293_v63  ;;  %12066 = vmatprep.subr.bf16.mxu0 %v12065_v38  ;;  %v12069_v48 = vpack.c.bf16 %v4018_v42, %v4017_v41 }
 0xbcd   :  { %11089 = vmatmul.mubr.msk.bf16.gmra.mrb[112].mxu1 %vm243_vm4, %v12383_v45  ;;  %v13162_v57 = vpop.f32.mrb[116].mxu0 }
 0xbce   :  { %11105 = vmatpush3.bf16.msra.mxu1 %v3293_v63  ;;  %v13164_v0 = vpop.f32.mrb[117].mxu0  ;;  %11092 = vmatprep.mubr.msk.bf16.mxu1 %vm243_vm4, %v12384_v46 }
 0xbcf   :  { %11106 = vmatprep.subr.bf16.mxu1 %v3294_v14  ;;  %12068 = vmatpush3.bf16.msra.mxu0 %v12065_v38 }
 0xbd1   :  { %v13167_v1 = vpop.f32.mrb[118].mxu0 }
 0xbd2   :  { %11107 = vmatpush3.bf16.msra.mxu1 %v3294_v14  ;;  %v13169_v58 = vpop.f32.mrb[119].mxu0 }
 0xbd3   :  { %12070 = vmatprep.subr.bf16.mxu1 %v12069_v48 }
 0xbd5   :  { %11093 = vmatmul.mubr.msk.bf16.gmra.mrb[116].mxu1 %vm243_vm4, %v12385_v2  ;;  %v13172_v43 = vpop.f32.mrb[120].mxu0 }
 0xbd6   :  { %v13174_v60 = vpop.f32.mrb[121].mxu0  ;;  %11096 = vmatprep.mubr.msk.bf16.mxu1 %vm243_vm4, %v12386_v3 }
 0xbd9   :  { %v13177_v4 = vpop.f32.mrb[122].mxu0 }
 0xbda   :  { %v13179_v7 = vpop.f32.mrb[123].mxu0 }
 0xbdd   :  { %11097 = vmatmul.mubr.msk.bf16.gmra.mrb[120].mxu1 %vm243_vm4, %v12387_v12  ;;  %v13182_v52 = vpop.f32.mrb[124].mxu0 }
 0xbde   :  { %v13184_v51 = vpop.f32.mrb[125].mxu0  ;;  %11108 = vmatprep.mubr.msk.bf16.mxu1 %vm243_vm4, %v12388_v16 }
 0xbe5   :  { %11109 = vmatmul.mubr.msk.bf16.vlgmr.msra.gmra.mrb[108].mxu1 %vm243_vm4, %v12389_v23 }
 0xbe6   :  { %11112 = vmatprep.mubr.msk.bf16.mxu1 %vm243_vm4, %v12390_v59  ;;  %12072 = vmatpush3.bf16.msra.mxu1 %v12069_v48 }
 0xbed   :  { %11113 = vmatmul.mubr.msk.bf16.gmra.mrb[112].mxu1 %vm243_vm4, %v12391_v30 }
 0xbee   :  { %11116 = vmatprep.mubr.msk.bf16.mxu1 %vm243_vm4, %v12392_v21 }
 0xbf5   :  { %11117 = vmatmul.mubr.msk.bf16.gmra.mrb[116].mxu1 %vm243_vm4, %v12393_v22 }
 0xbf6   :  { %11120 = vmatprep.mubr.msk.bf16.mxu1 %vm243_vm4, %v12394_v24 }
 0xbfd   :  { %11121 = vmatmul.mubr.msk.bf16.gmra.mrb[120].mxu1 %vm243_vm4, %v12395_v25 }
 0xcb8   :  { %v11110_v53 = vpop.f32.mrb[108].mxu1 }
 0xcb9   :  { %v3748_v9 = vadd.f32 %v11110_v53, %v13154_v37  ;;  %v3535_v63 = vpop.f32.mrb[109].mxu1 }
 0xcba   :  { %v3746_v31 = vadd.f32 %v13149_v40, %v3535_v63  ;;  %v11111_v10 = vpop.f32.mrb[110].mxu1 }
 0xcbb   :  { %v3749_v13 = vadd.f32 %v13152_v44, %v11111_v10  ;;  %v3538_v34 = vpop.f32.mrb[111].mxu1  ;;  %v3768_v17 = vadd.f32 %v13194_v55, %v3748_v9 }
 0xcbc   :  { %v3766_v35 = vadd.f32 %v13194_v55, %v3746_v31  ;;  %v3747_v14 = vadd.f32 %v13147_v39, %v3538_v34 }
 0xcbd   :  { %v3769_v45 = vadd.f32 %v13194_v55, %v3749_v13  ;;  %v3784_v40 = vmax.f32 %v3768_v17, 0.0 }
 0xcbe   :  { %v3782_v19 = vmax.f32 %v3766_v35, 0.0  ;;  %v3767_v54 = vadd.f32 %v13194_v55, %v3747_v14 }
 0xcbf   :  { %v3785_v23 = vmax.f32 %v3769_v45, 0.0 }
 0xcc0   :  { %v3783_v46 = vmax.f32 %v3767_v54, 0.0  ;;  %v11114_v37 = vpop.f32.mrb[112].mxu1  ;;  %11160 = vmatprep.mubr.msk.f32.mxu0 %vm1675_vm9, %v3782_v19 }
 0xcc1   :  { %v3752_v2 = vadd.f32 %v11114_v37, %v13164_v0  ;;  %v3551_v44 = vpop.f32.mrb[113].mxu1 }
 0xcc2   :  { %v3750_v3 = vadd.f32 %v13159_v47, %v3551_v44  ;;  %v11115_v12 = vpop.f32.mrb[114].mxu1  ;;  %11161 = vmatmul.mubr.msk.f32.vlgmr.msra.gmra.mrb[126].mxu0 %vm1675_vm9, %v3783_v46  ;;  %v4235_v44 = vld [vmem:[#allocation8 + $0x268] sm:$0xff] }
 0xcc3   :  { %v3753_v39 = vadd.f32 %v13162_v57, %v11115_v12  ;;  %v3554_v16 = vpop.f32.mrb[115].mxu1  ;;  %11163 = vmatprep.mubr.msk.f32.mxu0 %vm1675_vm9, %v3784_v40  ;;  %v3772_v21 = vadd.f32 %v13194_v55, %v3752_v2  ;;  %v4020_v40 = vld [vmem:[#allocation8 + $0x258] sm:$0xff] }
 0xcc4   :  { %v3770_v59 = vadd.f32 %v13194_v55, %v3750_v3  ;;  %v3751_v30 = vadd.f32 %v13157_v61, %v3554_v16  ;;  %v4236_v3 = vld [vmem:[#allocation8 + $0x270] sm:$0xff] }
 0xcc5   :  { %v3773_v47 = vadd.f32 %v13194_v55, %v3753_v39  ;;  %v3788_v57 = vmax.f32 %v3772_v21, 0.0  ;;  %v12077_v12 = vpack.c.bf16 %v4236_v3, %v4235_v44  ;;  %v4237_v3 = vld [vmem:[#allocation8 + $0x278] sm:$0xff] }
 0xcc6   :  { %v3786_v22 = vmax.f32 %v3770_v59, 0.0  ;;  %v3771_v0 = vadd.f32 %v13194_v55, %v3751_v30  ;;  %11164 = vmatmul.mubr.msk.f32.gmra.mrb[128].mxu0 %vm1675_vm9, %v3785_v23 }
 0xcc7   :  { %v3789_v38 = vmax.f32 %v3773_v47, 0.0  ;;  %12078 = vmatprep.subr.bf16.mxu0 %v12077_v12 }
 0xcc8   :  { %v3787_v24 = vmax.f32 %v3771_v0, 0.0  ;;  %v11118_v25 = vpop.f32.mrb[116].mxu1  ;;  %11166 = vmatprep.mubr.msk.f32.mxu0 %vm1675_vm9, %v3786_v22  ;;  %12080 = vmatpush3.bf16.msra.mxu0 %v12077_v12  ;;  %v4238_v12 = vld [vmem:[#allocation8 + $0x280] sm:$0xff] }
 0xcc9   :  { %v3756_v28 = vadd.f32 %v11118_v25, %v13174_v60  ;;  %v3567_v29 = vpop.f32.mrb[117].mxu1 }
 0xcca   :  { %v3754_v32 = vadd.f32 %v13169_v58, %v3567_v29  ;;  %v11119_v61 = vpop.f32.mrb[118].mxu1  ;;  %11167 = vmatmul.mubr.msk.f32.gmra.mrb[130].mxu0 %vm1675_vm9, %v3787_v24 }
 0xccb   :  { %v3757_v33 = vadd.f32 %v13172_v43, %v11119_v61  ;;  %v3570_v36 = vpop.f32.mrb[119].mxu1  ;;  %11169 = vmatprep.mubr.msk.f32.mxu0 %vm1675_vm9, %v3788_v57  ;;  %v3776_v48 = vadd.f32 %v13194_v55, %v3756_v28 }
 0xccc   :  { %v3774_v41 = vadd.f32 %v13194_v55, %v3754_v32  ;;  %v3755_v42 = vadd.f32 %v13167_v1, %v3570_v36 }
 0xccd   :  { %v3777_v58 = vadd.f32 %v13194_v55, %v3757_v33  ;;  %v3792_v43 = vmax.f32 %v3776_v48, 0.0 }
 0xcce   :  { %v3790_v53 = vmax.f32 %v3774_v41, 0.0  ;;  %v3775_v60 = vadd.f32 %v13194_v55, %v3755_v42  ;;  %11170 = vmatmul.mubr.msk.f32.gmra.mrb[132].mxu0 %vm1675_vm9, %v3789_v38 }
 0xccf   :  { %v3793_v14 = vmax.f32 %v3777_v58, 0.0 }
 0xcd0   :  { %v3791_v9 = vmax.f32 %v3775_v60, 0.0  ;;  %v11122_v63 = vpop.f32.mrb[120].mxu1  ;;  %11172 = vmatprep.mubr.msk.f32.mxu0 %vm1675_vm9, %v3790_v53 }
 0xcd1   :  { %v3760_v31 = vadd.f32 %v11122_v63, %v13184_v51  ;;  %v3583_v10 = vpop.f32.mrb[121].mxu1 }
 0xcd2   :  { %v3758_v13 = vadd.f32 %v13179_v7, %v3583_v10  ;;  %v11123_v1 = vpop.f32.mrb[122].mxu1  ;;  %11173 = vmatmul.mubr.msk.f32.gmra.mrb[134].mxu0 %vm1675_vm9, %v3791_v9 }
 0xcd3   :  { %v3761_v34 = vadd.f32 %v13182_v52, %v11123_v1  ;;  %v3586_v35 = vpop.f32.mrb[123].mxu1  ;;  %11175 = vmatprep.mubr.msk.f32.mxu0 %vm1675_vm9, %v3792_v43  ;;  %v3780_v54 = vadd.f32 %v13194_v55, %v3760_v31 }
 0xcd4   :  { %v3778_v17 = vadd.f32 %v13194_v55, %v3758_v13  ;;  %v3759_v19 = vadd.f32 %v13177_v4, %v3586_v35  ;;  %v4019_v4 = vld [vmem:[#allocation8 + $0x250] sm:$0xff] }
 0xcd5   :  { %v3781_v7 = vadd.f32 %v13194_v55, %v3761_v34  ;;  %v3796_v52 = vmax.f32 %v3780_v54, 0.0  ;;  %v12073_v2 = vpack.c.bf16 %v4020_v40, %v4019_v4 }
 0xcd6   :  { %v3794_v45 = vmax.f32 %v3778_v17, 0.0  ;;  %v3779_v51 = vadd.f32 %v13194_v55, %v3759_v19  ;;  %11176 = vmatmul.mubr.msk.f32.gmra.mrb[136].mxu0 %vm1675_vm9, %v3793_v14  ;;  %v9426_v55 = vld [vmem:[#allocation8 + $0x210] ss:$0 sm:$0xff] }
 0xcd7   :  { %v3797_v37 = vmax.f32 %v3781_v7, 0.0  ;;  %12074 = vmatprep.subr.bf16.mxu1 %v12073_v2 }
 0xcd8   :  { %v3795_v46 = vmax.f32 %v3779_v51, 0.0  ;;  %11178 = vmatprep.mubr.msk.f32.mxu0 %vm1675_vm9, %v3794_v45  ;;  %12076 = vmatpush3.bf16.msra.mxu1 %v12073_v2 }
 0xcda   :  { %11179 = vmatmul.mubr.msk.f32.gmra.mrb[138].mxu0 %vm1675_vm9, %v3795_v46 }
 0xcdb   :  { %11181 = vmatprep.mubr.msk.f32.mxu0 %vm1675_vm9, %v3796_v52 }
 0xcde   :  { %11182 = vmatmul.mubr.msk.f32.gmra.mrb[140].mxu0 %vm1675_vm9, %v3797_v37 }
 0xd95   :  { %v11162_v39 = vpop.f32.mrb[126].mxu0 }
 0xd96   :  { %v3927_v16 = vadd.f32 %v11162_v39, %v9426_v55  ;;  %v3921_v23 = vpop.f32.mrb[127].mxu0  ;;  %v12081_v39 = vpack.c.bf16 %v4238_v12, %v4237_v3 }
 0xd97   :  { %v3922_v59 = vadd.f32 %v9426_v55, %v3921_v23  ;;  %v4439_v23 = vld [vmem:[#allocation8 + $0x2a0] sm:$0xf] }
 0xd98   :  { %v4001_v22 = vmax.f32 %v3927_v16, 0.0  ;;  %12082 = vmatprep.subr.bf16.mxu0 %v12081_v39  ;;  %v4438_v16 = vld [vmem:[#allocation8 + $0x298] sm:$0xff] }
 0xd99   :  { %v4000_v30 = vmax.f32 %v3922_v59, 0.0  ;;  %v11165_v21 = vpop.f32.mrb[128].mxu0  ;;  %12084 = vmatpush3.bf16.msra.mxu0 %v12081_v39  ;;  %v12085_v59 = vpack.c.bf16 %v4439_v23, %v4438_v16  ;;  %v9460_v23 = vld [vmem:[#allocation8 + $0x260] ss:$0 sm:$0xff] }
 0xd9a   :  { %v3937_v0 = vadd.f32 %v11165_v21, %v9426_v55  ;;  %v3931_v47 = vpop.f32.mrb[129].mxu0 }
 0xd9b   :  { %v3932_v24 = vadd.f32 %v9426_v55, %v3931_v47  ;;  %11192 = vmatprep.mubr.msk.f32.mxu1 %vm1675_vm9, %v4000_v30  ;;  %12087 = vmatprep.subr.msk.bf16.mxu1 %vm12720_vm6, %v12085_v59 }
 0xd9c   :  { %11193 = vmatmul.mubr.msk.f32.vlgmr.msra.gmra.mrb[106].mxu1 %vm1675_vm9, %v4001_v22  ;;  %v4003_v28 = vmax.f32 %v3937_v0, 0.0 }
 0xd9d   :  { %v4002_v25 = vmax.f32 %v3932_v24, 0.0  ;;  %v11168_v57 = vpop.f32.mrb[130].mxu0  ;;  %12090 = vmatpush3.bf16.msk.msra.mxu1 %vm12720_vm6, %v12085_v59 }
 0xd9e   :  { %v3947_v29 = vadd.f32 %v11168_v57, %v9426_v55  ;;  %v3941_v32 = vpop.f32.mrb[131].mxu0 }
 0xd9f   :  { %v3942_v61 = vadd.f32 %v9426_v55, %v3941_v32  ;;  %11195 = vmatprep.mubr.msk.f32.mxu1 %vm1675_vm9, %v4002_v25 }
 0xda0   :  { %11196 = vmatmul.mubr.msk.f32.gmra.mrb[124].mxu1 %vm1675_vm9, %v4003_v28  ;;  %v4005_v38 = vmax.f32 %v3947_v29, 0.0 }
 0xda1   :  { %v4004_v33 = vmax.f32 %v3942_v61, 0.0  ;;  %v11171_v36 = vpop.f32.mrb[132].mxu0 }
 0xda2   :  { %v3957_v41 = vadd.f32 %v11171_v36, %v9426_v55  ;;  %v3951_v42 = vpop.f32.mrb[133].mxu0 }
 0xda3   :  { %v3952_v48 = vadd.f32 %v9426_v55, %v3951_v42  ;;  %11198 = vmatprep.mubr.msk.f32.mxu1 %vm1675_vm9, %v4004_v33 }
 0xda4   :  { %11199 = vmatmul.mubr.msk.f32.gmra.mrb[126].mxu1 %vm1675_vm9, %v4005_v38  ;;  %v4007_v58 = vmax.f32 %v3957_v41, 0.0 }
 0xda5   :  { %v4006_v53 = vmax.f32 %v3952_v48, 0.0  ;;  %v11174_v60 = vpop.f32.mrb[134].mxu0 }
 0xda6   :  { %v3967_v9 = vadd.f32 %v11174_v60, %v9426_v55  ;;  %v3961_v63 = vpop.f32.mrb[135].mxu0 }
 0xda7   :  { %v3962_v43 = vadd.f32 %v9426_v55, %v3961_v63  ;;  %11201 = vmatprep.mubr.msk.f32.mxu1 %vm1675_vm9, %v4006_v53 }
 0xda8   :  { %11202 = vmatmul.mubr.msk.f32.gmra.mrb[128].mxu1 %vm1675_vm9, %v4007_v58  ;;  %v4009_v13 = vmax.f32 %v3967_v9, 0.0 }
 0xda9   :  { %v4008_v31 = vmax.f32 %v3962_v43, 0.0  ;;  %v11177_v10 = vpop.f32.mrb[136].mxu0 }
 0xdaa   :  { %v3977_v1 = vadd.f32 %v11177_v10, %v9426_v55  ;;  %v3971_v34 = vpop.f32.mrb[137].mxu0 }
 0xdab   :  { %v3972_v35 = vadd.f32 %v9426_v55, %v3971_v34  ;;  %11204 = vmatprep.mubr.msk.f32.mxu1 %vm1675_vm9, %v4008_v31 }
 0xdac   :  { %11205 = vmatmul.mubr.msk.f32.gmra.mrb[130].mxu1 %vm1675_vm9, %v4009_v13  ;;  %v4011_v19 = vmax.f32 %v3977_v1, 0.0 }
 0xdad   :  { %v4010_v14 = vmax.f32 %v3972_v35, 0.0  ;;  %v11180_v17 = vpop.f32.mrb[138].mxu0 }
 0xdae   :  { %v3987_v54 = vadd.f32 %v11180_v17, %v9426_v55  ;;  %v3981_v45 = vpop.f32.mrb[139].mxu0 }
 0xdaf   :  { %v3982_v51 = vadd.f32 %v9426_v55, %v3981_v45  ;;  %11207 = vmatprep.mubr.msk.f32.mxu1 %vm1675_vm9, %v4010_v14 }
 0xdb0   :  { %11208 = vmatmul.mubr.msk.f32.gmra.mrb[132].mxu1 %vm1675_vm9, %v4011_v19  ;;  %v4013_v52 = vmax.f32 %v3987_v54, 0.0 }
 0xdb1   :  { %v4012_v7 = vmax.f32 %v3982_v51, 0.0  ;;  %v11183_v46 = vpop.f32.mrb[140].mxu0 }
 0xdb2   :  { %v3997_v37 = vadd.f32 %v11183_v46, %v9426_v55  ;;  %v3991_v4 = vpop.f32.mrb[141].mxu0 }
 0xdb3   :  { %v3992_v40 = vadd.f32 %v9426_v55, %v3991_v4  ;;  %11210 = vmatprep.mubr.msk.f32.mxu1 %vm1675_vm9, %v4012_v7  ;;  %v9443_v55 = vld [vmem:[#allocation8 + $0x238] ss:$0 sm:$0xff] }
 0xdb4   :  { %11211 = vmatmul.mubr.msk.f32.gmra.mrb[134].mxu1 %vm1675_vm9, %v4013_v52  ;;  %v4015_v44 = vmax.f32 %v3997_v37, 0.0 }
 0xdb5   :  { %v4014_v2 = vmax.f32 %v3992_v40, 0.0 }
 0xdb7   :  { %11213 = vmatprep.mubr.msk.f32.mxu1 %vm1675_vm9, %v4014_v2 }
 0xdb8   :  { %11214 = vmatmul.mubr.msk.f32.gmra.mrb[136].mxu1 %vm1675_vm9, %v4015_v44 }
 0xe6f   :  { %v11194_v30 = vpop.f32.mrb[106].mxu1 }
 0xe70   :  { %v4145_v21 = vadd.f32 %v11194_v30, %v9443_v55  ;;  %v4139_v22 = vpop.f32.mrb[107].mxu1 }
 0xe71   :  { %v4140_v0 = vadd.f32 %v9443_v55, %v4139_v22 }
 0xe72   :  { %v4219_v25 = vmax.f32 %v4145_v21, 0.0 }
 0xe73   :  { %v4218_v47 = vmax.f32 %v4140_v0, 0.0  ;;  %v11197_v24 = vpop.f32.mrb[124].mxu1 }
 0xe74   :  { %v4155_v57 = vadd.f32 %v11197_v24, %v9443_v55  ;;  %v4149_v28 = vpop.f32.mrb[125].mxu1 }
 0xe75   :  { %v4150_v29 = vadd.f32 %v9443_v55, %v4149_v28  ;;  %11224 = vmatprep.mubr.msk.f32.mxu0 %vm1675_vm9, %v4218_v47 }
 0xe76   :  { %11225 = vmatmul.mubr.msk.f32.vlgmr.msra.gmra.mrb[142].mxu0 %vm1675_vm9, %v4219_v25  ;;  %v4221_v33 = vmax.f32 %v4155_v57, 0.0 }
 0xe77   :  { %v4220_v32 = vmax.f32 %v4150_v29, 0.0  ;;  %v11200_v61 = vpop.f32.mrb[126].mxu1 }
 0xe78   :  { %v4165_v36 = vadd.f32 %v11200_v61, %v9443_v55  ;;  %v4159_v38 = vpop.f32.mrb[127].mxu1 }
 0xe79   :  { %v4160_v41 = vadd.f32 %v9443_v55, %v4159_v38  ;;  %11227 = vmatprep.mubr.msk.f32.mxu0 %vm1675_vm9, %v4220_v32 }
 0xe7a   :  { %11228 = vmatmul.mubr.msk.f32.gmra.mrb[144].mxu0 %vm1675_vm9, %v4221_v33  ;;  %v4223_v53 = vmax.f32 %v4165_v36, 0.0 }
 0xe7b   :  { %v4222_v42 = vmax.f32 %v4160_v41, 0.0  ;;  %v11203_v48 = vpop.f32.mrb[128].mxu1 }
 0xe7c   :  { %v4175_v60 = vadd.f32 %v11203_v48, %v9443_v55  ;;  %v4169_v58 = vpop.f32.mrb[129].mxu1 }
 0xe7d   :  { %v4170_v9 = vadd.f32 %v9443_v55, %v4169_v58  ;;  %11230 = vmatprep.mubr.msk.f32.mxu0 %vm1675_vm9, %v4222_v42 }
 0xe7e   :  { %11231 = vmatmul.mubr.msk.f32.gmra.mrb[146].mxu0 %vm1675_vm9, %v4223_v53  ;;  %v4225_v31 = vmax.f32 %v4175_v60, 0.0 }
 0xe7f   :  { %v4224_v63 = vmax.f32 %v4170_v9, 0.0  ;;  %v11206_v43 = vpop.f32.mrb[130].mxu1 }
 0xe80   :  { %v4185_v10 = vadd.f32 %v11206_v43, %v9443_v55  ;;  %v4179_v13 = vpop.f32.mrb[131].mxu1 }
 0xe81   :  { %v4180_v1 = vadd.f32 %v9443_v55, %v4179_v13  ;;  %11233 = vmatprep.mubr.msk.f32.mxu0 %vm1675_vm9, %v4224_v63 }
 0xe82   :  { %11234 = vmatmul.mubr.msk.f32.gmra.mrb[148].mxu0 %vm1675_vm9, %v4225_v31  ;;  %v4227_v14 = vmax.f32 %v4185_v10, 0.0 }
 0xe83   :  { %v4226_v34 = vmax.f32 %v4180_v1, 0.0  ;;  %v11209_v35 = vpop.f32.mrb[132].mxu1 }
 0xe84   :  { %v4195_v17 = vadd.f32 %v11209_v35, %v9443_v55  ;;  %v4189_v19 = vpop.f32.mrb[133].mxu1 }
 0xe85   :  { %v4190_v54 = vadd.f32 %v9443_v55, %v4189_v19  ;;  %11236 = vmatprep.mubr.msk.f32.mxu0 %vm1675_vm9, %v4226_v34 }
 0xe86   :  { %11237 = vmatmul.mubr.msk.f32.gmra.mrb[150].mxu0 %vm1675_vm9, %v4227_v14  ;;  %v4229_v7 = vmax.f32 %v4195_v17, 0.0 }
 0xe87   :  { %v4228_v45 = vmax.f32 %v4190_v54, 0.0  ;;  %v11212_v51 = vpop.f32.mrb[134].mxu1 }
 0xe88   :  { %v4205_v46 = vadd.f32 %v11212_v51, %v9443_v55  ;;  %v4199_v52 = vpop.f32.mrb[135].mxu1 }
 0xe89   :  { %v4200_v37 = vadd.f32 %v9443_v55, %v4199_v52  ;;  %11239 = vmatprep.mubr.msk.f32.mxu0 %vm1675_vm9, %v4228_v45 }
 0xe8a   :  { %11240 = vmatmul.mubr.msk.f32.gmra.mrb[152].mxu0 %vm1675_vm9, %v4229_v7  ;;  %v4231_v2 = vmax.f32 %v4205_v46, 0.0 }
 0xe8b   :  { %v4230_v4 = vmax.f32 %v4200_v37, 0.0  ;;  %v11215_v40 = vpop.f32.mrb[136].mxu1 }
 0xe8c   :  { %v4215_v44 = vadd.f32 %v11215_v40, %v9443_v55  ;;  %v4209_v3 = vpop.f32.mrb[137].mxu1 }
 0xe8d   :  { %v4210_v12 = vadd.f32 %v9443_v55, %v4209_v3  ;;  %11242 = vmatprep.mubr.msk.f32.mxu0 %vm1675_vm9, %v4230_v4 }
 0xe8e   :  { %11243 = vmatmul.mubr.msk.f32.gmra.mrb[154].mxu0 %vm1675_vm9, %v4231_v2  ;;  %v4233_v16 = vmax.f32 %v4215_v44, 0.0 }
 0xe8f   :  { %v4232_v39 = vmax.f32 %v4210_v12, 0.0 }
 0xe91   :  { %11245 = vmatprep.mubr.msk.f32.mxu0 %vm1675_vm9, %v4232_v39 }
 0xe92   :  { %11246 = vmatmul.mubr.msk.f32.gmra.mrb[156].mxu0 %vm1675_vm9, %v4233_v16 }
 0xe93   :  { %11292 = vmatprep.mubr.bf16.mxu0 %v13010_v56 }
 0xf49   :  { %v11226_v59 = vpop.f32.mrb[142].mxu0 }
 0xf4a   :  { %v4357_v30 = vpop.f32.mrb[143].mxu0  ;;  %v13283_v22 = vadd.f32 %v11226_v59, %v9460_v23 }
 0xf4b   :  { %v13281_v21 = vadd.f32 %v9460_v23, %v4357_v30 }
 0xf4d   :  { %v11229_v55 = vpop.f32.mrb[144].mxu0  ;;  %11252 = vmatprep.mubr.msk.f32.mxu1 %vm1417_vm8, %v13281_v21 }
 0xf4e   :  { %v4367_v0 = vpop.f32.mrb[145].mxu0  ;;  %11253 = vmatmul.mubr.msk.f32.vlgmr.msra.gmra.mrb[138].mxu1 %vm1417_vm8, %v13283_v22  ;;  %v13291_v24 = vadd.f32 %v11229_v55, %v9460_v23 }
 0xf4f   :  { %v13289_v47 = vadd.f32 %v9460_v23, %v4367_v0 }
 0xf51   :  { %v11232_v25 = vpop.f32.mrb[146].mxu0  ;;  %11255 = vmatprep.mubr.msk.f32.mxu1 %vm1417_vm8, %v13289_v47 }
 0xf52   :  { %v4377_v57 = vpop.f32.mrb[147].mxu0  ;;  %11256 = vmatmul.mubr.msk.f32.gmra.mrb[140].mxu1 %vm1417_vm8, %v13291_v24  ;;  %v13299_v29 = vadd.f32 %v11232_v25, %v9460_v23 }
 0xf53   :  { %v13297_v28 = vadd.f32 %v9460_v23, %v4377_v57  ;;  %v4437_v57 = vld [vmem:[#allocation8 + $0x290] sm:$0xff] }
 0xf55   :  { %v11235_v32 = vpop.f32.mrb[148].mxu0  ;;  %11258 = vmatprep.mubr.msk.f32.mxu1 %vm1417_vm8, %v13297_v28 }
 0xf56   :  { %v4387_v61 = vpop.f32.mrb[149].mxu0  ;;  %11259 = vmatmul.mubr.msk.f32.gmra.mrb[142].mxu1 %vm1417_vm8, %v13299_v29  ;;  %v13307_v36 = vadd.f32 %v11235_v32, %v9460_v23 }
 0xf57   :  { %v13305_v33 = vadd.f32 %v9460_v23, %v4387_v61  ;;  %v4838_v61 = vld [vmem:[#allocation8 + $0x2c8] sm:$0xff] }
 0xf59   :  { %v11238_v38 = vpop.f32.mrb[150].mxu0  ;;  %11261 = vmatprep.mubr.msk.f32.mxu1 %vm1417_vm8, %v13305_v33 }
 0xf5a   :  { %v4397_v41 = vpop.f32.mrb[151].mxu0  ;;  %11262 = vmatmul.mubr.msk.f32.gmra.mrb[144].mxu1 %vm1417_vm8, %v13307_v36  ;;  %v13315_v48 = vadd.f32 %v11238_v38, %v9460_v23  ;;  %v4982_v38 = vld [vmem:[#allocation8 + $0x2e0] sm:$0xff] }
 0xf5b   :  { %v13313_v42 = vadd.f32 %v9460_v23, %v4397_v41 }
 0xf5d   :  { %v11241_v53 = vpop.f32.mrb[152].mxu0  ;;  %11264 = vmatprep.mubr.msk.f32.mxu1 %vm1417_vm8, %v13313_v42 }
 0xf5e   :  { %v4407_v60 = vpop.f32.mrb[153].mxu0  ;;  %11265 = vmatmul.mubr.msk.f32.gmra.mrb[146].mxu1 %vm1417_vm8, %v13315_v48  ;;  %v13323_v9 = vadd.f32 %v11241_v53, %v9460_v23 }
 0xf5f   :  { %v13321_v58 = vadd.f32 %v9460_v23, %v4407_v60 }
 0xf61   :  { %v11244_v63 = vpop.f32.mrb[154].mxu0  ;;  %11267 = vmatprep.mubr.msk.f32.mxu1 %vm1417_vm8, %v13321_v58 }
 0xf62   :  { %v4417_v43 = vpop.f32.mrb[155].mxu0  ;;  %11268 = vmatmul.mubr.msk.f32.gmra.mrb[148].mxu1 %vm1417_vm8, %v13323_v9  ;;  %v13331_v10 = vadd.f32 %v11244_v63, %v9460_v23 }
 0xf63   :  { %v13329_v31 = vadd.f32 %v9460_v23, %v4417_v43 }
 0xf65   :  { %v11247_v13 = vpop.f32.mrb[156].mxu0  ;;  %11270 = vmatprep.mubr.msk.f32.mxu1 %vm1417_vm8, %v13329_v31 }
 0xf66   :  { %v4427_v1 = vpop.f32.mrb[157].mxu0  ;;  %11271 = vmatmul.mubr.msk.f32.gmra.mrb[150].mxu1 %vm1417_vm8, %v13331_v10  ;;  %v13339_v35 = vadd.f32 %v11247_v13, %v9460_v23 }
 0xf67   :  { %v13337_v34 = vadd.f32 %v9460_v23, %v4427_v1  ;;  %v9502_v1 = vld [vmem:[#allocation8 + $0x288] ss:$0 sm:$0xff] }
 0xf69   :  { %11273 = vmatprep.mubr.msk.f32.mxu1 %vm1417_vm8, %v13337_v34 }
 0xf6a   :  { %11274 = vmatmul.mubr.msk.f32.gmra.mrb[152].mxu1 %vm1417_vm8, %v13339_v35 }
0x1021   :  { %v11254_v14 = vpop.f32.mrb[138].mxu1 }
0x1022   :  { %v4557_v17 = vpop.f32.mrb[139].mxu1 }
0x1023   :  { %v4636_v19 = vpack.c.bf16 %v11254_v14, %v4557_v17 }
0x1025   :  { %v11257_v54 = vpop.f32.mrb[140].mxu1  ;;  %11276 = vmatprep.subr.bf16.mxu0 %v4636_v19 }
0x1026   :  { %v4567_v45 = vpop.f32.mrb[141].mxu1  ;;  %11277 = vmatpush3.bf16.msra.mxu0 %v4636_v19 }
0x1027   :  { %v4637_v51 = vpack.c.bf16 %v11257_v54, %v4567_v45 }
0x1029   :  { %v11260_v7 = vpop.f32.mrb[142].mxu1  ;;  %11278 = vmatprep.subr.bf16.mxu0 %v4637_v51 }
0x102a   :  { %v4577_v46 = vpop.f32.mrb[143].mxu1  ;;  %11279 = vmatpush3.bf16.msra.mxu0 %v4637_v51 }
0x102b   :  { %v4638_v52 = vpack.c.bf16 %v11260_v7, %v4577_v46 }
0x102d   :  { %v11263_v37 = vpop.f32.mrb[144].mxu1  ;;  %11280 = vmatprep.subr.bf16.mxu0 %v4638_v52 }
0x102e   :  { %v4587_v4 = vpop.f32.mrb[145].mxu1  ;;  %11281 = vmatpush3.bf16.msra.mxu0 %v4638_v52 }
0x102f   :  { %v4639_v40 = vpack.c.bf16 %v11263_v37, %v4587_v4 }
0x1031   :  { %v11266_v2 = vpop.f32.mrb[146].mxu1  ;;  %11282 = vmatprep.subr.bf16.mxu0 %v4639_v40 }
0x1032   :  { %v4597_v44 = vpop.f32.mrb[147].mxu1  ;;  %11283 = vmatpush3.bf16.msra.mxu0 %v4639_v40 }
0x1033   :  { %v4640_v3 = vpack.c.bf16 %v11266_v2, %v4597_v44 }
0x1035   :  { %v11269_v12 = vpop.f32.mrb[148].mxu1  ;;  %11284 = vmatprep.subr.bf16.mxu0 %v4640_v3 }
0x1036   :  { %v4607_v39 = vpop.f32.mrb[149].mxu1  ;;  %11285 = vmatpush3.bf16.msra.mxu0 %v4640_v3 }
0x1037   :  { %v4641_v16 = vpack.c.bf16 %v11269_v12, %v4607_v39 }
0x1039   :  { %v11272_v23 = vpop.f32.mrb[150].mxu1  ;;  %11286 = vmatprep.subr.bf16.mxu0 %v4641_v16 }
0x103a   :  { %v4617_v59 = vpop.f32.mrb[151].mxu1  ;;  %11287 = vmatpush3.bf16.msra.mxu0 %v4641_v16 }
0x103b   :  { %v4642_v30 = vpack.c.bf16 %v11272_v23, %v4617_v59 }
0x103d   :  { %v11275_v55 = vpop.f32.mrb[152].mxu1  ;;  %11288 = vmatprep.subr.bf16.mxu0 %v4642_v30 }
0x103e   :  { %v4627_v0 = vpop.f32.mrb[153].mxu1  ;;  %11289 = vmatpush3.bf16.msra.mxu0 %v4642_v30 }
0x103f   :  { %v4643_v25 = vpack.c.bf16 %v11275_v55, %v4627_v0 }
0x1041   :  { %11290 = vmatprep.subr.bf16.mxu0 %v4643_v25 }
0x1042   :  { %11291 = vmatpush3.bf16.msra.mxu0 %v4643_v25 }
0x1043   :  { %11300 = vmatprep.subr.mxu0 %v4437_v57 }
0x1045   :  { %11293 = vmatmul.mubr.bf16.vlgmr.msra.gmra.mrb[160].mxu0 %v13013_v18 }
0x1046   :  { %11296 = vmatprep.mubr.bf16.mxu0 %v13015_v26  ;;  %11301 = vmatpush3.msra.mxu0 %v4437_v57 }
0x104d   :  { %11297 = vmatmul.mubr.bf16.gmra.mrb[164].mxu0 %v13019_v27 }
0x104e   :  { %11302 = vmatprep.mubr.msk.f32.mxu0 %vm820_vm7, %v13064_v8  ;;  %v4835_v8 = vld [vmem:[#allocation8 + $0x2b0] sm:$0xff] }
0x1055   :  { %11303 = vmatmul.mubr.msk.f32.vlgmr.msra.gmra.mrb[158].mxu0 %vm820_vm7, %v13066_v11  ;;  %v4836_v11 = vld [vmem:[#allocation8 + $0x2b8] sm:$0xff] }
0x1056   :  { %11305 = vmatprep.mubr.msk.f32.mxu0 %vm820_vm7, %v13076_v50  ;;  %v12091_v32 = vpack.c.bf16 %v4836_v11, %v4835_v8  ;;  %v4837_v50 = vld [vmem:[#allocation8 + $0x2c0] sm:$0xff] }
0x1058   :  { %12092 = vmatprep.subr.bf16.mxu1 %v12091_v32 }
0x1059   :  { %11306 = vmatmul.mubr.msk.f32.gmra.mrb[168].mxu0 %vm820_vm7, %v13080_v15  ;;  %12094 = vmatpush3.bf16.msra.mxu1 %v12091_v32  ;;  %v12095_v15 = vpack.c.bf16 %v4838_v61, %v4837_v50 }
0x105a   :  { %11308 = vmatprep.mubr.msk.f32.mxu0 %vm820_vm7, %v13090_v49  ;;  %v4981_v49 = vld [vmem:[#allocation8 + $0x2d8] sm:$0xff] }
0x105b   :  { %12096 = vmatprep.subr.bf16.mxu1 %v12095_v15  ;;  %v12099_v41 = vpack.c.bf16 %v4982_v38, %v4981_v49  ;;  %v4983_v38 = vld [vmem:[#allocation8 + $0x2e8] sm:$0xff] }
0x105d   :  { %11309 = vmatmul.mubr.msk.f32.gmra.mrb[170].mxu0 %vm820_vm7, %v13092_v20  ;;  %12098 = vmatpush3.bf16.msra.mxu1 %v12095_v15 }
0x105e   :  { %11311 = vmatprep.mubr.msk.f32.mxu0 %vm820_vm7, %v13102_v5  ;;  %12100 = vmatprep.subr.bf16.mxu0 %v12099_v41 }
0x105f   :  { %12102 = vmatpush3.bf16.msra.mxu0 %v12099_v41  ;;  %v4984_v41 = vld [vmem:[#allocation8 + $0x2f0] sm:$0xff] }
0x1061   :  { %11312 = vmatmul.mubr.msk.f32.gmra.mrb[172].mxu0 %vm820_vm7, %v13104_v6 }
0x1118   :  { %v11294_v20 = vpop.f32.mrb[160].mxu0 }
0x1119   :  { %v4678_v5 = vpop.f32.mrb[161].mxu0 }
0x111a   :  { %v11295_v53 = vpop.f32.mrb[162].mxu0 }
0x111b   :  { %v4681_v60 = vpop.f32.mrb[163].mxu0 }
0x1120   :  { %v11298_v6 = vpop.f32.mrb[164].mxu0 }
0x1121   :  { %v4694_v63 = vpop.f32.mrb[165].mxu0 }
0x1122   :  { %v11299_v43 = vpop.f32.mrb[166].mxu0 }
0x1123   :  { %v4697_v13 = vpop.f32.mrb[167].mxu0 }
0x1128   :  { %v11304_v14 = vpop.f32.mrb[158].mxu0 }
0x1129   :  { %v4781_v17 = vadd.f32 %v11304_v14, %v4681_v60  ;;  %v4775_v19 = vpop.f32.mrb[159].mxu0 }
0x112a   :  { %v4776_v54 = vadd.f32 %v4775_v19, %v4678_v5  ;;  %v5127_v5 = vld [vmem:[#allocation8 + $0x300] sm:$0xff] }
0x112b   :  { %v4819_v45 = vadd.f32 %v9502_v1, %v4781_v17 }
0x112c   :  { %v4818_v51 = vadd.f32 %v9502_v1, %v4776_v54  ;;  %v11307_v7 = vpop.f32.mrb[168].mxu0 }
0x112d   :  { %v4791_v46 = vadd.f32 %v11307_v7, %v11295_v53  ;;  %v4785_v52 = vpop.f32.mrb[169].mxu0  ;;  %v4827_v40 = vmax.f32 %v4819_v45, 0.0  ;;  %v5128_v53 = vld [vmem:[#allocation8 + $0x308] sm:$0xff] }
0x112e   :  { %v4826_v37 = vmax.f32 %v4818_v51, 0.0  ;;  %v4786_v4 = vadd.f32 %v11294_v20, %v4785_v52  ;;  %v12103_v20 = vpack.c.bf16 %v4984_v41, %v4983_v38  ;;  %v12107_v60 = vpack.c.bf16 %v5128_v53, %v5127_v5 }
0x112f   :  { %v4821_v2 = vadd.f32 %v9502_v1, %v4791_v46 }
0x1130   :  { %v4820_v44 = vadd.f32 %v9502_v1, %v4786_v4  ;;  %v11310_v3 = vpop.f32.mrb[170].mxu0  ;;  %11322 = vmatprep.mubr.msk.f32.mxu1 %vm1675_vm9, %v4826_v37  ;;  %12104 = vmatprep.subr.bf16.mxu0 %v12103_v20 }
0x1131   :  { %v4801_v12 = vadd.f32 %v11310_v3, %v4697_v13  ;;  %v4795_v39 = vpop.f32.mrb[171].mxu0  ;;  %11323 = vmatmul.mubr.msk.f32.vlgmr.msra.gmra.mrb[154].mxu1 %vm1675_vm9, %v4827_v40  ;;  %v4829_v59 = vmax.f32 %v4821_v2, 0.0  ;;  %12106 = vmatpush3.bf16.msra.mxu0 %v12103_v20 }
0x1132   :  { %v4828_v16 = vmax.f32 %v4820_v44, 0.0  ;;  %v4796_v23 = vadd.f32 %v4795_v39, %v4694_v63  ;;  %12108 = vmatprep.subr.bf16.mxu1 %v12107_v60 }
0x1133   :  { %v4823_v30 = vadd.f32 %v9502_v1, %v4801_v12  ;;  %12110 = vmatpush3.bf16.msra.mxu1 %v12107_v60 }
0x1134   :  { %v4822_v55 = vadd.f32 %v9502_v1, %v4796_v23  ;;  %v11313_v0 = vpop.f32.mrb[172].mxu0  ;;  %11325 = vmatprep.mubr.msk.f32.mxu1 %vm1675_vm9, %v4828_v16 }
0x1135   :  { %v4811_v25 = vadd.f32 %v11313_v0, %v11299_v43  ;;  %v4805_v57 = vpop.f32.mrb[173].mxu0  ;;  %11326 = vmatmul.mubr.msk.f32.gmra.mrb[156].mxu1 %vm1675_vm9, %v4829_v59  ;;  %v4831_v32 = vmax.f32 %v4823_v30, 0.0  ;;  %v5129_v30 = vld [vmem:[#allocation8 + $0x310] sm:$0xff] }
0x1136   :  { %v4830_v8 = vmax.f32 %v4822_v55, 0.0  ;;  %v4806_v11 = vadd.f32 %v11298_v6, %v4805_v57  ;;  %v9503_v6 = vld [vmem:[#allocation8 + $0x2a8] ss:$0 sm:$0xff]  ;;  %v5130_v55 = vld [vmem:[#allocation8 + $0x318] sm:$0xff] }
0x1137   :  { %v4825_v50 = vadd.f32 %v9502_v1, %v4811_v25  ;;  %v12111_v0 = vpack.c.bf16 %v5130_v55, %v5129_v30  ;;  %v9512_v25 = vld [vmem:[#allocation8 + $0x2d0] ss:$0 sm:$0xff] }
0x1138   :  { %v4824_v61 = vadd.f32 %v9502_v1, %v4806_v11  ;;  %11328 = vmatprep.mubr.msk.f32.mxu1 %vm1675_vm9, %v4830_v8 }
0x1139   :  { %11329 = vmatmul.mubr.msk.f32.gmra.mrb[158].mxu1 %vm1675_vm9, %v4831_v32  ;;  %v4833_v49 = vmax.f32 %v4825_v50, 0.0  ;;  %12112 = vmatprep.subr.bf16.mxu1 %v12111_v0 }
0x113a   :  { %v4832_v15 = vmax.f32 %v4824_v61, 0.0  ;;  %12114 = vmatpush3.bf16.msra.mxu1 %v12111_v0 }
0x113c   :  { %11331 = vmatprep.mubr.msk.f32.mxu1 %vm1675_vm9, %v4832_v15 }
0x113d   :  { %11332 = vmatmul.mubr.msk.f32.gmra.mrb[160].mxu1 %vm1675_vm9, %v4833_v49 }
0x1204   :  { %v11324_v63 = vpop.f32.mrb[154].mxu1 }
0x1205   :  { %v4939_v43 = vadd.f32 %v11324_v63, %v9503_v6  ;;  %v4933_v13 = vpop.f32.mrb[155].mxu1 }
0x1206   :  { %v4934_v1 = vadd.f32 %v9503_v6, %v4933_v13 }
0x1207   :  { %v4973_v19 = vmax.f32 %v4939_v43, 0.0 }
0x1208   :  { %v4972_v14 = vmax.f32 %v4934_v1, 0.0  ;;  %v11327_v17 = vpop.f32.mrb[156].mxu1 }
0x1209   :  { %v4949_v54 = vadd.f32 %v11327_v17, %v9503_v6  ;;  %v4943_v45 = vpop.f32.mrb[157].mxu1 }
0x120a   :  { %v4944_v51 = vadd.f32 %v9503_v6, %v4943_v45  ;;  %11342 = vmatprep.mubr.msk.f32.mxu0 %vm1675_vm9, %v4972_v14 }
0x120b   :  { %11343 = vmatmul.mubr.msk.f32.vlgmr.msra.gmra.mrb[174].mxu0 %vm1675_vm9, %v4973_v19  ;;  %v4975_v52 = vmax.f32 %v4949_v54, 0.0 }
0x120c   :  { %v4974_v7 = vmax.f32 %v4944_v51, 0.0  ;;  %v11330_v46 = vpop.f32.mrb[158].mxu1  ;;  %v5265_v51 = vld [vmem:[#allocation8 + $0x328] sm:$0xff] }
0x120d   :  { %v4959_v37 = vadd.f32 %v11330_v46, %v9503_v6  ;;  %v4953_v4 = vpop.f32.mrb[159].mxu1  ;;  %11374 = vmatprep.subr.mxu0 %v5265_v51  ;;  %v5267_v46 = vld [vmem:[#allocation8 + $0x338] sm:$0xff] }
0x120e   :  { %v4954_v40 = vadd.f32 %v9503_v6, %v4953_v4  ;;  %11345 = vmatprep.mubr.msk.f32.mxu0 %vm1675_vm9, %v4974_v7  ;;  %v5266_v7 = vld [vmem:[#allocation8 + $0x330] sm:$0xff]  ;;  %11375 = vmatpush3.msra.mxu0 %v5265_v51  ;;  %v9521_v4 = vld [vmem:[#allocation8 + $0x2f8] ss:$0 sm:$0xff] }
0x120f   :  { %11346 = vmatmul.mubr.msk.f32.gmra.mrb[176].mxu0 %vm1675_vm9, %v4975_v52  ;;  %v4977_v3 = vmax.f32 %v4959_v37, 0.0  ;;  %11388 = vmatprep.subr.mxu1 %v5266_v7  ;;  %v5268_v52 = vld [vmem:[#allocation8 + $0x340] sm:$0xf] }
0x1210   :  { %v4976_v2 = vmax.f32 %v4954_v40, 0.0  ;;  %v11333_v44 = vpop.f32.mrb[160].mxu1  ;;  %v12115_v37 = vpack.c.bf16 %v5268_v52, %v5267_v46  ;;  %v12401_v46 = vld [vmem:[#allocation7 + $0x68] sm:$0xff]  }
0x1211   :  { %v4969_v12 = vadd.f32 %v11333_v44, %v9503_v6  ;;  %v4963_v39 = vpop.f32.mrb[161].mxu1 }
0x1212   :  { %v4964_v16 = vadd.f32 %v9503_v6, %v4963_v39  ;;  %11348 = vmatprep.mubr.msk.f32.mxu0 %vm1675_vm9, %v4976_v2 }
0x1213   :  { %11349 = vmatmul.mubr.msk.f32.gmra.mrb[178].mxu0 %vm1675_vm9, %v4977_v3  ;;  %v4979_v59 = vmax.f32 %v4969_v12, 0.0 }
0x1214   :  { %v4978_v23 = vmax.f32 %v4964_v16, 0.0 }
0x1216   :  { %11351 = vmatprep.mubr.msk.f32.mxu0 %vm1675_vm9, %v4978_v23 }
0x1217   :  { %11352 = vmatmul.mubr.msk.f32.gmra.mrb[180].mxu0 %vm1675_vm9, %v4979_v59 }
0x12de   :  { %v11344_v57 = vpop.f32.mrb[174].mxu0 }
0x12df   :  { %v5085_v8 = vadd.f32 %v11344_v57, %v9512_v25  ;;  %v5079_v11 = vpop.f32.mrb[175].mxu0 }
0x12e0   :  { %v5080_v32 = vadd.f32 %v9512_v25, %v5079_v11 }
0x12e1   :  { %v5119_v15 = vmax.f32 %v5085_v8, 0.0 }
0x12e2   :  { %v5118_v50 = vmax.f32 %v5080_v32, 0.0  ;;  %v11347_v61 = vpop.f32.mrb[176].mxu0  ;;  %v12396_v32 = vld [vmem:[#allocation7 + $0x40] sm:$0xff]  }
0x12e3   :  { %v5095_v49 = vadd.f32 %v11347_v61, %v9512_v25  ;;  %v5089_v38 = vpop.f32.mrb[177].mxu0 }
0x12e4   :  { %v5090_v41 = vadd.f32 %v9512_v25, %v5089_v38  ;;  %11362 = vmatprep.mubr.msk.f32.mxu1 %vm1675_vm9, %v5118_v50 }
0x12e5   :  { %11363 = vmatmul.mubr.msk.f32.vlgmr.msra.gmra.mrb[162].mxu1 %vm1675_vm9, %v5119_v15  ;;  %v5121_v53 = vmax.f32 %v5095_v49, 0.0 }
0x12e6   :  { %v5120_v20 = vmax.f32 %v5090_v41, 0.0  ;;  %v11350_v5 = vpop.f32.mrb[178].mxu0  ;;  %11389 = vmatpush3.msra.mxu1 %v5266_v7 }
0x12e7   :  { %v5105_v60 = vadd.f32 %v11350_v5, %v9512_v25  ;;  %v5099_v6 = vpop.f32.mrb[179].mxu0  ;;  %12117 = vmatprep.subr.msk.bf16.mxu1 %vm12720_vm6, %v12115_v37 }
0x12e8   :  { %v5100_v63 = vadd.f32 %v9512_v25, %v5099_v6  ;;  %11365 = vmatprep.mubr.msk.f32.mxu1 %vm1675_vm9, %v5120_v20  ;;  %v12397_v6 = vld [vmem:[#allocation7 + $0x48] sm:$0xff]  }
0x12e9   :  { %11366 = vmatmul.mubr.msk.f32.gmra.mrb[164].mxu1 %vm1675_vm9, %v5121_v53  ;;  %v5123_v1 = vmax.f32 %v5105_v60, 0.0 }
0x12ea   :  { %v5122_v43 = vmax.f32 %v5100_v63, 0.0  ;;  %v11353_v13 = vpop.f32.mrb[180].mxu0 }
0x12eb   :  { %v5115_v14 = vadd.f32 %v11353_v13, %v9512_v25  ;;  %v5109_v17 = vpop.f32.mrb[181].mxu0  ;;  %v12398_v13 = vld [vmem:[#allocation7 + $0x50] sm:$0xff]  }
0x12ec   :  { %v5110_v19 = vadd.f32 %v9512_v25, %v5109_v17  ;;  %11368 = vmatprep.mubr.msk.f32.mxu1 %vm1675_vm9, %v5122_v43  ;;  %v12399_v17 = vld [vmem:[#allocation7 + $0x58] sm:$0xff]  }
0x12ed   :  { %11369 = vmatmul.mubr.msk.f32.gmra.mrb[166].mxu1 %vm1675_vm9, %v5123_v1  ;;  %v5125_v45 = vmax.f32 %v5115_v14, 0.0 }
0x12ee   :  { %v5124_v54 = vmax.f32 %v5110_v19, 0.0 }
0x12f0   :  { %11371 = vmatprep.mubr.msk.f32.mxu1 %vm1675_vm9, %v5124_v54 }
0x12f1   :  { %11372 = vmatmul.mubr.msk.f32.gmra.mrb[168].mxu1 %vm1675_vm9, %v5125_v45  ;;  %v12400_v45 = vld [vmem:[#allocation7 + $0x60] sm:$0xff]  }
0x13b8   :  { %v11364_v40 = vpop.f32.mrb[162].mxu1 }
0x13b9   :  { %v5225_v2 = vpop.f32.mrb[163].mxu1  ;;  %v13392_v3 = vadd.f32 %v11364_v40, %v9521_v4 }
0x13ba   :  { %v13390_v44 = vadd.f32 %v9521_v4, %v5225_v2 }
0x13bc   :  { %v11367_v12 = vpop.f32.mrb[164].mxu1  ;;  %11376 = vmatprep.mubr.msk.f32.mxu0 %vm820_vm7, %v13390_v44  ;;  %11390 = vmatprep.mubr.msk.f32.mxu1 %vm820_vm7, %v13390_v44 }
0x13bd   :  { %v5235_v39 = vpop.f32.mrb[165].mxu1  ;;  %11377 = vmatmul.mubr.msk.f32.vlgmr.msra.gmra.mrb[182].mxu0 %vm820_vm7, %v13392_v3  ;;  %11391 = vmatmul.mubr.msk.f32.vlgmr.msra.gmra.mrb[170].mxu1 %vm820_vm7, %v13392_v3  ;;  %v13406_v23 = vadd.f32 %v11367_v12, %v9521_v4  ;;  %v12403_v12 = vld [vmem:[#allocation7 + $0x78] sm:$0xff]  }
0x13be   :  { %v13402_v16 = vadd.f32 %v9521_v4, %v5235_v39  ;;  %12120 = vmatpush3.bf16.msk.msra.mxu1 %vm12720_vm6, %v12115_v37 }
0x13c0   :  { %v11370_v59 = vpop.f32.mrb[166].mxu1  ;;  %11379 = vmatprep.mubr.msk.f32.mxu0 %vm820_vm7, %v13402_v16  ;;  %11393 = vmatprep.mubr.msk.f32.mxu1 %vm820_vm7, %v13402_v16 }
0x13c1   :  { %v5245_v30 = vpop.f32.mrb[167].mxu1  ;;  %11380 = vmatmul.mubr.msk.f32.gmra.mrb[184].mxu0 %vm820_vm7, %v13406_v23  ;;  %11394 = vmatmul.mubr.msk.f32.gmra.mrb[172].mxu1 %vm820_vm7, %v13406_v23  ;;  %v13418_v0 = vadd.f32 %v11370_v59, %v9521_v4 }
0x13c2   :  { %v13416_v55 = vadd.f32 %v9521_v4, %v5245_v30  ;;  %v12404_v30 = vld [vmem:[#allocation7] sm:$0xff]  }
0x13c4   :  { %v11373_v25 = vpop.f32.mrb[168].mxu1  ;;  %11382 = vmatprep.mubr.msk.f32.mxu0 %vm820_vm7, %v13416_v55  ;;  %11396 = vmatprep.mubr.msk.f32.mxu1 %vm820_vm7, %v13416_v55 }
0x13c5   :  { %v5255_v57 = vpop.f32.mrb[169].mxu1  ;;  %11383 = vmatmul.mubr.msk.f32.gmra.mrb[186].mxu0 %vm820_vm7, %v13418_v0  ;;  %11397 = vmatmul.mubr.msk.f32.gmra.mrb[174].mxu1 %vm820_vm7, %v13418_v0  ;;  %v13430_v11 = vadd.f32 %v11373_v25, %v9521_v4  ;;  %v12405_v25 = vld [vmem:[#allocation7 + $0x8] sm:$0xff]  }
0x13c6   :  { %v13428_v8 = vadd.f32 %v9521_v4, %v5255_v57  ;;  %v12402_v4 = vld [vmem:[#allocation7 + $0x70] sm:$0xff]  }
0x13c7   :  { %v12406_v57 = vld [vmem:[#allocation7 + $0x10] sm:$0xff]  }
0x13c8   :  { %11385 = vmatprep.mubr.msk.f32.mxu0 %vm820_vm7, %v13428_v8  ;;  %11399 = vmatprep.mubr.msk.f32.mxu1 %vm820_vm7, %v13428_v8 }
0x13c9   :  { %11386 = vmatmul.mubr.msk.f32.gmra.mrb[188].mxu0 %vm820_vm7, %v13430_v11  ;;  %11400 = vmatmul.mubr.msk.f32.gmra.mrb[176].mxu1 %vm820_vm7, %v13430_v11 }
0x13ca   :  { %11454 = vmatprep.mubr.msk.f32.mxu1 %vm1417_vm8, %v13281_v21  ;;  %11410 = vmatprep.mubr.msk.bf16.mxu0 %vm243_vm4, %v12396_v32  ;;  %v12407_v32 = vld [vmem:[#allocation7 + $0x18] sm:$0xff]  }
0x13cd   :  { %11455 = vmatmul.mubr.msk.f32.vlgmr.msra.gmra.mrb[178].mxu1 %vm1417_vm8, %v13283_v22 }
0x13ce   :  { %11457 = vmatprep.mubr.msk.f32.mxu1 %vm1417_vm8, %v13289_v47 }
0x13d1   :  { %11458 = vmatmul.mubr.msk.f32.gmra.mrb[180].mxu1 %vm1417_vm8, %v13291_v24 }
0x13d2   :  { %11460 = vmatprep.mubr.msk.f32.mxu1 %vm1417_vm8, %v13297_v28 }
0x13d5   :  { %11461 = vmatmul.mubr.msk.f32.gmra.mrb[182].mxu1 %vm1417_vm8, %v13299_v29 }
0x13d6   :  { %11463 = vmatprep.mubr.msk.f32.mxu1 %vm1417_vm8, %v13305_v33 }
0x13d9   :  { %11464 = vmatmul.mubr.msk.f32.gmra.mrb[184].mxu1 %vm1417_vm8, %v13307_v36 }
0x13da   :  { %11466 = vmatprep.mubr.msk.f32.mxu1 %vm1417_vm8, %v13313_v42 }
0x13dd   :  { %11467 = vmatmul.mubr.msk.f32.gmra.mrb[186].mxu1 %vm1417_vm8, %v13315_v48 }
0x13de   :  { %11469 = vmatprep.mubr.msk.f32.mxu1 %vm1417_vm8, %v13321_v58 }
0x13e1   :  { %11470 = vmatmul.mubr.msk.f32.gmra.mrb[188].mxu1 %vm1417_vm8, %v13323_v9 }
0x13e2   :  { %11472 = vmatprep.mubr.msk.f32.mxu1 %vm1417_vm8, %v13329_v31 }
0x13e5   :  { %11473 = vmatmul.mubr.msk.f32.gmra.mrb[190].mxu1 %vm1417_vm8, %v13331_v10 }
0x13e6   :  { %11475 = vmatprep.mubr.msk.f32.mxu1 %vm1417_vm8, %v13337_v34 }
0x13e9   :  { %11476 = vmatmul.mubr.msk.f32.gmra.mrb[192].mxu1 %vm1417_vm8, %v13339_v35 }
0x1490   :  { %v11378_v21 = vpop.f32.mrb[182].mxu0  ;;  %v11392_v22 = vpop.f32.mrb[170].mxu1 }
0x1491   :  { %v5359_v47 = vpop.f32.mrb[183].mxu0  ;;  %v5468_v24 = vpop.f32.mrb[171].mxu1 }
0x1492   :  { %v5398_v28 = vpack.c.bf16 %v11378_v21, %v5359_v47  ;;  %v5507_v29 = vpack.c.bf16 %v11392_v22, %v5468_v24  ;;  %v12408_v21 = vld [vmem:[#allocation7 + $0x20] sm:$0xff]   ;;  %v12409_v22 = vld [vmem:[#allocation7 + $0x28] sm:$0xff]   ;;  %v12410_v47 = vld [vmem:[#allocation7 + $0x30] sm:$0xff]  }
0x1493   :  { %v12411_v24 = vld [vmem:[#allocation7 + $0x38] sm:$0xff]  }
0x1494   :  { %v11381_v33 = vpop.f32.mrb[184].mxu0  ;;  %v11395_v36 = vpop.f32.mrb[172].mxu1  ;;  %11402 = vmatprep.subr.bf16.mxu0 %v5507_v29 }
0x1495   :  { %v5369_v42 = vpop.f32.mrb[185].mxu0  ;;  %v5478_v48 = vpop.f32.mrb[173].mxu1  ;;  %11403 = vmatpush3.bf16.msra.mxu0 %v5507_v29  ;;  %v5907_v29 = vld [vmem:[#allocation8 + $0x358] sm:$0xff] }
0x1496   :  { %v5399_v58 = vpack.c.bf16 %v11381_v33, %v5369_v42  ;;  %v5508_v9 = vpack.c.bf16 %v11395_v36, %v5478_v48  ;;  %v5908_v36 = vld [vmem:[#allocation8 + $0x360] sm:$0xff]  ;;  %v5909_v42 = vld [vmem:[#allocation8 + $0x368] sm:$0xff] }
0x1497   :  { %v12125_v48 = vpack.c.bf16 %v5909_v42, %v5908_v36 }
0x1498   :  { %v11384_v31 = vpop.f32.mrb[186].mxu0  ;;  %v11398_v10 = vpop.f32.mrb[174].mxu1  ;;  %11404 = vmatprep.subr.bf16.mxu0 %v5508_v9 }
0x1499   :  { %v5379_v34 = vpop.f32.mrb[187].mxu0  ;;  %v5488_v50 = vpop.f32.mrb[175].mxu1  ;;  %11405 = vmatpush3.bf16.msra.mxu0 %v5508_v9  ;;  %v6125_v9 = vld [vmem:[#allocation8 + $0x380] sm:$0xff] }
0x149a   :  { %v5400_v35 = vpack.c.bf16 %v11384_v31, %v5379_v34  ;;  %v5509_v61 = vpack.c.bf16 %v11398_v10, %v5488_v50  ;;  %v13520_v34 = vld [vmem:[#allocation8 + $0x320] ss:$0 sm:$0xff] }
0x149c   :  { %v11387_v15 = vpop.f32.mrb[188].mxu0  ;;  %v11401_v49 = vpop.f32.mrb[176].mxu1  ;;  %11406 = vmatprep.subr.bf16.mxu0 %v5509_v61 }
0x149d   :  { %v5389_v38 = vpop.f32.mrb[189].mxu0  ;;  %v5498_v41 = vpop.f32.mrb[177].mxu1  ;;  %11407 = vmatpush3.bf16.msra.mxu0 %v5509_v61 }
0x149e   :  { %v5401_v20 = vpack.c.bf16 %v11387_v15, %v5389_v38  ;;  %v5510_v5 = vpack.c.bf16 %v11401_v49, %v5498_v41 }
0x14a0   :  { %11408 = vmatprep.subr.bf16.mxu0 %v5510_v5  ;;  %v13473_v53 = vpop.f32.mrb[178].mxu1 }
0x14a1   :  { %11409 = vmatpush3.bf16.msra.mxu0 %v5510_v5  ;;  %v13475_v60 = vpop.f32.mrb[179].mxu1 }
0x14a2   :  { %11426 = vmatprep.subr.bf16.mxu0 %v5398_v28 }
0x14a4   :  { %11411 = vmatmul.mubr.msk.bf16.vlgmr.msra.gmra.mrb[192].mxu0 %vm243_vm4, %v12397_v6  ;;  %v13478_v63 = vpop.f32.mrb[180].mxu1 }
0x14a5   :  { %11427 = vmatpush3.bf16.msra.mxu0 %v5398_v28  ;;  %v13480_v43 = vpop.f32.mrb[181].mxu1  ;;  %11414 = vmatprep.mubr.msk.bf16.mxu0 %vm243_vm4, %v12398_v13  ;;  %v5906_v28 = vld [vmem:[#allocation8 + $0x350] sm:$0xff] }
0x14a6   :  { %11428 = vmatprep.subr.bf16.mxu0 %v5399_v58  ;;  %v12121_v33 = vpack.c.bf16 %v5907_v29, %v5906_v28 }
0x14a8   :  { %v13483_v1 = vpop.f32.mrb[182].mxu1  ;;  %12122 = vmatprep.subr.bf16.mxu1 %v12121_v33 }
0x14a9   :  { %11429 = vmatpush3.bf16.msra.mxu0 %v5399_v58  ;;  %v13485_v14 = vpop.f32.mrb[183].mxu1  ;;  %12124 = vmatpush3.bf16.msra.mxu1 %v12121_v33  ;;  %v6124_v58 = vld [vmem:[#allocation8 + $0x378] sm:$0xff] }
0x14aa   :  { %11430 = vmatprep.subr.bf16.mxu0 %v5400_v35  ;;  %12126 = vmatprep.subr.bf16.mxu1 %v12125_v48  ;;  %v12129_v31 = vpack.c.bf16 %v6125_v9, %v6124_v58 }
0x14ac   :  { %11415 = vmatmul.mubr.msk.bf16.gmra.mrb[196].mxu0 %vm243_vm4, %v12399_v17  ;;  %v13488_v19 = vpop.f32.mrb[184].mxu1 }
0x14ad   :  { %11431 = vmatpush3.bf16.msra.mxu0 %v5400_v35  ;;  %v13490_v54 = vpop.f32.mrb[185].mxu1  ;;  %11418 = vmatprep.mubr.msk.bf16.mxu0 %vm243_vm4, %v12400_v45 }
0x14ae   :  { %11432 = vmatprep.subr.bf16.mxu0 %v5401_v20  ;;  %12128 = vmatpush3.bf16.msra.mxu1 %v12125_v48 }
0x14b0   :  { %v13493_v51 = vpop.f32.mrb[186].mxu1 }
0x14b1   :  { %11433 = vmatpush3.bf16.msra.mxu0 %v5401_v20  ;;  %v13495_v7 = vpop.f32.mrb[187].mxu1 }
0x14b2   :  { %12130 = vmatprep.subr.bf16.mxu0 %v12129_v31 }
0x14b4   :  { %11419 = vmatmul.mubr.msk.bf16.gmra.mrb[200].mxu0 %vm243_vm4, %v12401_v46  ;;  %v13498_v52 = vpop.f32.mrb[188].mxu1 }
0x14b5   :  { %v13500_v37 = vpop.f32.mrb[189].mxu1  ;;  %11422 = vmatprep.mubr.msk.bf16.mxu0 %vm243_vm4, %v12402_v4 }
0x14b8   :  { %v13503_v40 = vpop.f32.mrb[190].mxu1 }
0x14b9   :  { %v13505_v2 = vpop.f32.mrb[191].mxu1 }
0x14bc   :  { %11423 = vmatmul.mubr.msk.bf16.gmra.mrb[204].mxu0 %vm243_vm4, %v12403_v12  ;;  %v13508_v39 = vpop.f32.mrb[192].mxu1 }
0x14bd   :  { %v13510_v59 = vpop.f32.mrb[193].mxu1  ;;  %11434 = vmatprep.mubr.msk.bf16.mxu0 %vm243_vm4, %v12404_v30 }
0x14c4   :  { %11435 = vmatmul.mubr.msk.bf16.vlgmr.msra.gmra.mrb[192].mxu0 %vm243_vm4, %v12405_v25 }
0x14c5   :  { %11438 = vmatprep.mubr.msk.bf16.mxu0 %vm243_vm4, %v12406_v57  ;;  %12132 = vmatpush3.bf16.msra.mxu0 %v12129_v31 }
0x14cc   :  { %11439 = vmatmul.mubr.msk.bf16.gmra.mrb[196].mxu0 %vm243_vm4, %v12407_v32 }
0x14cd   :  { %11442 = vmatprep.mubr.msk.bf16.mxu0 %vm243_vm4, %v12408_v21 }
0x14d4   :  { %11443 = vmatmul.mubr.msk.bf16.gmra.mrb[200].mxu0 %vm243_vm4, %v12409_v22 }
0x14d5   :  { %11446 = vmatprep.mubr.msk.bf16.mxu0 %vm243_vm4, %v12410_v47 }
0x14dc   :  { %11447 = vmatmul.mubr.msk.bf16.gmra.mrb[204].mxu0 %vm243_vm4, %v12411_v24 }
0x1597   :  { %v11436_v10 = vpop.f32.mrb[192].mxu0 }
0x1598   :  { %v5855_v50 = vadd.f32 %v11436_v10, %v13480_v43  ;;  %v5642_v35 = vpop.f32.mrb[193].mxu0 }
0x1599   :  { %v5853_v61 = vadd.f32 %v13475_v60, %v5642_v35  ;;  %v11437_v15 = vpop.f32.mrb[194].mxu0 }
0x159a   :  { %v5856_v49 = vadd.f32 %v13478_v63, %v11437_v15  ;;  %v5645_v38 = vpop.f32.mrb[195].mxu0  ;;  %v5875_v5 = vadd.f32 %v13520_v34, %v5855_v50 }
0x159b   :  { %v5873_v41 = vadd.f32 %v13520_v34, %v5853_v61  ;;  %v5854_v20 = vadd.f32 %v13473_v53, %v5645_v38 }
0x159c   :  { %v5876_v17 = vadd.f32 %v13520_v34, %v5856_v49  ;;  %v5891_v60 = vmax.f32 %v5875_v5, 0.0 }
0x159d   :  { %v5889_v6 = vmax.f32 %v5873_v41, 0.0  ;;  %v5874_v13 = vadd.f32 %v13520_v34, %v5854_v20 }
0x159e   :  { %v5892_v25 = vmax.f32 %v5876_v17, 0.0 }
0x159f   :  { %v5890_v45 = vmax.f32 %v5874_v13, 0.0  ;;  %v11440_v43 = vpop.f32.mrb[196].mxu0  ;;  %11486 = vmatprep.mubr.msk.f32.mxu1 %vm1675_vm9, %v5889_v6 }
0x15a0   :  { %v5859_v46 = vadd.f32 %v11440_v43, %v13490_v54  ;;  %v5658_v63 = vpop.f32.mrb[197].mxu0 }
0x15a1   :  { %v5857_v4 = vadd.f32 %v13485_v14, %v5658_v63  ;;  %v11441_v12 = vpop.f32.mrb[198].mxu0  ;;  %11487 = vmatmul.mubr.msk.f32.vlgmr.msra.gmra.mrb[194].mxu1 %vm1675_vm9, %v5890_v45  ;;  %v6342_v63 = vld [vmem:[#allocation8 + $0x3a0] sm:$0xff] }
0x15a2   :  { %v5860_v53 = vadd.f32 %v13488_v19, %v11441_v12  ;;  %v5661_v30 = vpop.f32.mrb[199].mxu0  ;;  %11489 = vmatprep.mubr.msk.f32.mxu1 %vm1675_vm9, %v5891_v60  ;;  %v5879_v21 = vadd.f32 %v13520_v34, %v5859_v46  ;;  %v6127_v60 = vld [vmem:[#allocation8 + $0x390] sm:$0xff] }
0x15a3   :  { %v5877_v57 = vadd.f32 %v13520_v34, %v5857_v4  ;;  %v5858_v32 = vadd.f32 %v13483_v1, %v5661_v30  ;;  %v6343_v4 = vld [vmem:[#allocation8 + $0x3a8] sm:$0xff] }
0x15a4   :  { %v5880_v14 = vadd.f32 %v13520_v34, %v5860_v53  ;;  %v5895_v19 = vmax.f32 %v5879_v21, 0.0  ;;  %v12137_v12 = vpack.c.bf16 %v6343_v4, %v6342_v63  ;;  %v6344_v4 = vld [vmem:[#allocation8 + $0x3b0] sm:$0xff] }
0x15a5   :  { %v5893_v22 = vmax.f32 %v5877_v57, 0.0  ;;  %v5878_v54 = vadd.f32 %v13520_v34, %v5858_v32  ;;  %11490 = vmatmul.mubr.msk.f32.gmra.mrb[196].mxu1 %vm1675_vm9, %v5892_v25 }
0x15a6   :  { %v5896_v48 = vmax.f32 %v5880_v14, 0.0  ;;  %12138 = vmatprep.subr.bf16.mxu1 %v12137_v12 }
0x15a7   :  { %v5894_v47 = vmax.f32 %v5878_v54, 0.0  ;;  %v11444_v24 = vpop.f32.mrb[200].mxu0  ;;  %11492 = vmatprep.mubr.msk.f32.mxu1 %vm1675_vm9, %v5893_v22  ;;  %12140 = vmatpush3.bf16.msra.mxu1 %v12137_v12  ;;  %v6345_v12 = vld [vmem:[#allocation8 + $0x3b8] sm:$0xff] }
0x15a8   :  { %v5863_v28 = vadd.f32 %v11444_v24, %v13500_v37  ;;  %v5674_v29 = vpop.f32.mrb[201].mxu0 }
0x15a9   :  { %v5861_v33 = vadd.f32 %v13495_v7, %v5674_v29  ;;  %v11445_v1 = vpop.f32.mrb[202].mxu0  ;;  %11493 = vmatmul.mubr.msk.f32.gmra.mrb[198].mxu1 %vm1675_vm9, %v5894_v47 }
0x15aa   :  { %v5864_v36 = vadd.f32 %v13498_v52, %v11445_v1  ;;  %v5677_v42 = vpop.f32.mrb[203].mxu0  ;;  %11495 = vmatprep.mubr.msk.f32.mxu1 %vm1675_vm9, %v5895_v19  ;;  %v5883_v31 = vadd.f32 %v13520_v34, %v5863_v28 }
0x15ab   :  { %v5881_v58 = vadd.f32 %v13520_v34, %v5861_v33  ;;  %v5862_v9 = vadd.f32 %v13493_v51, %v5677_v42 }
0x15ac   :  { %v5884_v7 = vadd.f32 %v13520_v34, %v5864_v36  ;;  %v5899_v52 = vmax.f32 %v5883_v31, 0.0 }
0x15ad   :  { %v5897_v10 = vmax.f32 %v5881_v58, 0.0  ;;  %v5882_v37 = vadd.f32 %v13520_v34, %v5862_v9  ;;  %11496 = vmatmul.mubr.msk.f32.gmra.mrb[200].mxu1 %vm1675_vm9, %v5896_v48 }
0x15ae   :  { %v5900_v20 = vmax.f32 %v5884_v7, 0.0 }
0x15af   :  { %v5898_v50 = vmax.f32 %v5882_v37, 0.0  ;;  %v11448_v35 = vpop.f32.mrb[204].mxu0  ;;  %11498 = vmatprep.mubr.msk.f32.mxu1 %vm1675_vm9, %v5897_v10 }
0x15b0   :  { %v5867_v61 = vadd.f32 %v11448_v35, %v13510_v59  ;;  %v5690_v15 = vpop.f32.mrb[205].mxu0 }
0x15b1   :  { %v5865_v49 = vadd.f32 %v13505_v2, %v5690_v15  ;;  %v11449_v51 = vpop.f32.mrb[206].mxu0  ;;  %11499 = vmatmul.mubr.msk.f32.gmra.mrb[202].mxu1 %vm1675_vm9, %v5898_v50 }
0x15b2   :  { %v5868_v38 = vadd.f32 %v13508_v39, %v11449_v51  ;;  %v5693_v41 = vpop.f32.mrb[207].mxu0  ;;  %11501 = vmatprep.mubr.msk.f32.mxu1 %vm1675_vm9, %v5899_v52  ;;  %v5887_v13 = vadd.f32 %v13520_v34, %v5867_v61 }
0x15b3   :  { %v5885_v5 = vadd.f32 %v13520_v34, %v5865_v49  ;;  %v5866_v6 = vadd.f32 %v13503_v40, %v5693_v41  ;;  %v6126_v40 = vld [vmem:[#allocation8 + $0x388] sm:$0xff] }
0x15b4   :  { %v5888_v2 = vadd.f32 %v13520_v34, %v5868_v38  ;;  %v5903_v39 = vmax.f32 %v5887_v13, 0.0  ;;  %v12133_v46 = vpack.c.bf16 %v6127_v60, %v6126_v40 }
0x15b5   :  { %v5901_v17 = vmax.f32 %v5885_v5, 0.0  ;;  %v5886_v59 = vadd.f32 %v13520_v34, %v5866_v6  ;;  %11502 = vmatmul.mubr.msk.f32.gmra.mrb[204].mxu1 %vm1675_vm9, %v5900_v20  ;;  %v9580_v34 = vld [vmem:[#allocation8 + $0x348] ss:$0 sm:$0xff] }
0x15b6   :  { %v5904_v43 = vmax.f32 %v5888_v2, 0.0  ;;  %12134 = vmatprep.subr.bf16.mxu0 %v12133_v46 }
0x15b7   :  { %v5902_v45 = vmax.f32 %v5886_v59, 0.0  ;;  %11504 = vmatprep.mubr.msk.f32.mxu1 %vm1675_vm9, %v5901_v17  ;;  %12136 = vmatpush3.bf16.msra.mxu0 %v12133_v46 }
0x15b9   :  { %11505 = vmatmul.mubr.msk.f32.gmra.mrb[206].mxu1 %vm1675_vm9, %v5902_v45 }
0x15ba   :  { %11507 = vmatprep.mubr.msk.f32.mxu1 %vm1675_vm9, %v5903_v39 }
0x15bd   :  { %11508 = vmatmul.mubr.msk.f32.gmra.mrb[208].mxu1 %vm1675_vm9, %v5904_v43 }
0x1674   :  { %v11488_v53 = vpop.f32.mrb[194].mxu1 }
0x1675   :  { %v6034_v30 = vadd.f32 %v11488_v53, %v9580_v34  ;;  %v6028_v25 = vpop.f32.mrb[195].mxu1  ;;  %v12141_v53 = vpack.c.bf16 %v6345_v12, %v6344_v4 }
0x1676   :  { %v6029_v57 = vadd.f32 %v9580_v34, %v6028_v25  ;;  %v6546_v25 = vld [vmem:[#allocation8 + $0x3d8] sm:$0xf] }
0x1677   :  { %v6108_v22 = vmax.f32 %v6034_v30, 0.0  ;;  %12142 = vmatprep.subr.bf16.mxu1 %v12141_v53  ;;  %v6545_v30 = vld [vmem:[#allocation8 + $0x3d0] sm:$0xff] }
0x1678   :  { %v6107_v32 = vmax.f32 %v6029_v57, 0.0  ;;  %v11491_v21 = vpop.f32.mrb[196].mxu1  ;;  %12144 = vmatpush3.bf16.msra.mxu1 %v12141_v53  ;;  %v12145_v57 = vpack.c.bf16 %v6546_v25, %v6545_v30  ;;  %v9614_v25 = vld [vmem:[#allocation8 + $0x398] ss:$0 sm:$0xff] }
0x1679   :  { %v6044_v54 = vadd.f32 %v11491_v21, %v9580_v34  ;;  %v6038_v14 = vpop.f32.mrb[197].mxu1 }
0x167a   :  { %v6039_v47 = vadd.f32 %v9580_v34, %v6038_v14  ;;  %11518 = vmatprep.mubr.msk.f32.mxu0 %vm1675_vm9, %v6107_v32  ;;  %12147 = vmatprep.subr.msk.bf16.mxu0 %vm12720_vm6, %v12145_v57 }
0x167b   :  { %11519 = vmatmul.mubr.msk.f32.vlgmr.msra.gmra.mrb[190].mxu0 %vm1675_vm9, %v6108_v22  ;;  %v6110_v28 = vmax.f32 %v6044_v54, 0.0 }
0x167c   :  { %v6109_v24 = vmax.f32 %v6039_v47, 0.0  ;;  %v11494_v19 = vpop.f32.mrb[198].mxu1  ;;  %12150 = vmatpush3.bf16.msk.msra.mxu0 %vm12720_vm6, %v12145_v57 }
0x167d   :  { %v6054_v29 = vadd.f32 %v11494_v19, %v9580_v34  ;;  %v6048_v33 = vpop.f32.mrb[199].mxu1 }
0x167e   :  { %v6049_v1 = vadd.f32 %v9580_v34, %v6048_v33  ;;  %11521 = vmatprep.mubr.msk.f32.mxu0 %vm1675_vm9, %v6109_v24 }
0x167f   :  { %11522 = vmatmul.mubr.msk.f32.gmra.mrb[208].mxu0 %vm1675_vm9, %v6110_v28  ;;  %v6112_v48 = vmax.f32 %v6054_v29, 0.0 }
0x1680   :  { %v6111_v36 = vmax.f32 %v6049_v1, 0.0  ;;  %v11497_v42 = vpop.f32.mrb[200].mxu1 }
0x1681   :  { %v6064_v58 = vadd.f32 %v11497_v42, %v9580_v34  ;;  %v6058_v9 = vpop.f32.mrb[201].mxu1 }
0x1682   :  { %v6059_v31 = vadd.f32 %v9580_v34, %v6058_v9  ;;  %11524 = vmatprep.mubr.msk.f32.mxu0 %vm1675_vm9, %v6111_v36 }
0x1683   :  { %11525 = vmatmul.mubr.msk.f32.gmra.mrb[210].mxu0 %vm1675_vm9, %v6112_v48  ;;  %v6114_v7 = vmax.f32 %v6064_v58, 0.0 }
0x1684   :  { %v6113_v10 = vmax.f32 %v6059_v31, 0.0  ;;  %v11500_v37 = vpop.f32.mrb[202].mxu1 }
0x1685   :  { %v6074_v50 = vadd.f32 %v11500_v37, %v9580_v34  ;;  %v6068_v35 = vpop.f32.mrb[203].mxu1 }
0x1686   :  { %v6069_v52 = vadd.f32 %v9580_v34, %v6068_v35  ;;  %11527 = vmatprep.mubr.msk.f32.mxu0 %vm1675_vm9, %v6113_v10 }
0x1687   :  { %11528 = vmatmul.mubr.msk.f32.gmra.mrb[212].mxu0 %vm1675_vm9, %v6114_v7  ;;  %v6116_v49 = vmax.f32 %v6074_v50, 0.0 }
0x1688   :  { %v6115_v61 = vmax.f32 %v6069_v52, 0.0  ;;  %v11503_v15 = vpop.f32.mrb[204].mxu1 }
0x1689   :  { %v6084_v51 = vadd.f32 %v11503_v15, %v9580_v34  ;;  %v6078_v38 = vpop.f32.mrb[205].mxu1 }
0x168a   :  { %v6079_v41 = vadd.f32 %v9580_v34, %v6078_v38  ;;  %11530 = vmatprep.mubr.msk.f32.mxu0 %vm1675_vm9, %v6115_v61 }
0x168b   :  { %11531 = vmatmul.mubr.msk.f32.gmra.mrb[214].mxu0 %vm1675_vm9, %v6116_v49  ;;  %v6118_v6 = vmax.f32 %v6084_v51, 0.0 }
0x168c   :  { %v6117_v20 = vmax.f32 %v6079_v41, 0.0  ;;  %v11506_v5 = vpop.f32.mrb[206].mxu1 }
0x168d   :  { %v6094_v13 = vadd.f32 %v11506_v5, %v9580_v34  ;;  %v6088_v17 = vpop.f32.mrb[207].mxu1 }
0x168e   :  { %v6089_v59 = vadd.f32 %v9580_v34, %v6088_v17  ;;  %11533 = vmatprep.mubr.msk.f32.mxu0 %vm1675_vm9, %v6117_v20 }
0x168f   :  { %11534 = vmatmul.mubr.msk.f32.gmra.mrb[216].mxu0 %vm1675_vm9, %v6118_v6  ;;  %v6120_v39 = vmax.f32 %v6094_v13, 0.0 }
0x1690   :  { %v6119_v2 = vmax.f32 %v6089_v59, 0.0  ;;  %v11509_v45 = vpop.f32.mrb[208].mxu1 }
0x1691   :  { %v6104_v43 = vadd.f32 %v11509_v45, %v9580_v34  ;;  %v6098_v40 = vpop.f32.mrb[209].mxu1 }
0x1692   :  { %v6099_v60 = vadd.f32 %v9580_v34, %v6098_v40  ;;  %11536 = vmatprep.mubr.msk.f32.mxu0 %vm1675_vm9, %v6119_v2  ;;  %v9597_v34 = vld [vmem:[#allocation8 + $0x370] ss:$0 sm:$0xff] }
0x1693   :  { %11537 = vmatmul.mubr.msk.f32.gmra.mrb[218].mxu0 %vm1675_vm9, %v6120_v39  ;;  %v6122_v63 = vmax.f32 %v6104_v43, 0.0 }
0x1694   :  { %v6121_v46 = vmax.f32 %v6099_v60, 0.0 }
0x1696   :  { %11539 = vmatprep.mubr.msk.f32.mxu0 %vm1675_vm9, %v6121_v46 }
0x1697   :  { %11540 = vmatmul.mubr.msk.f32.gmra.mrb[220].mxu0 %vm1675_vm9, %v6122_v63 }
0x174e   :  { %v11520_v32 = vpop.f32.mrb[190].mxu0 }
0x174f   :  { %v6252_v21 = vadd.f32 %v11520_v32, %v9597_v34  ;;  %v6246_v22 = vpop.f32.mrb[191].mxu0 }
0x1750   :  { %v6247_v54 = vadd.f32 %v9597_v34, %v6246_v22 }
0x1751   :  { %v6326_v24 = vmax.f32 %v6252_v21, 0.0 }
0x1752   :  { %v6325_v14 = vmax.f32 %v6247_v54, 0.0  ;;  %v11523_v47 = vpop.f32.mrb[208].mxu0 }
0x1753   :  { %v6262_v19 = vadd.f32 %v11523_v47, %v9597_v34  ;;  %v6256_v28 = vpop.f32.mrb[209].mxu0 }
0x1754   :  { %v6257_v29 = vadd.f32 %v9597_v34, %v6256_v28  ;;  %11550 = vmatprep.mubr.msk.f32.mxu1 %vm1675_vm9, %v6325_v14 }
0x1755   :  { %11551 = vmatmul.mubr.msk.f32.vlgmr.msra.gmra.mrb[210].mxu1 %vm1675_vm9, %v6326_v24  ;;  %v6328_v36 = vmax.f32 %v6262_v19, 0.0 }
0x1756   :  { %v6327_v33 = vmax.f32 %v6257_v29, 0.0  ;;  %v11526_v1 = vpop.f32.mrb[210].mxu0 }
0x1757   :  { %v6272_v42 = vadd.f32 %v11526_v1, %v9597_v34  ;;  %v6266_v48 = vpop.f32.mrb[211].mxu0 }
0x1758   :  { %v6267_v58 = vadd.f32 %v9597_v34, %v6266_v48  ;;  %11553 = vmatprep.mubr.msk.f32.mxu1 %vm1675_vm9, %v6327_v33 }
0x1759   :  { %11554 = vmatmul.mubr.msk.f32.gmra.mrb[212].mxu1 %vm1675_vm9, %v6328_v36  ;;  %v6330_v10 = vmax.f32 %v6272_v42, 0.0 }
0x175a   :  { %v6329_v9 = vmax.f32 %v6267_v58, 0.0  ;;  %v11529_v31 = vpop.f32.mrb[212].mxu0 }
0x175b   :  { %v6282_v37 = vadd.f32 %v11529_v31, %v9597_v34  ;;  %v6276_v7 = vpop.f32.mrb[213].mxu0 }
0x175c   :  { %v6277_v50 = vadd.f32 %v9597_v34, %v6276_v7  ;;  %11556 = vmatprep.mubr.msk.f32.mxu1 %vm1675_vm9, %v6329_v9 }
0x175d   :  { %11557 = vmatmul.mubr.msk.f32.gmra.mrb[214].mxu1 %vm1675_vm9, %v6330_v10  ;;  %v6332_v61 = vmax.f32 %v6282_v37, 0.0 }
0x175e   :  { %v6331_v35 = vmax.f32 %v6277_v50, 0.0  ;;  %v11532_v52 = vpop.f32.mrb[214].mxu0 }
0x175f   :  { %v6292_v15 = vadd.f32 %v11532_v52, %v9597_v34  ;;  %v6286_v49 = vpop.f32.mrb[215].mxu0 }
0x1760   :  { %v6287_v51 = vadd.f32 %v9597_v34, %v6286_v49  ;;  %11559 = vmatprep.mubr.msk.f32.mxu1 %vm1675_vm9, %v6331_v35 }
0x1761   :  { %11560 = vmatmul.mubr.msk.f32.gmra.mrb[216].mxu1 %vm1675_vm9, %v6332_v61  ;;  %v6334_v20 = vmax.f32 %v6292_v15, 0.0 }
0x1762   :  { %v6333_v38 = vmax.f32 %v6287_v51, 0.0  ;;  %v11535_v41 = vpop.f32.mrb[216].mxu0 }
0x1763   :  { %v6302_v5 = vadd.f32 %v11535_v41, %v9597_v34  ;;  %v6296_v6 = vpop.f32.mrb[217].mxu0 }
0x1764   :  { %v6297_v13 = vadd.f32 %v9597_v34, %v6296_v6  ;;  %11562 = vmatprep.mubr.msk.f32.mxu1 %vm1675_vm9, %v6333_v38 }
0x1765   :  { %11563 = vmatmul.mubr.msk.f32.gmra.mrb[218].mxu1 %vm1675_vm9, %v6334_v20  ;;  %v6336_v2 = vmax.f32 %v6302_v5, 0.0 }
0x1766   :  { %v6335_v17 = vmax.f32 %v6297_v13, 0.0  ;;  %v11538_v59 = vpop.f32.mrb[218].mxu0 }
0x1767   :  { %v6312_v45 = vadd.f32 %v11538_v59, %v9597_v34  ;;  %v6306_v39 = vpop.f32.mrb[219].mxu0 }
0x1768   :  { %v6307_v43 = vadd.f32 %v9597_v34, %v6306_v39  ;;  %11565 = vmatprep.mubr.msk.f32.mxu1 %vm1675_vm9, %v6335_v17 }
0x1769   :  { %11566 = vmatmul.mubr.msk.f32.gmra.mrb[220].mxu1 %vm1675_vm9, %v6336_v2  ;;  %v6338_v46 = vmax.f32 %v6312_v45, 0.0 }
0x176a   :  { %v6337_v40 = vmax.f32 %v6307_v43, 0.0  ;;  %v11541_v60 = vpop.f32.mrb[220].mxu0 }
0x176b   :  { %v6322_v63 = vadd.f32 %v11541_v60, %v9597_v34  ;;  %v6316_v4 = vpop.f32.mrb[221].mxu0 }
0x176c   :  { %v6317_v12 = vadd.f32 %v9597_v34, %v6316_v4  ;;  %11568 = vmatprep.mubr.msk.f32.mxu1 %vm1675_vm9, %v6337_v40 }
0x176d   :  { %11569 = vmatmul.mubr.msk.f32.gmra.mrb[222].mxu1 %vm1675_vm9, %v6338_v46  ;;  %v6340_v30 = vmax.f32 %v6322_v63, 0.0 }
0x176e   :  { %v6339_v53 = vmax.f32 %v6317_v12, 0.0 }
0x1770   :  { %11571 = vmatprep.mubr.msk.f32.mxu1 %vm1675_vm9, %v6339_v53 }
0x1771   :  { %11572 = vmatmul.mubr.msk.f32.gmra.mrb[224].mxu1 %vm1675_vm9, %v6340_v30 }
0x1772   :  { %11618 = vmatprep.mubr.bf16.mxu1 %v13010_v56 }
0x1828   :  { %v11552_v57 = vpop.f32.mrb[210].mxu1 }
0x1829   :  { %v6464_v32 = vpop.f32.mrb[211].mxu1  ;;  %v13609_v22 = vadd.f32 %v11552_v57, %v9614_v25 }
0x182a   :  { %v13607_v21 = vadd.f32 %v9614_v25, %v6464_v32 }
0x182c   :  { %v11555_v34 = vpop.f32.mrb[212].mxu1  ;;  %11578 = vmatprep.mubr.msk.f32.mxu0 %vm1417_vm8, %v13607_v21 }
0x182d   :  { %v6474_v54 = vpop.f32.mrb[213].mxu1  ;;  %11579 = vmatmul.mubr.msk.f32.vlgmr.msra.gmra.mrb[222].mxu0 %vm1417_vm8, %v13609_v22  ;;  %v13617_v47 = vadd.f32 %v11555_v34, %v9614_v25 }
0x182e   :  { %v13615_v14 = vadd.f32 %v9614_v25, %v6474_v54 }
0x1830   :  { %v11558_v56 = vpop.f32.mrb[214].mxu1  ;;  %11581 = vmatprep.mubr.msk.f32.mxu0 %vm1417_vm8, %v13615_v14 }
0x1831   :  { %v6484_v24 = vpop.f32.mrb[215].mxu1  ;;  %11582 = vmatmul.mubr.msk.f32.gmra.mrb[224].mxu0 %vm1417_vm8, %v13617_v47  ;;  %v13625_v28 = vadd.f32 %v11558_v56, %v9614_v25  ;;  %v6544_v56 = vld [vmem:[#allocation8 + $0x3c8] sm:$0xff] }
0x1832   :  { %v13623_v19 = vadd.f32 %v9614_v25, %v6484_v24 }
0x1834   :  { %v11561_v29 = vpop.f32.mrb[216].mxu1  ;;  %11584 = vmatprep.mubr.msk.f32.mxu0 %vm1417_vm8, %v13623_v19 }
0x1835   :  { %v6494_v33 = vpop.f32.mrb[217].mxu1  ;;  %11585 = vmatmul.mubr.msk.f32.gmra.mrb[226].mxu0 %vm1417_vm8, %v13625_v28  ;;  %v13633_v36 = vadd.f32 %v11561_v29, %v9614_v25 }
0x1836   :  { %v13631_v1 = vadd.f32 %v9614_v25, %v6494_v33 }
0x1838   :  { %v11564_v42 = vpop.f32.mrb[218].mxu1  ;;  %11587 = vmatprep.mubr.msk.f32.mxu0 %vm1417_vm8, %v13631_v1 }
0x1839   :  { %v6504_v48 = vpop.f32.mrb[219].mxu1  ;;  %11588 = vmatmul.mubr.msk.f32.gmra.mrb[228].mxu0 %vm1417_vm8, %v13633_v36  ;;  %v13641_v9 = vadd.f32 %v11564_v42, %v9614_v25 }
0x183a   :  { %v13639_v58 = vadd.f32 %v9614_v25, %v6504_v48 }
0x183c   :  { %v11567_v31 = vpop.f32.mrb[220].mxu1  ;;  %11590 = vmatprep.mubr.msk.f32.mxu0 %vm1417_vm8, %v13639_v58 }
0x183d   :  { %v6514_v10 = vpop.f32.mrb[221].mxu1  ;;  %11591 = vmatmul.mubr.msk.f32.gmra.mrb[230].mxu0 %vm1417_vm8, %v13641_v9  ;;  %v13649_v7 = vadd.f32 %v11567_v31, %v9614_v25 }
0x183e   :  { %v13647_v37 = vadd.f32 %v9614_v25, %v6514_v10  ;;  %v9656_v10 = vld [vmem:[#allocation8 + $0x3c0] ss:$0 sm:$0xff] }
0x1840   :  { %v11570_v50 = vpop.f32.mrb[222].mxu1  ;;  %11593 = vmatprep.mubr.msk.f32.mxu0 %vm1417_vm8, %v13647_v37 }
0x1841   :  { %v6524_v35 = vpop.f32.mrb[223].mxu1  ;;  %11594 = vmatmul.mubr.msk.f32.gmra.mrb[232].mxu0 %vm1417_vm8, %v13649_v7  ;;  %v13657_v61 = vadd.f32 %v11570_v50, %v9614_v25 }
0x1842   :  { %v13655_v52 = vadd.f32 %v9614_v25, %v6524_v35 }
0x1844   :  { %v11573_v15 = vpop.f32.mrb[224].mxu1  ;;  %11596 = vmatprep.mubr.msk.f32.mxu0 %vm1417_vm8, %v13655_v52 }
0x1845   :  { %v6534_v49 = vpop.f32.mrb[225].mxu1  ;;  %11597 = vmatmul.mubr.msk.f32.gmra.mrb[234].mxu0 %vm1417_vm8, %v13657_v61  ;;  %v13665_v38 = vadd.f32 %v11573_v15, %v9614_v25 }
0x1846   :  { %v13663_v51 = vadd.f32 %v9614_v25, %v6534_v49 }
0x1848   :  { %11599 = vmatprep.mubr.msk.f32.mxu0 %vm1417_vm8, %v13663_v51 }
0x1849   :  { %11600 = vmatmul.mubr.msk.f32.gmra.mrb[236].mxu0 %vm1417_vm8, %v13665_v38 }
0x1900   :  { %v11580_v41 = vpop.f32.mrb[222].mxu0 }
0x1901   :  { %v6664_v20 = vpop.f32.mrb[223].mxu0 }
0x1902   :  { %v6743_v5 = vpack.c.bf16 %v11580_v41, %v6664_v20 }
0x1904   :  { %v11583_v6 = vpop.f32.mrb[224].mxu0  ;;  %11602 = vmatprep.subr.bf16.mxu1 %v6743_v5 }
0x1905   :  { %v6674_v13 = vpop.f32.mrb[225].mxu0  ;;  %11603 = vmatpush3.bf16.msra.mxu1 %v6743_v5 }
0x1906   :  { %v6744_v17 = vpack.c.bf16 %v11583_v6, %v6674_v13 }
0x1908   :  { %v11586_v59 = vpop.f32.mrb[226].mxu0  ;;  %11604 = vmatprep.subr.bf16.mxu1 %v6744_v17 }
0x1909   :  { %v6684_v2 = vpop.f32.mrb[227].mxu0  ;;  %11605 = vmatpush3.bf16.msra.mxu1 %v6744_v17 }
0x190a   :  { %v6745_v45 = vpack.c.bf16 %v11586_v59, %v6684_v2 }
0x190c   :  { %v11589_v39 = vpop.f32.mrb[228].mxu0  ;;  %11606 = vmatprep.subr.bf16.mxu1 %v6745_v45 }
0x190d   :  { %v6694_v43 = vpop.f32.mrb[229].mxu0  ;;  %11607 = vmatpush3.bf16.msra.mxu1 %v6745_v45 }
0x190e   :  { %v6746_v40 = vpack.c.bf16 %v11589_v39, %v6694_v43 }
0x1910   :  { %v11592_v60 = vpop.f32.mrb[230].mxu0  ;;  %11608 = vmatprep.subr.bf16.mxu1 %v6746_v40 }
0x1911   :  { %v6704_v46 = vpop.f32.mrb[231].mxu0  ;;  %11609 = vmatpush3.bf16.msra.mxu1 %v6746_v40 }
0x1912   :  { %v6747_v63 = vpack.c.bf16 %v11592_v60, %v6704_v46 }
0x1914   :  { %v11595_v4 = vpop.f32.mrb[232].mxu0  ;;  %11610 = vmatprep.subr.bf16.mxu1 %v6747_v63 }
0x1915   :  { %v6714_v12 = vpop.f32.mrb[233].mxu0  ;;  %11611 = vmatpush3.bf16.msra.mxu1 %v6747_v63 }
0x1916   :  { %v6748_v53 = vpack.c.bf16 %v11595_v4, %v6714_v12 }
0x1918   :  { %v11598_v30 = vpop.f32.mrb[234].mxu0  ;;  %11612 = vmatprep.subr.bf16.mxu1 %v6748_v53 }
0x1919   :  { %v6724_v25 = vpop.f32.mrb[235].mxu0  ;;  %11613 = vmatpush3.bf16.msra.mxu1 %v6748_v53 }
0x191a   :  { %v6749_v57 = vpack.c.bf16 %v11598_v30, %v6724_v25 }
0x191c   :  { %v11601_v32 = vpop.f32.mrb[236].mxu0  ;;  %11614 = vmatprep.subr.bf16.mxu1 %v6749_v57 }
0x191d   :  { %v6734_v34 = vpop.f32.mrb[237].mxu0  ;;  %11615 = vmatpush3.bf16.msra.mxu1 %v6749_v57 }
0x191e   :  { %v6750_v54 = vpack.c.bf16 %v11601_v32, %v6734_v34 }
0x1920   :  { %11616 = vmatprep.subr.bf16.mxu1 %v6750_v54 }
0x1921   :  { %11617 = vmatpush3.bf16.msra.mxu1 %v6750_v54 }
0x1922   :  { %11626 = vmatprep.subr.mxu1 %v6544_v56 }
0x1924   :  { %11619 = vmatmul.mubr.bf16.vlgmr.msra.gmra.mrb[228].mxu1 %v13013_v18  ;;  %v6942_v18 = vld [vmem:[#allocation8 + $0x3e8] sm:$0xff] }
0x1925   :  { %11622 = vmatprep.mubr.bf16.mxu1 %v13015_v26  ;;  %11627 = vmatpush3.msra.mxu1 %v6544_v56  ;;  %v6943_v26 = vld [vmem:[#allocation8 + $0x3f0] sm:$0xff] }
0x192c   :  { %11623 = vmatmul.mubr.bf16.gmra.mrb[232].mxu1 %v13019_v27  ;;  %v12151_v27 = vpack.c.bf16 %v6943_v26, %v6942_v18 }
0x192d   :  { %11628 = vmatprep.mubr.msk.f32.mxu1 %vm820_vm7, %v13390_v44  ;;  %v6944_v44 = vld [vmem:[#allocation8 + $0x3f8] sm:$0xff] }
0x192e   :  { %12152 = vmatprep.subr.bf16.mxu0 %v12151_v27 }
0x192f   :  { %12154 = vmatpush3.bf16.msra.mxu0 %v12151_v27 }
0x1934   :  { %11629 = vmatmul.mubr.msk.f32.vlgmr.msra.gmra.mrb[226].mxu1 %vm820_vm7, %v13392_v3  ;;  %v6945_v3 = vld [vmem:[#allocation8 + $0x400] sm:$0xff] }
0x1935   :  { %11631 = vmatprep.mubr.msk.f32.mxu1 %vm820_vm7, %v13402_v16  ;;  %v12155_v16 = vpack.c.bf16 %v6945_v3, %v6944_v44  ;;  %v7090_v44 = vld [vmem:[#allocation8 + $0x420] sm:$0xff]  ;;  %v7091_v3 = vld [vmem:[#allocation8 + $0x428] sm:$0xff] }
0x1937   :  { %12156 = vmatprep.subr.bf16.mxu0 %v12155_v16 }
0x1938   :  { %11632 = vmatmul.mubr.msk.f32.gmra.mrb[236].mxu1 %vm820_vm7, %v13406_v23  ;;  %12158 = vmatpush3.bf16.msra.mxu0 %v12155_v16  ;;  %v7088_v23 = vld [vmem:[#allocation8 + $0x410] sm:$0xff]  ;;  %v12163_v16 = vpack.c.bf16 %v7091_v3, %v7090_v44 }
0x1939   :  { %11634 = vmatprep.mubr.msk.f32.mxu1 %vm820_vm7, %v13416_v55  ;;  %v7089_v55 = vld [vmem:[#allocation8 + $0x418] sm:$0xff] }
0x193a   :  { %v12159_v24 = vpack.c.bf16 %v7089_v55, %v7088_v23  ;;  %v7234_v23 = vld [vmem:[#allocation8 + $0x438] sm:$0xff]  ;;  %v7235_v55 = vld [vmem:[#allocation8 + $0x440] sm:$0xff] }
0x193c   :  { %11635 = vmatmul.mubr.msk.f32.gmra.mrb[238].mxu1 %vm820_vm7, %v13418_v0  ;;  %12160 = vmatprep.subr.bf16.mxu1 %v12159_v24 }
0x193d   :  { %11637 = vmatprep.mubr.msk.f32.mxu1 %vm820_vm7, %v13428_v8  ;;  %12162 = vmatpush3.bf16.msra.mxu1 %v12159_v24  ;;  %v12167_v24 = vpack.c.bf16 %v7235_v55, %v7234_v23 }
0x193e   :  { %12164 = vmatprep.subr.bf16.mxu1 %v12163_v16 }
0x193f   :  { %12168 = vmatprep.subr.bf16.mxu0 %v12167_v24 }
0x1940   :  { %11638 = vmatmul.mubr.msk.f32.gmra.mrb[240].mxu1 %vm820_vm7, %v13430_v11 }
0x1941   :  { %12166 = vmatpush3.bf16.msra.mxu1 %v12163_v16 }
0x19f7   :  { %v11620_v0 = vpop.f32.mrb[228].mxu1 }
0x19f8   :  { %v6785_v8 = vpop.f32.mrb[229].mxu1 }
0x19f9   :  { %v11621_v29 = vpop.f32.mrb[230].mxu1 }
0x19fa   :  { %v6788_v33 = vpop.f32.mrb[231].mxu1 }
0x19ff   :  { %v11624_v11 = vpop.f32.mrb[232].mxu1 }
0x1a00   :  { %v6801_v42 = vpop.f32.mrb[233].mxu1 }
0x1a01   :  { %v11625_v48 = vpop.f32.mrb[234].mxu1 }
0x1a02   :  { %v6804_v31 = vpop.f32.mrb[235].mxu1 }
0x1a07   :  { %v11630_v50 = vpop.f32.mrb[226].mxu1 }
0x1a08   :  { %v6888_v35 = vadd.f32 %v11630_v50, %v6788_v33  ;;  %v6882_v15 = vpop.f32.mrb[227].mxu1 }
0x1a09   :  { %v6883_v49 = vadd.f32 %v6882_v15, %v6785_v8 }
0x1a0a   :  { %v6926_v41 = vadd.f32 %v9656_v10, %v6888_v35 }
0x1a0b   :  { %v6925_v20 = vadd.f32 %v9656_v10, %v6883_v49  ;;  %v11633_v5 = vpop.f32.mrb[236].mxu1 }
0x1a0c   :  { %v6898_v6 = vadd.f32 %v11633_v5, %v11621_v29  ;;  %v6892_v13 = vpop.f32.mrb[237].mxu1  ;;  %v6934_v2 = vmax.f32 %v6926_v41, 0.0 }
0x1a0d   :  { %v6933_v17 = vmax.f32 %v6925_v20, 0.0  ;;  %v6893_v59 = vadd.f32 %v11620_v0, %v6892_v13  ;;  %v9657_v0 = vld [vmem:[#allocation8 + $0x3e0] ss:$0 sm:$0xff] }
0x1a0e   :  { %v6928_v45 = vadd.f32 %v9656_v10, %v6898_v6 }
0x1a0f   :  { %v6927_v39 = vadd.f32 %v9656_v10, %v6893_v59  ;;  %v11636_v43 = vpop.f32.mrb[238].mxu1  ;;  %11648 = vmatprep.mubr.msk.f32.mxu0 %vm1675_vm9, %v6933_v17 }
0x1a10   :  { %v6908_v40 = vadd.f32 %v11636_v43, %v6804_v31  ;;  %v6902_v60 = vpop.f32.mrb[239].mxu1  ;;  %11649 = vmatmul.mubr.msk.f32.vlgmr.msra.gmra.mrb[238].mxu0 %vm1675_vm9, %v6934_v2  ;;  %v6936_v4 = vmax.f32 %v6928_v45, 0.0 }
0x1a11   :  { %v6935_v46 = vmax.f32 %v6927_v39, 0.0  ;;  %v6903_v63 = vadd.f32 %v6902_v60, %v6801_v42  ;;  %12170 = vmatpush3.bf16.msra.mxu0 %v12167_v24  ;;  %v7236_v60 = vld [vmem:[#allocation8 + $0x448] sm:$0xff] }
0x1a12   :  { %v6930_v12 = vadd.f32 %v9656_v10, %v6908_v40 }
0x1a13   :  { %v6929_v53 = vadd.f32 %v9656_v10, %v6903_v63  ;;  %v11639_v30 = vpop.f32.mrb[240].mxu1  ;;  %11651 = vmatprep.mubr.msk.f32.mxu0 %vm1675_vm9, %v6935_v46  ;;  %v7237_v46 = vld [vmem:[#allocation8 + $0x450] sm:$0xff] }
0x1a14   :  { %v6918_v25 = vadd.f32 %v11639_v30, %v11625_v48  ;;  %v6912_v57 = vpop.f32.mrb[241].mxu1  ;;  %11652 = vmatmul.mubr.msk.f32.gmra.mrb[240].mxu0 %vm1675_vm9, %v6936_v4  ;;  %v6938_v54 = vmax.f32 %v6930_v12, 0.0  ;;  %v12171_v63 = vpack.c.bf16 %v7237_v46, %v7236_v60  ;;  %v9666_v4 = vld [vmem:[#allocation8 + $0x408] ss:$0 sm:$0xff] }
0x1a15   :  { %v6937_v32 = vmax.f32 %v6929_v53, 0.0  ;;  %v6913_v34 = vadd.f32 %v11624_v11, %v6912_v57 }
0x1a16   :  { %v6932_v56 = vadd.f32 %v9656_v10, %v6918_v25  ;;  %12172 = vmatprep.subr.bf16.mxu0 %v12171_v63 }
0x1a17   :  { %v6931_v18 = vadd.f32 %v9656_v10, %v6913_v34  ;;  %11654 = vmatprep.mubr.msk.f32.mxu0 %vm1675_vm9, %v6937_v32  ;;  %12174 = vmatpush3.bf16.msra.mxu0 %v12171_v63  ;;  %v12412_v63 = vld [vmem:[#allocation7 + $0x40] sm:$0xff]  }
0x1a18   :  { %11655 = vmatmul.mubr.msk.f32.gmra.mrb[242].mxu0 %vm1675_vm9, %v6938_v54  ;;  %v6940_v27 = vmax.f32 %v6932_v56, 0.0 }
0x1a19   :  { %v6939_v26 = vmax.f32 %v6931_v18, 0.0 }
0x1a1b   :  { %11657 = vmatprep.mubr.msk.f32.mxu0 %vm1675_vm9, %v6939_v26 }
0x1a1c   :  { %11658 = vmatmul.mubr.msk.f32.gmra.mrb[244].mxu0 %vm1675_vm9, %v6940_v27 }
0x1ae3   :  { %v11650_v8 = vpop.f32.mrb[238].mxu0 }
0x1ae4   :  { %v7046_v29 = vadd.f32 %v11650_v8, %v9657_v0  ;;  %v7040_v33 = vpop.f32.mrb[239].mxu0 }
0x1ae5   :  { %v7041_v11 = vadd.f32 %v9657_v0, %v7040_v33 }
0x1ae6   :  { %v7080_v31 = vmax.f32 %v7046_v29, 0.0 }
0x1ae7   :  { %v7079_v42 = vmax.f32 %v7041_v11, 0.0  ;;  %v11653_v48 = vpop.f32.mrb[240].mxu0 }
0x1ae8   :  { %v7056_v10 = vadd.f32 %v11653_v48, %v9657_v0  ;;  %v7050_v50 = vpop.f32.mrb[241].mxu0  ;;  %v7372_v48 = vld [vmem:[#allocation8 + $0x460] sm:$0xff] }
0x1ae9   :  { %v7051_v35 = vadd.f32 %v9657_v0, %v7050_v50  ;;  %11668 = vmatprep.mubr.msk.f32.mxu1 %vm1675_vm9, %v7079_v42  ;;  %11700 = vmatprep.subr.mxu1 %v7372_v48  ;;  %v7375_v50 = vld [vmem:[#allocation8 + $0x478] sm:$0xf] }
0x1aea   :  { %11669 = vmatmul.mubr.msk.f32.vlgmr.msra.gmra.mrb[242].mxu1 %vm1675_vm9, %v7080_v31  ;;  %v7082_v41 = vmax.f32 %v7056_v10, 0.0  ;;  %v7373_v31 = vld [vmem:[#allocation8 + $0x468] sm:$0xff]  ;;  %v7374_v10 = vld [vmem:[#allocation8 + $0x470] sm:$0xff] }
0x1aeb   :  { %v7081_v15 = vmax.f32 %v7051_v35, 0.0  ;;  %v11656_v49 = vpop.f32.mrb[242].mxu0  ;;  %11714 = vmatprep.subr.mxu0 %v7373_v31  ;;  %11701 = vmatpush3.msra.mxu1 %v7372_v48  ;;  %v12175_v35 = vpack.c.bf16 %v7375_v50, %v7374_v10  ;;  %v12418_v48 = vld [vmem:[#allocation7 + $0x70] sm:$0xff]   ;;  %v12419_v50 = vld [vmem:[#allocation7 + $0x78] sm:$0xff]  }
0x1aec   :  { %v7066_v20 = vadd.f32 %v11656_v49, %v9657_v0  ;;  %v7060_v5 = vpop.f32.mrb[243].mxu0 }
0x1aed   :  { %v7061_v6 = vadd.f32 %v9657_v0, %v7060_v5  ;;  %11671 = vmatprep.mubr.msk.f32.mxu1 %vm1675_vm9, %v7081_v15  ;;  %v9675_v15 = vld [vmem:[#allocation8 + $0x430] ss:$0 sm:$0xff] }
0x1aee   :  { %11672 = vmatmul.mubr.msk.f32.gmra.mrb[244].mxu1 %vm1675_vm9, %v7082_v41  ;;  %v7084_v59 = vmax.f32 %v7066_v20, 0.0 }
0x1aef   :  { %v7083_v13 = vmax.f32 %v7061_v6, 0.0  ;;  %v11659_v17 = vpop.f32.mrb[244].mxu0 }
0x1af0   :  { %v7076_v2 = vadd.f32 %v11659_v17, %v9657_v0  ;;  %v7070_v45 = vpop.f32.mrb[245].mxu0 }
0x1af1   :  { %v7071_v39 = vadd.f32 %v9657_v0, %v7070_v45  ;;  %11674 = vmatprep.mubr.msk.f32.mxu1 %vm1675_vm9, %v7083_v13 }
0x1af2   :  { %11675 = vmatmul.mubr.msk.f32.gmra.mrb[246].mxu1 %vm1675_vm9, %v7084_v59  ;;  %v7086_v40 = vmax.f32 %v7076_v2, 0.0 }
0x1af3   :  { %v7085_v43 = vmax.f32 %v7071_v39, 0.0 }
0x1af5   :  { %11677 = vmatprep.mubr.msk.f32.mxu1 %vm1675_vm9, %v7085_v43 }
0x1af6   :  { %11678 = vmatmul.mubr.msk.f32.gmra.mrb[248].mxu1 %vm1675_vm9, %v7086_v40 }
0x1bbd   :  { %v11670_v12 = vpop.f32.mrb[242].mxu1 }
0x1bbe   :  { %v7192_v53 = vadd.f32 %v11670_v12, %v9666_v4  ;;  %v7186_v30 = vpop.f32.mrb[243].mxu1 }
0x1bbf   :  { %v7187_v25 = vadd.f32 %v9666_v4, %v7186_v30 }
0x1bc0   :  { %v7226_v34 = vmax.f32 %v7192_v53, 0.0 }
0x1bc1   :  { %v7225_v57 = vmax.f32 %v7187_v25, 0.0  ;;  %v11673_v32 = vpop.f32.mrb[244].mxu1 }
0x1bc2   :  { %v7202_v54 = vadd.f32 %v11673_v32, %v9666_v4  ;;  %v7196_v56 = vpop.f32.mrb[245].mxu1 }
0x1bc3   :  { %v7197_v18 = vadd.f32 %v9666_v4, %v7196_v56  ;;  %11688 = vmatprep.mubr.msk.f32.mxu0 %vm1675_vm9, %v7225_v57 }
0x1bc4   :  { %11689 = vmatmul.mubr.msk.f32.vlgmr.msra.gmra.mrb[246].mxu0 %vm1675_vm9, %v7226_v34  ;;  %v7228_v44 = vmax.f32 %v7202_v54, 0.0 }
0x1bc5   :  { %v7227_v26 = vmax.f32 %v7197_v18, 0.0  ;;  %v11676_v27 = vpop.f32.mrb[246].mxu1  ;;  %11715 = vmatpush3.msra.mxu0 %v7373_v31  ;;  %v12413_v18 = vld [vmem:[#allocation7 + $0x48] sm:$0xff]  }
0x1bc6   :  { %v7212_v3 = vadd.f32 %v11676_v27, %v9666_v4  ;;  %v7206_v16 = vpop.f32.mrb[247].mxu1  ;;  %12177 = vmatprep.subr.msk.bf16.mxu0 %vm12720_vm6, %v12175_v35 }
0x1bc7   :  { %v7207_v23 = vadd.f32 %v9666_v4, %v7206_v16  ;;  %11691 = vmatprep.mubr.msk.f32.mxu0 %vm1675_vm9, %v7227_v26 }
0x1bc8   :  { %11692 = vmatmul.mubr.msk.f32.gmra.mrb[248].mxu0 %vm1675_vm9, %v7228_v44  ;;  %v7230_v0 = vmax.f32 %v7212_v3, 0.0  ;;  %v12414_v44 = vld [vmem:[#allocation7 + $0x50] sm:$0xff]  }
0x1bc9   :  { %v7229_v55 = vmax.f32 %v7207_v23, 0.0  ;;  %v11679_v24 = vpop.f32.mrb[248].mxu1  ;;  %v12415_v23 = vld [vmem:[#allocation7 + $0x58] sm:$0xff]  }
0x1bca   :  { %v7222_v8 = vadd.f32 %v11679_v24, %v9666_v4  ;;  %v7216_v29 = vpop.f32.mrb[249].mxu1 }
0x1bcb   :  { %v7217_v33 = vadd.f32 %v9666_v4, %v7216_v29  ;;  %11694 = vmatprep.mubr.msk.f32.mxu0 %vm1675_vm9, %v7229_v55 }
0x1bcc   :  { %11695 = vmatmul.mubr.msk.f32.gmra.mrb[250].mxu0 %vm1675_vm9, %v7230_v0  ;;  %v7232_v42 = vmax.f32 %v7222_v8, 0.0  ;;  %v12416_v0 = vld [vmem:[#allocation7 + $0x60] sm:$0xff]  }
0x1bcd   :  { %v7231_v11 = vmax.f32 %v7217_v33, 0.0  ;;  %v12417_v33 = vld [vmem:[#allocation7 + $0x68] sm:$0xff]  }
0x1bcf   :  { %11697 = vmatprep.mubr.msk.f32.mxu0 %vm1675_vm9, %v7231_v11 }
0x1bd0   :  { %11698 = vmatmul.mubr.msk.f32.gmra.mrb[252].mxu0 %vm1675_vm9, %v7232_v42 }
0x1c97   :  { %v11690_v49 = vpop.f32.mrb[246].mxu0 }
0x1c98   :  { %v7332_v41 = vpop.f32.mrb[247].mxu0  ;;  %v7338_v5 = vadd.f32 %v11690_v49, %v9675_v15  ;;  %v12420_v49 = vld [vmem:[#allocation7] sm:$0xff]  }
0x1c99   :  { %v7333_v20 = vadd.f32 %v9675_v15, %v7332_v41  ;;  %v12421_v41 = vld [vmem:[#allocation7 + $0x8] sm:$0xff]  }
0x1c9b   :  { %v11693_v6 = vpop.f32.mrb[248].mxu0  ;;  %11702 = vmatprep.mubr.msk.f32.mxu1 %vm820_vm7, %v7333_v20  ;;  %11716 = vmatprep.mubr.msk.f32.mxu0 %vm820_vm7, %v7333_v20  ;;  %v12422_v20 = vld [vmem:[#allocation7 + $0x10] sm:$0xff]  }
0x1c9c   :  { %v7342_v13 = vpop.f32.mrb[249].mxu0  ;;  %11703 = vmatmul.mubr.msk.f32.vlgmr.msra.gmra.mrb[250].mxu1 %vm820_vm7, %v7338_v5  ;;  %11717 = vmatmul.mubr.msk.f32.vlgmr.msra.gmra.mrb[254].mxu0 %vm820_vm7, %v7338_v5  ;;  %v7348_v59 = vadd.f32 %v11693_v6, %v9675_v15  ;;  %v12423_v5 = vld [vmem:[#allocation7 + $0x18] sm:$0xff]   ;;  %v12424_v6 = vld [vmem:[#allocation7 + $0x20] sm:$0xff]  }
0x1c9d   :  { %v7343_v17 = vadd.f32 %v9675_v15, %v7342_v13  ;;  %12180 = vmatpush3.bf16.msk.msra.mxu0 %vm12720_vm6, %v12175_v35  ;;  %v12425_v13 = vld [vmem:[#allocation7 + $0x28] sm:$0xff]  }
0x1c9f   :  { %v11696_v2 = vpop.f32.mrb[250].mxu0  ;;  %11705 = vmatprep.mubr.msk.f32.mxu1 %vm820_vm7, %v7343_v17  ;;  %11719 = vmatprep.mubr.msk.f32.mxu0 %vm820_vm7, %v7343_v17  ;;  %v12426_v17 = vld [vmem:[#allocation7 + $0x30] sm:$0xff]  }
0x1ca0   :  { %v7352_v45 = vpop.f32.mrb[251].mxu0  ;;  %11706 = vmatmul.mubr.msk.f32.gmra.mrb[252].mxu1 %vm820_vm7, %v7348_v59  ;;  %11720 = vmatmul.mubr.msk.f32.gmra.mrb[0].mxu0 %vm820_vm7, %v7348_v59  ;;  %v7358_v43 = vadd.f32 %v11696_v2, %v9675_v15  ;;  %v12427_v59 = vld [vmem:[#allocation7 + $0x38] sm:$0xff]   ;;  %v8013_v2 = vld [vmem:[#allocation8 + $0x488] sm:$0xff] }
0x1ca1   :  { %v7353_v39 = vadd.f32 %v9675_v15, %v7352_v45  ;;  %v8014_v45 = vld [vmem:[#allocation8 + $0x490] sm:$0xff] }
0x1ca3   :  { %v11699_v40 = vpop.f32.mrb[252].mxu0  ;;  %11708 = vmatprep.mubr.msk.f32.mxu1 %vm820_vm7, %v7353_v39  ;;  %11722 = vmatprep.mubr.msk.f32.mxu0 %vm820_vm7, %v7353_v39  ;;  %v12181_v39 = vpack.c.bf16 %v8014_v45, %v8013_v2 }
0x1ca4   :  { %v7362_v62 = vpop.f32.mrb[253].mxu0  ;;  %11709 = vmatmul.mubr.msk.f32.gmra.mrb[254].mxu1 %vm820_vm7, %v7358_v43  ;;  %11723 = vmatmul.mubr.msk.f32.gmra.mrb[2].mxu0 %vm820_vm7, %v7358_v43  ;;  %v7368_v46 = vadd.f32 %v11699_v40, %v9675_v15  ;;  %v8015_v43 = vld [vmem:[#allocation8 + $0x498] sm:$0xff]  ;;  %v8016_v40 = vld [vmem:[#allocation8 + $0x4a0] sm:$0xff] }
0x1ca5   :  { %v7363_v60 = vadd.f32 %v9675_v15, %v7362_v62  ;;  %12182 = vmatprep.subr.bf16.mxu0 %v12181_v39  ;;  %v12185_v62 = vpack.c.bf16 %v8016_v40, %v8015_v43 }
0x1ca7   :  { %11711 = vmatprep.mubr.msk.f32.mxu1 %vm820_vm7, %v7363_v60  ;;  %11725 = vmatprep.mubr.msk.f32.mxu0 %vm820_vm7, %v7363_v60  ;;  %v8231_v60 = vld [vmem:[#allocation8 + $0x4b0] sm:$0xff] }
0x1ca8   :  { %11712 = vmatmul.mubr.msk.f32.gmra.mrb[0].mxu1 %vm820_vm7, %v7368_v46  ;;  %11726 = vmatmul.mubr.msk.f32.gmra.mrb[4].mxu0 %vm820_vm7, %v7368_v46  ;;  %v8232_v46 = vld [vmem:[#allocation8 + $0x4b8] sm:$0xff] }
0x1ca9   :  { %11780 = vmatprep.mubr.msk.f32.mxu0 %vm1417_vm8, %v13607_v21  ;;  %11736 = vmatprep.mubr.msk.bf16.mxu1 %vm243_vm4, %v12412_v63  ;;  %v12189_v63 = vpack.c.bf16 %v8232_v46, %v8231_v60 }
0x1cac   :  { %11781 = vmatmul.mubr.msk.f32.vlgmr.msra.gmra.mrb[6].mxu0 %vm1417_vm8, %v13609_v22 }
0x1cad   :  { %11783 = vmatprep.mubr.msk.f32.mxu0 %vm1417_vm8, %v13615_v14  ;;  %12184 = vmatpush3.bf16.msra.mxu0 %v12181_v39 }
0x1cae   :  { %12186 = vmatprep.subr.bf16.mxu0 %v12185_v62 }
0x1cb0   :  { %11784 = vmatmul.mubr.msk.f32.gmra.mrb[8].mxu0 %vm1417_vm8, %v13617_v47 }
0x1cb1   :  { %11786 = vmatprep.mubr.msk.f32.mxu0 %vm1417_vm8, %v13623_v19  ;;  %12188 = vmatpush3.bf16.msra.mxu0 %v12185_v62 }
0x1cb4   :  { %11787 = vmatmul.mubr.msk.f32.gmra.mrb[10].mxu0 %vm1417_vm8, %v13625_v28 }
0x1cb5   :  { %11789 = vmatprep.mubr.msk.f32.mxu0 %vm1417_vm8, %v13631_v1 }
0x1cb8   :  { %11790 = vmatmul.mubr.msk.f32.gmra.mrb[12].mxu0 %vm1417_vm8, %v13633_v36 }
0x1cb9   :  { %11792 = vmatprep.mubr.msk.f32.mxu0 %vm1417_vm8, %v13639_v58 }
0x1cbc   :  { %11793 = vmatmul.mubr.msk.f32.gmra.mrb[14].mxu0 %vm1417_vm8, %v13641_v9 }
0x1cbd   :  { %11795 = vmatprep.mubr.msk.f32.mxu0 %vm1417_vm8, %v13647_v37 }
0x1cc0   :  { %11796 = vmatmul.mubr.msk.f32.gmra.mrb[16].mxu0 %vm1417_vm8, %v13649_v7 }
0x1cc1   :  { %11798 = vmatprep.mubr.msk.f32.mxu0 %vm1417_vm8, %v13655_v52 }
0x1cc4   :  { %11799 = vmatmul.mubr.msk.f32.gmra.mrb[18].mxu0 %vm1417_vm8, %v13657_v61 }
0x1cc5   :  { %11801 = vmatprep.mubr.msk.f32.mxu0 %vm1417_vm8, %v13663_v51 }
0x1cc8   :  { %11802 = vmatmul.mubr.msk.f32.gmra.mrb[20].mxu0 %vm1417_vm8, %v13665_v38 }
0x1d6f   :  { %v11704_v21 = vpop.f32.mrb[250].mxu1  ;;  %v11718_v22 = vpop.f32.mrb[254].mxu0 }
0x1d70   :  { %v7466_v14 = vpop.f32.mrb[251].mxu1  ;;  %v7575_v47 = vpop.f32.mrb[255].mxu0 }
0x1d71   :  { %v7505_v19 = vpack.c.bf16 %v11704_v21, %v7466_v14  ;;  %v7614_v28 = vpack.c.bf16 %v11718_v22, %v7575_v47  ;;  %v13814_v22 = vld [vmem:[#allocation8 + $0x458] ss:$0 sm:$0xff] }
0x1d73   :  { %v11707_v1 = vpop.f32.mrb[252].mxu1  ;;  %v11721_v36 = vpop.f32.mrb[0].mxu0  ;;  %11728 = vmatprep.subr.bf16.mxu1 %v7614_v28 }
0x1d74   :  { %v7476_v58 = vpop.f32.mrb[253].mxu1  ;;  %v7585_v9 = vpop.f32.mrb[1].mxu0  ;;  %11729 = vmatpush3.bf16.msra.mxu1 %v7614_v28 }
0x1d75   :  { %v7506_v37 = vpack.c.bf16 %v11707_v1, %v7476_v58  ;;  %v7615_v7 = vpack.c.bf16 %v11721_v36, %v7585_v9 }
0x1d77   :  { %v11710_v52 = vpop.f32.mrb[254].mxu1  ;;  %v11724_v61 = vpop.f32.mrb[2].mxu0  ;;  %11730 = vmatprep.subr.bf16.mxu1 %v7615_v7 }
0x1d78   :  { %v7486_v51 = vpop.f32.mrb[255].mxu1  ;;  %v7595_v4 = vpop.f32.mrb[3].mxu0  ;;  %11731 = vmatpush3.bf16.msra.mxu1 %v7615_v7 }
0x1d79   :  { %v7507_v38 = vpack.c.bf16 %v11710_v52, %v7486_v51  ;;  %v7616_v12 = vpack.c.bf16 %v11724_v61, %v7595_v4 }
0x1d7b   :  { %v11713_v53 = vpop.f32.mrb[0].mxu1  ;;  %v11727_v30 = vpop.f32.mrb[4].mxu0  ;;  %11732 = vmatprep.subr.bf16.mxu1 %v7616_v12 }
0x1d7c   :  { %v7496_v25 = vpop.f32.mrb[1].mxu1  ;;  %v7605_v57 = vpop.f32.mrb[5].mxu0  ;;  %11733 = vmatpush3.bf16.msra.mxu1 %v7616_v12 }
0x1d7d   :  { %v7508_v32 = vpack.c.bf16 %v11713_v53, %v7496_v25  ;;  %v7617_v34 = vpack.c.bf16 %v11727_v30, %v7605_v57 }
0x1d7f   :  { %11734 = vmatprep.subr.bf16.mxu1 %v7617_v34  ;;  %v13767_v54 = vpop.f32.mrb[6].mxu0 }
0x1d80   :  { %11735 = vmatpush3.bf16.msra.mxu1 %v7617_v34  ;;  %v13769_v56 = vpop.f32.mrb[7].mxu0 }
0x1d81   :  { %11752 = vmatprep.subr.bf16.mxu1 %v7505_v19 }
0x1d83   :  { %11737 = vmatmul.mubr.msk.bf16.vlgmr.msra.gmra.mrb[4].mxu1 %vm243_vm4, %v12413_v18  ;;  %v13772_v26 = vpop.f32.mrb[8].mxu0 }
0x1d84   :  { %11753 = vmatpush3.bf16.msra.mxu1 %v7505_v19  ;;  %v13774_v27 = vpop.f32.mrb[9].mxu0  ;;  %11740 = vmatprep.mubr.msk.bf16.mxu1 %vm243_vm4, %v12414_v44 }
0x1d85   :  { %11754 = vmatprep.subr.bf16.mxu1 %v7506_v37 }
0x1d87   :  { %v13777_v3 = vpop.f32.mrb[10].mxu0 }
0x1d88   :  { %11755 = vmatpush3.bf16.msra.mxu1 %v7506_v37  ;;  %v13779_v16 = vpop.f32.mrb[11].mxu0 }
0x1d89   :  { %11756 = vmatprep.subr.bf16.mxu1 %v7507_v38 }
0x1d8b   :  { %11741 = vmatmul.mubr.msk.bf16.gmra.mrb[8].mxu1 %vm243_vm4, %v12415_v23  ;;  %v13782_v55 = vpop.f32.mrb[12].mxu0 }
0x1d8c   :  { %11757 = vmatpush3.bf16.msra.mxu1 %v7507_v38  ;;  %v13784_v24 = vpop.f32.mrb[13].mxu0  ;;  %11744 = vmatprep.mubr.msk.bf16.mxu1 %vm243_vm4, %v12416_v0 }
0x1d8d   :  { %11758 = vmatprep.subr.bf16.mxu1 %v7508_v32 }
0x1d8f   :  { %v13787_v8 = vpop.f32.mrb[14].mxu0 }
0x1d90   :  { %11759 = vmatpush3.bf16.msra.mxu1 %v7508_v32  ;;  %v13789_v29 = vpop.f32.mrb[15].mxu0 }
0x1d91   :  { %12190 = vmatprep.subr.bf16.mxu1 %v12189_v63 }
0x1d93   :  { %11745 = vmatmul.mubr.msk.bf16.gmra.mrb[12].mxu1 %vm243_vm4, %v12417_v33  ;;  %v13792_v11 = vpop.f32.mrb[16].mxu0 }
0x1d94   :  { %v13794_v42 = vpop.f32.mrb[17].mxu0  ;;  %11748 = vmatprep.mubr.msk.bf16.mxu1 %vm243_vm4, %v12418_v48 }
0x1d97   :  { %v13797_v31 = vpop.f32.mrb[18].mxu0 }
0x1d98   :  { %v13799_v10 = vpop.f32.mrb[19].mxu0 }
0x1d9b   :  { %11749 = vmatmul.mubr.msk.bf16.gmra.mrb[16].mxu1 %vm243_vm4, %v12419_v50  ;;  %v13802_v35 = vpop.f32.mrb[20].mxu0 }
0x1d9c   :  { %v13804_v15 = vpop.f32.mrb[21].mxu0  ;;  %11760 = vmatprep.mubr.msk.bf16.mxu1 %vm243_vm4, %v12420_v49 }
0x1da3   :  { %11761 = vmatmul.mubr.msk.bf16.vlgmr.msra.gmra.mrb[4].mxu1 %vm243_vm4, %v12421_v41 }
0x1da4   :  { %11764 = vmatprep.mubr.msk.bf16.mxu1 %vm243_vm4, %v12422_v20  ;;  %12192 = vmatpush3.bf16.msra.mxu1 %v12189_v63 }
0x1dab   :  { %11765 = vmatmul.mubr.msk.bf16.gmra.mrb[8].mxu1 %vm243_vm4, %v12423_v5 }
0x1dac   :  { %11768 = vmatprep.mubr.msk.bf16.mxu1 %vm243_vm4, %v12424_v6 }
0x1db3   :  { %11769 = vmatmul.mubr.msk.bf16.gmra.mrb[12].mxu1 %vm243_vm4, %v12425_v13 }
0x1db4   :  { %11772 = vmatprep.mubr.msk.bf16.mxu1 %vm243_vm4, %v12426_v17 }
0x1dbb   :  { %11773 = vmatmul.mubr.msk.bf16.gmra.mrb[16].mxu1 %vm243_vm4, %v12427_v59 }
0x1e76   :  { %v11762_v21 = vpop.f32.mrb[4].mxu1 }
0x1e77   :  { %v7962_v14 = vadd.f32 %v11762_v21, %v13774_v27  ;;  %v7749_v47 = vpop.f32.mrb[5].mxu1 }
0x1e78   :  { %v7960_v19 = vadd.f32 %v13769_v56, %v7749_v47  ;;  %v11763_v28 = vpop.f32.mrb[6].mxu1  ;;  %v8234_v47 = vld [vmem:[#allocation8 + $0x4c8] sm:$0xff] }
0x1e79   :  { %v7963_v1 = vadd.f32 %v13772_v26, %v11763_v28  ;;  %v7752_v36 = vpop.f32.mrb[7].mxu1  ;;  %v7982_v37 = vadd.f32 %v13814_v22, %v7962_v14  ;;  %v8449_v28 = vld [vmem:[#allocation8 + $0x4d8] sm:$0xff] }
0x1e7a   :  { %v7980_v58 = vadd.f32 %v13814_v22, %v7960_v19  ;;  %v7961_v9 = vadd.f32 %v13767_v54, %v7752_v36 }
0x1e7b   :  { %v7983_v61 = vadd.f32 %v13814_v22, %v7963_v1  ;;  %v7998_v38 = vmax.f32 %v7982_v37, 0.0  ;;  %v8450_v1 = vld [vmem:[#allocation8 + $0x4e0] sm:$0xff] }
0x1e7c   :  { %v7996_v7 = vmax.f32 %v7980_v58, 0.0  ;;  %v7981_v52 = vadd.f32 %v13814_v22, %v7961_v9  ;;  %v12197_v36 = vpack.c.bf16 %v8450_v1, %v8449_v28 }
0x1e7d   :  { %v7999_v34 = vmax.f32 %v7983_v61, 0.0 }
0x1e7e   :  { %v7997_v51 = vmax.f32 %v7981_v52, 0.0  ;;  %v11766_v4 = vpop.f32.mrb[8].mxu1  ;;  %11812 = vmatprep.mubr.msk.f32.mxu0 %vm1675_vm9, %v7996_v7  ;;  %12198 = vmatprep.subr.bf16.mxu0 %v12197_v36 }
0x1e7f   :  { %v7966_v12 = vadd.f32 %v11766_v4, %v13784_v24  ;;  %v7765_v53 = vpop.f32.mrb[9].mxu1 }
0x1e80   :  { %v7964_v30 = vadd.f32 %v13779_v16, %v7765_v53  ;;  %v11767_v25 = vpop.f32.mrb[10].mxu1  ;;  %11813 = vmatmul.mubr.msk.f32.vlgmr.msra.gmra.mrb[22].mxu0 %vm1675_vm9, %v7997_v51 }
0x1e81   :  { %v7967_v57 = vadd.f32 %v13782_v55, %v11767_v25  ;;  %v7768_v32 = vpop.f32.mrb[11].mxu1  ;;  %11815 = vmatprep.mubr.msk.f32.mxu0 %vm1675_vm9, %v7998_v38  ;;  %v7986_v18 = vadd.f32 %v13814_v22, %v7966_v12  ;;  %12200 = vmatpush3.bf16.msra.mxu0 %v12197_v36 }
0x1e82   :  { %v7984_v54 = vadd.f32 %v13814_v22, %v7964_v30  ;;  %v7965_v56 = vadd.f32 %v13777_v3, %v7768_v32 }
0x1e83   :  { %v7987_v44 = vadd.f32 %v13814_v22, %v7967_v57  ;;  %v8002_v55 = vmax.f32 %v7986_v18, 0.0 }
0x1e84   :  { %v8000_v26 = vmax.f32 %v7984_v54, 0.0  ;;  %v7985_v27 = vadd.f32 %v13814_v22, %v7965_v56  ;;  %11816 = vmatmul.mubr.msk.f32.gmra.mrb[24].mxu0 %vm1675_vm9, %v7999_v34 }
0x1e85   :  { %v8003_v49 = vmax.f32 %v7987_v44, 0.0 }
0x1e86   :  { %v8001_v16 = vmax.f32 %v7985_v27, 0.0  ;;  %v11770_v23 = vpop.f32.mrb[12].mxu1  ;;  %11818 = vmatprep.mubr.msk.f32.mxu0 %vm1675_vm9, %v8000_v26 }
0x1e87   :  { %v7970_v24 = vadd.f32 %v11770_v23, %v13794_v42  ;;  %v7781_v0 = vpop.f32.mrb[13].mxu1 }
0x1e88   :  { %v7968_v33 = vadd.f32 %v13789_v29, %v7781_v0  ;;  %v11771_v3 = vpop.f32.mrb[14].mxu1  ;;  %11819 = vmatmul.mubr.msk.f32.gmra.mrb[26].mxu0 %vm1675_vm9, %v8001_v16 }
0x1e89   :  { %v7971_v48 = vadd.f32 %v13792_v11, %v11771_v3  ;;  %v7784_v50 = vpop.f32.mrb[15].mxu1  ;;  %11821 = vmatprep.mubr.msk.f32.mxu0 %vm1675_vm9, %v8002_v55  ;;  %v7990_v5 = vadd.f32 %v13814_v22, %v7970_v24 }
0x1e8a   :  { %v7988_v41 = vadd.f32 %v13814_v22, %v7968_v33  ;;  %v7969_v20 = vadd.f32 %v13787_v8, %v7784_v50 }
0x1e8b   :  { %v7991_v29 = vadd.f32 %v13814_v22, %v7971_v48  ;;  %v8006_v11 = vmax.f32 %v7990_v5, 0.0 }
0x1e8c   :  { %v8004_v6 = vmax.f32 %v7988_v41, 0.0  ;;  %v7989_v42 = vadd.f32 %v13814_v22, %v7969_v20  ;;  %11822 = vmatmul.mubr.msk.f32.gmra.mrb[28].mxu0 %vm1675_vm9, %v8003_v49 }
0x1e8d   :  { %v8007_v40 = vmax.f32 %v7991_v29, 0.0 }
0x1e8e   :  { %v8005_v13 = vmax.f32 %v7989_v42, 0.0  ;;  %v11774_v17 = vpop.f32.mrb[16].mxu1  ;;  %11824 = vmatprep.mubr.msk.f32.mxu0 %vm1675_vm9, %v8004_v6 }
0x1e8f   :  { %v7974_v59 = vadd.f32 %v11774_v17, %v13804_v15  ;;  %v7797_v2 = vpop.f32.mrb[17].mxu1 }
0x1e90   :  { %v7972_v45 = vadd.f32 %v13799_v10, %v7797_v2  ;;  %v11775_v8 = vpop.f32.mrb[18].mxu1  ;;  %11825 = vmatmul.mubr.msk.f32.gmra.mrb[30].mxu0 %vm1675_vm9, %v8005_v13 }
0x1e91   :  { %v7975_v39 = vadd.f32 %v13802_v35, %v11775_v8  ;;  %v7800_v43 = vpop.f32.mrb[19].mxu1  ;;  %11827 = vmatprep.mubr.msk.f32.mxu0 %vm1675_vm9, %v8006_v11  ;;  %v7994_v46 = vadd.f32 %v13814_v22, %v7974_v59 }
0x1e92   :  { %v7992_v62 = vadd.f32 %v13814_v22, %v7972_v45  ;;  %v7973_v60 = vadd.f32 %v13797_v31, %v7800_v43  ;;  %v8233_v31 = vld [vmem:[#allocation8 + $0x4c0] sm:$0xff] }
0x1e93   :  { %v7995_v10 = vadd.f32 %v13814_v22, %v7975_v39  ;;  %v8010_v35 = vmax.f32 %v7994_v46, 0.0  ;;  %v12193_v19 = vpack.c.bf16 %v8234_v47, %v8233_v31 }
0x1e94   :  { %v8008_v63 = vmax.f32 %v7992_v62, 0.0  ;;  %v7993_v15 = vadd.f32 %v13814_v22, %v7973_v60  ;;  %11828 = vmatmul.mubr.msk.f32.gmra.mrb[32].mxu0 %vm1675_vm9, %v8007_v40  ;;  %v9734_v22 = vld [vmem:[#allocation8 + $0x480] ss:$0 sm:$0xff]  ;;  %v8451_v62 = vld [vmem:[#allocation8 + $0x4e8] sm:$0xff]  ;;  %v8452_v60 = vld [vmem:[#allocation8 + $0x4f0] sm:$0xff] }
0x1e95   :  { %v8011_v14 = vmax.f32 %v7995_v10, 0.0  ;;  %12194 = vmatprep.subr.bf16.mxu1 %v12193_v19  ;;  %v12201_v46 = vpack.c.bf16 %v8452_v60, %v8451_v62  ;;  %v9751_v10 = vld [vmem:[#allocation8 + $0x4a8] ss:$0 sm:$0xff] }
0x1e96   :  { %v8009_v21 = vmax.f32 %v7993_v15, 0.0  ;;  %11830 = vmatprep.mubr.msk.f32.mxu0 %vm1675_vm9, %v8008_v63  ;;  %12196 = vmatpush3.bf16.msra.mxu1 %v12193_v19  ;;  %v8650_v63 = vld [vmem:[#allocation8 + $0x598] sm:$0xff]  ;;  %v8651_v15 = vld [vmem:[#allocation8 + $0x5a0] sm:$0xf]  ;;  %v8860_v62 = vld [vmem:[#allocation8 + $0x5c8] sm:$0xff] }
0x1e97   :  { %12202 = vmatprep.subr.bf16.mxu0 %v12201_v46  ;;  %8676 = vxpose.xlu1.b32.start [1/2] (short) (narrow) %v8650_v63, 32 }
0x1e98   :  { %11831 = vmatmul.mubr.msk.f32.gmra.mrb[34].mxu0 %vm1675_vm9, %v8009_v21 }
0x1e99   :  { %11833 = vmatprep.mubr.msk.f32.mxu0 %vm1675_vm9, %v8010_v35  ;;  %12204 = vmatpush3.bf16.msra.mxu0 %v12201_v46 }
0x1e9b   :  { %8677 = vxpose.xlu1.b32.end [2/2] (short) (narrow) %v8651_v15, 32 }
0x1e9c   :  { %11834 = vmatmul.mubr.msk.f32.gmra.mrb[36].mxu0 %vm1675_vm9, %v8011_v14 }
0x1f53   :  { %v11814_v58 = vpop.f32.mrb[22].mxu0 }
0x1f54   :  { %v8141_v9 = vadd.f32 %v11814_v58, %v9734_v22  ;;  %v8135_v37 = vpop.f32.mrb[23].mxu0 }
0x1f55   :  { %v8136_v7 = vadd.f32 %v9734_v22, %v8135_v37 }
0x1f56   :  { %v8215_v51 = vmax.f32 %v8141_v9, 0.0 }
0x1f57   :  { %v8214_v52 = vmax.f32 %v8136_v7, 0.0  ;;  %v11817_v61 = vpop.f32.mrb[24].mxu0 }
0x1f58   :  { %v8151_v4 = vadd.f32 %v11817_v61, %v9734_v22  ;;  %v8145_v38 = vpop.f32.mrb[25].mxu0 }
0x1f59   :  { %v8146_v12 = vadd.f32 %v9734_v22, %v8145_v38  ;;  %11844 = vmatprep.mubr.msk.f32.mxu1 %vm1675_vm9, %v8214_v52 }
0x1f5a   :  { %11845 = vmatmul.mubr.msk.f32.vlgmr.msra.gmra.mrb[2].mxu1 %vm1675_vm9, %v8215_v51  ;;  %v8217_v25 = vmax.f32 %v8151_v4, 0.0 }
0x1f5b   :  { %v8216_v53 = vmax.f32 %v8146_v12, 0.0  ;;  %v11820_v30 = vpop.f32.mrb[26].mxu0 }
0x1f5c   :  { %v8161_v57 = vadd.f32 %v11820_v30, %v9734_v22  ;;  %v8155_v32 = vpop.f32.mrb[27].mxu0 }
0x1f5d   :  { %v8156_v34 = vadd.f32 %v9734_v22, %v8155_v32  ;;  %11847 = vmatprep.mubr.msk.f32.mxu1 %vm1675_vm9, %v8216_v53 }
0x1f5e   :  { %11848 = vmatmul.mubr.msk.f32.gmra.mrb[20].mxu1 %vm1675_vm9, %v8217_v25  ;;  %v8219_v18 = vmax.f32 %v8161_v57, 0.0 }
0x1f5f   :  { %v8218_v54 = vmax.f32 %v8156_v34, 0.0  ;;  %v11823_v56 = vpop.f32.mrb[28].mxu0 }
0x1f60   :  { %v8171_v26 = vadd.f32 %v11823_v56, %v9734_v22  ;;  %v8165_v27 = vpop.f32.mrb[29].mxu0 }
0x1f61   :  { %v8166_v44 = vadd.f32 %v9734_v22, %v8165_v27  ;;  %11850 = vmatprep.mubr.msk.f32.mxu1 %vm1675_vm9, %v8218_v54 }
0x1f62   :  { %11851 = vmatmul.mubr.msk.f32.gmra.mrb[22].mxu1 %vm1675_vm9, %v8219_v18  ;;  %v8221_v55 = vmax.f32 %v8171_v26, 0.0 }
0x1f63   :  { %v8220_v16 = vmax.f32 %v8166_v44, 0.0  ;;  %v11826_v23 = vpop.f32.mrb[30].mxu0 }
0x1f64   :  { %v8181_v24 = vadd.f32 %v11826_v23, %v9734_v22  ;;  %v8175_v0 = vpop.f32.mrb[31].mxu0 }
0x1f65   :  { %v8176_v33 = vadd.f32 %v9734_v22, %v8175_v0  ;;  %11853 = vmatprep.mubr.msk.f32.mxu1 %vm1675_vm9, %v8220_v16 }
0x1f66   :  { %11854 = vmatmul.mubr.msk.f32.gmra.mrb[24].mxu1 %vm1675_vm9, %v8221_v55  ;;  %v8223_v50 = vmax.f32 %v8181_v24, 0.0 }
0x1f67   :  { %v8222_v3 = vmax.f32 %v8176_v33, 0.0  ;;  %v11829_v48 = vpop.f32.mrb[32].mxu0 }
0x1f68   :  { %v8191_v49 = vadd.f32 %v11829_v48, %v9734_v22  ;;  %v8185_v41 = vpop.f32.mrb[33].mxu0 }
0x1f69   :  { %v8186_v20 = vadd.f32 %v9734_v22, %v8185_v41  ;;  %11856 = vmatprep.mubr.msk.f32.mxu1 %vm1675_vm9, %v8222_v3 }
0x1f6a   :  { %11857 = vmatmul.mubr.msk.f32.gmra.mrb[26].mxu1 %vm1675_vm9, %v8223_v50  ;;  %v8225_v42 = vmax.f32 %v8191_v49, 0.0 }
0x1f6b   :  { %v8224_v5 = vmax.f32 %v8186_v20, 0.0  ;;  %v11832_v6 = vpop.f32.mrb[34].mxu0 }
0x1f6c   :  { %v8201_v29 = vadd.f32 %v11832_v6, %v9734_v22  ;;  %v8195_v13 = vpop.f32.mrb[35].mxu0 }
0x1f6d   :  { %v8196_v17 = vadd.f32 %v9734_v22, %v8195_v13  ;;  %11859 = vmatprep.mubr.msk.f32.mxu1 %vm1675_vm9, %v8224_v5  ;;  %v8692_v13 = vpop.trf.xlu1 }
0x1f6e   :  { %11860 = vmatmul.mubr.msk.f32.gmra.mrb[28].mxu1 %vm1675_vm9, %v8225_v42  ;;  %v8227_v2 = vmax.f32 %v8201_v29, 0.0 }
0x1f6f   :  { %v8226_v11 = vmax.f32 %v8196_v17, 0.0  ;;  %v11835_v59 = vpop.f32.mrb[36].mxu0  ;;  %v13897_v17 = vld [vmem:[#allocation8 + $0x5f8] sm:$0xff] }
0x1f70   :  { %v8211_v45 = vadd.f32 %v11835_v59, %v9734_v22  ;;  %v8205_v8 = vpop.f32.mrb[37].mxu0  ;;  %v12555_v59 = vmov 0  }
0x1f71   :  { %v8206_v39 = vadd.f32 %v9734_v22, %v8205_v8  ;;  %11862 = vmatprep.mubr.msk.f32.mxu1 %vm1675_vm9, %v8226_v11  ;;  %v13899_v11 = vld [vmem:[#allocation8 + $0x600] sm:$0xff]  ;;  %12355 = vset.pattern.permute.xlu1 %v12555_v59  ;;  %v8857_v8 = vld [vmem:[#allocation8 + $0x5b0] sm:$0xff] }
0x1f72   :  { %11863 = vmatmul.mubr.msk.f32.gmra.mrb[30].mxu1 %vm1675_vm9, %v8227_v2  ;;  %v8229_v40 = vmax.f32 %v8211_v45, 0.0  ;;  %12356 = vset.pattern.permute.xlu0 %v12555_v59  ;;  %v13903_v2 = vld [vmem:[#allocation8 + $0x608] sm:$0xff]  ;;  %v13906_v45 = vld [vmem:[#allocation8 + $0x610] sm:$0xff] }
0x1f73   :  { %v8228_v43 = vmax.f32 %v8206_v39, 0.0  ;;  %8658 = vperm.xlu1 %12355, %v13897_v17   ;;  %8663 = vperm.xlu0 %12356, %v13899_v11   ;;  %v8858_v39 = vld [vmem:[#allocation8 + $0x5b8] sm:$0xff] }
0x1f75   :  { %11865 = vmatprep.mubr.msk.f32.mxu1 %vm1675_vm9, %v8228_v43  ;;  %v8859_v43 = vld [vmem:[#allocation8 + $0x5c0] sm:$0xff] }
0x1f76   :  { %11866 = vmatmul.mubr.msk.f32.gmra.mrb[32].mxu1 %vm1675_vm9, %v8229_v40  ;;  %v9768_v40 = vld [vmem:[#allocation8 + $0x4d0] ss:$0 sm:$0xff] }
0x1f77   :  { %11932 = vmatprep.mubr.msk.f32.mxu1 %vm1417_vm8, %v8692_v13  ;;  %8668 = vperm.xlu0 %12356, %v13903_v2  }
0x1f7b   :  { %8673 = vperm.xlu0 %12356, %v13906_v45  }
0x1f9c   :  { %8877 = vxpose.xlu1.b32.start [1/4] (short) (narrow) %v8857_v8, 32 }
0x1fa0   :  { %8878 = vxpose.xlu1.b32.cont [2/4] (short) (narrow) %v8858_v39, 32 }
0x1fa4   :  { %8879 = vxpose.xlu1.b32.cont [3/4] (short) (narrow) %v8859_v43, 32 }
0x1fa8   :  { %8880 = vxpose.xlu1.b32.end [4/4] (short) (narrow) %v8860_v62, 32 }
0x202d   :  { %v11846_v21 = vpop.f32.mrb[2].mxu1 }
0x202e   :  { %v8359_v35 = vadd.f32 %v11846_v21, %v9751_v10  ;;  %v8353_v14 = vpop.f32.mrb[3].mxu1 }
0x202f   :  { %v8354_v31 = vadd.f32 %v9751_v10, %v8353_v14 }
0x2030   :  { %v8433_v28 = vmax.f32 %v8359_v35, 0.0 }
0x2031   :  { %v8432_v47 = vmax.f32 %v8354_v31, 0.0  ;;  %v11849_v19 = vpop.f32.mrb[20].mxu1 }
0x2032   :  { %v8369_v1 = vadd.f32 %v11849_v19, %v9751_v10  ;;  %v8363_v36 = vpop.f32.mrb[21].mxu1 }
0x2033   :  { %v8364_v22 = vadd.f32 %v9751_v10, %v8363_v36  ;;  %11876 = vmatprep.mubr.msk.f32.mxu0 %vm1675_vm9, %v8432_v47 }
0x2034   :  { %11877 = vmatmul.mubr.msk.f32.vlgmr.msra.gmra.mrb[40].mxu0 %vm1675_vm9, %v8433_v28  ;;  %v8435_v37 = vmax.f32 %v8369_v1, 0.0 }
0x2035   :  { %v8434_v58 = vmax.f32 %v8364_v22, 0.0  ;;  %v11852_v9 = vpop.f32.mrb[22].mxu1 }
0x2036   :  { %v8379_v7 = vadd.f32 %v11852_v9, %v9751_v10  ;;  %v8373_v52 = vpop.f32.mrb[23].mxu1 }
0x2037   :  { %v8374_v61 = vadd.f32 %v9751_v10, %v8373_v52  ;;  %11879 = vmatprep.mubr.msk.f32.mxu0 %vm1675_vm9, %v8434_v58 }
0x2038   :  { %11880 = vmatmul.mubr.msk.f32.gmra.mrb[42].mxu0 %vm1675_vm9, %v8435_v37  ;;  %v8437_v38 = vmax.f32 %v8379_v7, 0.0 }
0x2039   :  { %v8436_v51 = vmax.f32 %v8374_v61, 0.0  ;;  %v11855_v4 = vpop.f32.mrb[24].mxu1 }
0x203a   :  { %v8389_v12 = vadd.f32 %v11855_v4, %v9751_v10  ;;  %v8383_v53 = vpop.f32.mrb[25].mxu1 }
0x203b   :  { %v8384_v30 = vadd.f32 %v9751_v10, %v8383_v53  ;;  %11882 = vmatprep.mubr.msk.f32.mxu0 %vm1675_vm9, %v8436_v51 }
0x203c   :  { %11883 = vmatmul.mubr.msk.f32.gmra.mrb[44].mxu0 %vm1675_vm9, %v8437_v38  ;;  %v8439_v32 = vmax.f32 %v8389_v12, 0.0 }
0x203d   :  { %v8438_v25 = vmax.f32 %v8384_v30, 0.0  ;;  %v11858_v57 = vpop.f32.mrb[26].mxu1 }
0x203e   :  { %v8399_v34 = vadd.f32 %v11858_v57, %v9751_v10  ;;  %v8393_v54 = vpop.f32.mrb[27].mxu1 }
0x203f   :  { %v8394_v56 = vadd.f32 %v9751_v10, %v8393_v54  ;;  %11885 = vmatprep.mubr.msk.f32.mxu0 %vm1675_vm9, %v8438_v25 }
0x2040   :  { %11886 = vmatmul.mubr.msk.f32.gmra.mrb[46].mxu0 %vm1675_vm9, %v8439_v32  ;;  %v8441_v27 = vmax.f32 %v8399_v34, 0.0 }
0x2041   :  { %v8440_v18 = vmax.f32 %v8394_v56, 0.0  ;;  %v11861_v26 = vpop.f32.mrb[28].mxu1 }
0x2042   :  { %v8409_v44 = vadd.f32 %v11861_v26, %v9751_v10  ;;  %v8403_v16 = vpop.f32.mrb[29].mxu1 }
0x2043   :  { %v8404_v23 = vadd.f32 %v9751_v10, %v8403_v16  ;;  %11888 = vmatprep.mubr.msk.f32.mxu0 %vm1675_vm9, %v8440_v18 }
0x2044   :  { %11889 = vmatmul.mubr.msk.f32.gmra.mrb[48].mxu0 %vm1675_vm9, %v8441_v27  ;;  %v8443_v0 = vmax.f32 %v8409_v44, 0.0 }
0x2045   :  { %v8442_v55 = vmax.f32 %v8404_v23, 0.0  ;;  %v11864_v24 = vpop.f32.mrb[30].mxu1 }
0x2046   :  { %v8419_v33 = vadd.f32 %v11864_v24, %v9751_v10  ;;  %v8413_v3 = vpop.f32.mrb[31].mxu1 }
0x2047   :  { %v8414_v48 = vadd.f32 %v9751_v10, %v8413_v3  ;;  %11891 = vmatprep.mubr.msk.f32.mxu0 %vm1675_vm9, %v8442_v55 }
0x2048   :  { %11892 = vmatmul.mubr.msk.f32.gmra.mrb[50].mxu0 %vm1675_vm9, %v8443_v0  ;;  %v8445_v41 = vmax.f32 %v8419_v33, 0.0  ;;  %v8693_v0 = vpop.trf.xlu1 }
0x2049   :  { %v8444_v50 = vmax.f32 %v8414_v48, 0.0  ;;  %v11867_v49 = vpop.f32.mrb[32].mxu1 }
0x204a   :  { %v8429_v20 = vadd.f32 %v11867_v49, %v9751_v10  ;;  %v8423_v5 = vpop.f32.mrb[33].mxu1  ;;  %v12556_v49 = vmov 1  }
0x204b   :  { %v8424_v6 = vadd.f32 %v9751_v10, %v8423_v5  ;;  %11894 = vmatprep.mubr.msk.f32.mxu0 %vm1675_vm9, %v8444_v50  ;;  %12357 = vset.pattern.permute.xlu0 %v12556_v49  ;;  %v9012_v5 = vld [vmem:[#allocation8 + $0x5e8] sm:$0xff] }
0x204c   :  { %11895 = vmatmul.mubr.msk.f32.gmra.mrb[52].mxu0 %vm1675_vm9, %v8445_v41  ;;  %v8447_v29 = vmax.f32 %v8429_v20, 0.0  ;;  %v8694_v33 = vpop.trf.xlu1  ;;  %8862 = vperm.xlu0 %12357, %v13897_v17   ;;  %v9010_v41 = vld [vmem:[#allocation8 + $0x5d8] sm:$0xff]  ;;  %v9011_v20 = vld [vmem:[#allocation8 + $0x5e0] sm:$0xff] }
0x204d   :  { %v8446_v42 = vmax.f32 %v8424_v6, 0.0  ;;  %v9013_v6 = vld [vmem:[#allocation8 + $0x5f0] sm:$0xff] }
0x204f   :  { %11897 = vmatprep.mubr.msk.f32.mxu0 %vm1675_vm9, %v8446_v42  ;;  %v8664_v42 = vpop.permute.xlu0 %8663 }
0x2050   :  { %11898 = vmatmul.mubr.msk.f32.gmra.mrb[54].mxu0 %vm1675_vm9, %v8447_v29  ;;  %v8695_v3 = vpop.trf.xlu1  ;;  %8866 = vperm.xlu0 %12357, %v13899_v11  }
0x2053   :  { %v8669_v29 = vpop.permute.xlu0 %8668 }
0x2054   :  { %v8659_v48 = vpop.permute.xlu1 %8658  ;;  %8870 = vperm.xlu0 %12357, %v13903_v2  }
0x2057   :  { %v8674_v11 = vpop.permute.xlu0 %8673 }
0x2058   :  { %v8893_v50 = vpop.trf.xlu1  ;;  %8874 = vperm.xlu0 %12357, %v13906_v45  }
0x2059   :  { %11946 = vmatprep.mubr.msk.f32.mxu0 %vm1675_vm9, %v8893_v50 }
0x205c   :  { %v8894_v62 = vpop.trf.xlu1 }
0x2076   :  { %9020 = vxpose.xlu0.b32.start [1/4] (short) (narrow) %v9010_v41, 8 }
0x207a   :  { %9021 = vxpose.xlu0.b32.cont [2/4] (short) (narrow) %v9011_v20, 8 }
0x207e   :  { %9022 = vxpose.xlu0.b32.cont [3/4] (short) (narrow) %v9012_v5, 8 }
0x2082   :  { %9023 = vxpose.xlu0.b32.end [4/4] (short) (narrow) %v9013_v6, 8 }
0x2107   :  { %v11878_v60 = vpop.f32.mrb[40].mxu0 }
0x2108   :  { %v8577_v46 = vadd.f32 %v11878_v60, %v9768_v40  ;;  %v8571_v63 = vpop.f32.mrb[41].mxu0 }
0x2109   :  { %v8572_v15 = vadd.f32 %v9768_v40, %v8571_v63 }
0x210b   :  { %v12205_v21 = vpack.c.bf16 %v8577_v46, %v8572_v15  ;;  %v11881_v35 = vpop.f32.mrb[42].mxu0 }
0x210c   :  { %v8587_v14 = vadd.f32 %v11881_v35, %v9768_v40  ;;  %v8581_v31 = vpop.f32.mrb[43].mxu0 }
0x210d   :  { %v8582_v47 = vadd.f32 %v9768_v40, %v8581_v31  ;;  %12207 = vmatprep.subr.msk.bf16.mxu1 %vm13911_vm10, %v12205_v21  ;;  %v12559_v31 = vmov 0.0  }
0x210e   :  { %12210 = vmatpush3.bf16.xpose.msk.msra.mxu1 %vm13911_vm10, %v12205_v21  ;;  %v8895_v21 = vpop.trf.xlu1 }
0x210f   :  { %v12211_v19 = vpack.c.bf16 %v8587_v14, %v8582_v47  ;;  %v11884_v28 = vpop.f32.mrb[44].mxu0  ;;  %v12557_v14 = vmov 0.0|0.0   ;;  %v9014_v47 = vld [vmem:[#allocation8 + $0x5f8] sm:$0x1] }
0x2110   :  { %v8597_v1 = vadd.f32 %v11884_v28, %v9768_v40  ;;  %v8591_v36 = vpop.f32.mrb[45].mxu0  ;;  %v8863_v28 = vpop.permute.xlu0 %8862 }
0x2111   :  { %v8592_v22 = vadd.f32 %v9768_v40, %v8591_v36  ;;  %12213 = vmatprep.subr.msk.bf16.mxu1 %vm13911_vm10, %v12211_v19 }
0x2112   :  { %v8896_v35 = vpop.trf.xlu1 }
0x2113   :  { %v12217_v58 = vpack.c.bf16 %v8597_v1, %v8592_v22  ;;  %v11887_v9 = vpop.f32.mrb[46].mxu0 }
0x2114   :  { %v8607_v37 = vadd.f32 %v11887_v9, %v9768_v40  ;;  %v8601_v7 = vpop.f32.mrb[47].mxu0  ;;  %v8867_v1 = vpop.permute.xlu0 %8866 }
0x2115   :  { %v8602_v52 = vadd.f32 %v9768_v40, %v8601_v7 }
0x2116   :  { %12216 = vmatpush3.bf16.xpose.msk.msra.mxu1 %vm13911_vm10, %v12211_v19  ;;  %v12560_v19 = vmov 2  }
0x2117   :  { %v12223_v61 = vpack.c.bf16 %v8607_v37, %v8602_v52  ;;  %v11890_v51 = vpop.f32.mrb[48].mxu0  ;;  %12219 = vmatprep.subr.msk.bf16.mxu1 %vm13911_vm10, %v12217_v58  ;;  %12358 = vset.pattern.permute.xlu1 %v12560_v19 }
0x2118   :  { %v8617_v4 = vadd.f32 %v11890_v51, %v9768_v40  ;;  %v8611_v38 = vpop.f32.mrb[49].mxu0  ;;  %12359 = vset.pattern.permute.xlu0 %v12560_v19  ;;  %9017 = vperm.xlu1 %12358, %v9014_v47   ;;  %v8871_v36 = vpop.permute.xlu0 %8870 }
0x2119   :  { %v8612_v12 = vadd.f32 %v9768_v40, %v8611_v38 }
0x211b   :  { %v12229_v53 = vpack.c.bf16 %v8617_v4, %v8612_v12  ;;  %v11893_v30 = vpop.f32.mrb[50].mxu0 }
0x211c   :  { %v8627_v25 = vadd.f32 %v11893_v30, %v9768_v40  ;;  %v8621_v57 = vpop.f32.mrb[51].mxu0  ;;  %v8875_v52 = vpop.permute.xlu0 %8874 }
0x211d   :  { %v8622_v32 = vadd.f32 %v9768_v40, %v8621_v57 }
0x211e   :  { %12222 = vmatpush3.bf16.xpose.msk.msra.mxu1 %vm13911_vm10, %v12217_v58 }
0x211f   :  { %v12235_v34 = vpack.c.bf16 %v8627_v25, %v8622_v32  ;;  %v11896_v54 = vpop.f32.mrb[52].mxu0  ;;  %12225 = vmatprep.subr.msk.bf16.mxu1 %vm13911_vm10, %v12223_v61 }
0x2120   :  { %v8637_v56 = vadd.f32 %v11896_v54, %v9768_v40  ;;  %v8631_v18 = vpop.f32.mrb[53].mxu0  ;;  %v9036_v32 = vpop.trf.xlu0 }
0x2121   :  { %v8632_v26 = vadd.f32 %v9768_v40, %v8631_v18 }
0x2123   :  { %v12241_v27 = vpack.c.bf16 %v8637_v56, %v8632_v26  ;;  %v11899_v44 = vpop.f32.mrb[54].mxu0 }
0x2124   :  { %v8647_v16 = vadd.f32 %v11899_v44, %v9768_v40  ;;  %v8641_v23 = vpop.f32.mrb[55].mxu0 }
0x2125   :  { %v8642_v55 = vadd.f32 %v9768_v40, %v8641_v23 }
0x2126   :  { %12228 = vmatpush3.bf16.xpose.msk.msra.mxu1 %vm13911_vm10, %v12223_v61 }
0x2127   :  { %v12247_v24 = vpack.c.bf16 %v8647_v16, %v8642_v55  ;;  %12231 = vmatprep.subr.msk.bf16.mxu1 %vm13911_vm10, %v12229_v53 }
0x212e   :  { %12234 = vmatpush3.bf16.xpose.msk.msra.mxu1 %vm13911_vm10, %v12229_v53 }
0x212f   :  { %12237 = vmatprep.subr.msk.bf16.mxu1 %vm13911_vm10, %v12235_v34 }
0x2136   :  { %12240 = vmatpush3.bf16.xpose.msk.msra.mxu1 %vm13911_vm10, %v12235_v34 }
0x2137   :  { %12243 = vmatprep.subr.msk.bf16.mxu1 %vm13911_vm10, %v12241_v27 }
0x213e   :  { %12246 = vmatpush3.bf16.xpose.msk.msra.mxu1 %vm13911_vm10, %v12241_v27 }
0x213f   :  { %12249 = vmatprep.subr.msk.bf16.mxu1 %vm13911_vm10, %v12247_v24 }
0x2146   :  { %12252 = vmatpush3.bf16.xpose.msk.msra.mxu1 %vm13911_vm10, %v12247_v24 }
0x214d   :  { %11933 = vmatmul.mubr.msk.f32.vlgmr.msra.gmra.mrb[34].mxu1 %vm1417_vm8, %v8693_v0 }
0x214e   :  { %11935 = vmatprep.mubr.msk.f32.mxu1 %vm1417_vm8, %v8694_v33 }
0x2151   :  { %11936 = vmatmul.mubr.msk.f32.gmra.mrb[36].mxu1 %vm1417_vm8, %v8695_v3 }
0x2197   :  { %v9018_v34 = vpop.permute.xlu1 %9017 }
0x2220   :  { %v11934_v13 = vpop.f32.mrb[34].mxu1 }
0x2221   :  { %v8840_v59 = vadd.f32 %v11934_v13, %v8664_v42  ;;  %v8834_v8 = vpop.f32.mrb[35].mxu1 }
0x2222   :  { %v8835_v17 = vadd.f32 %v8834_v8, %v8659_v48 }
0x2223   :  { %v8854_v39 = vmax.f32 %v8840_v59, 0.0 }
0x2224   :  { %v8853_v43 = vmax.f32 %v8835_v17, 0.0  ;;  %v11937_v2 = vpop.f32.mrb[36].mxu1 }
0x2225   :  { %v8850_v40 = vadd.f32 %v11937_v2, %v8674_v11  ;;  %v8844_v45 = vpop.f32.mrb[37].mxu1 }
0x2226   :  { %v12253_v60 = vpack.c.bf16 %v8854_v39, %v8853_v43  ;;  %v8845_v46 = vadd.f32 %v8844_v45, %v8669_v29 }
0x2227   :  { %v8856_v63 = vmax.f32 %v8850_v40, 0.0 }
0x2228   :  { %v8855_v15 = vmax.f32 %v8845_v46, 0.0  ;;  %12254 = vmatprep.subr.bf16.mxu0 %v12253_v60 }
0x2229   :  { %12256 = vmatpush3.bf16.msra.mxu0 %v12253_v60 }
0x222a   :  { %v12257_v10 = vpack.c.bf16 %v8856_v63, %v8855_v15 }
0x222c   :  { %12258 = vmatprep.subr.bf16.mxu0 %v12257_v10 }
0x222d   :  { %12260 = vmatpush3.bf16.msra.mxu0 %v12257_v10 }
0x222e   :  { %12261 = vmatprep.subr.bf16.mxu0 %v12557_v14 }
0x2230   :  { %11947 = vmatmul.mubr.msk.f32.vlgmr.msra.gmra.mrb[38].mxu0 %vm1675_vm9, %v8894_v62 }
0x2231   :  { %11949 = vmatprep.mubr.msk.f32.mxu0 %vm1675_vm9, %v8895_v21 }
0x2234   :  { %11950 = vmatmul.mubr.msk.f32.gmra.mrb[56].mxu0 %vm1675_vm9, %v8896_v35 }
0x2235   :  { %11960 = vmatprep.mubr.msk.f32.mxu0 %vm12558_vm11, %v12559_v31 }
0x2303   :  { %v11948_v22 = vpop.f32.mrb[38].mxu0 }
0x2304   :  { %v8993_v58 = vadd.f32 %v11948_v22, %v8867_v1  ;;  %v8987_v9 = vpop.f32.mrb[39].mxu0 }
0x2305   :  { %v8988_v37 = vadd.f32 %v8987_v9, %v8863_v28 }
0x2306   :  { %v9007_v7 = vmax.f32 %v8993_v58, 0.0 }
0x2307   :  { %v9006_v61 = vmax.f32 %v8988_v37, 0.0  ;;  %v11951_v51 = vpop.f32.mrb[56].mxu0 }
0x2308   :  { %v9003_v4 = vadd.f32 %v11951_v51, %v8875_v52  ;;  %v8997_v38 = vpop.f32.mrb[57].mxu0 }
0x2309   :  { %v12262_v12 = vpack.c.bf16 %v9007_v7, %v9006_v61  ;;  %v8998_v53 = vadd.f32 %v8997_v38, %v8871_v36 }
0x230a   :  { %v9009_v30 = vmax.f32 %v9003_v4, 0.0 }
0x230b   :  { %v9008_v25 = vmax.f32 %v8998_v53, 0.0  ;;  %12263 = vmatpush3.bf16.msra.mxu0 %v12262_v12 }
0x230c   :  { %12264 = vmatprep.subr.bf16.mxu0 %v12557_v14 }
0x230d   :  { %v12265_v57 = vpack.c.bf16 %v9009_v30, %v9008_v25 }
0x230f   :  { %12266 = vmatpush3.bf16.msra.mxu0 %v12265_v57 }
0x2312   :  { %11961 = vmatmul.mubr.msk.f32.vlgmr.msra.gmra.mrb[58].mxu0 %vm1675_vm9, %v9036_v32 }
0x23e5   :  { %v9121_v54 = vpop.f32.mrb[58].mxu0 }
0x23e6   :  { %v9122_v56 = vadd.f32 %v9121_v54, %v9018_v34  ;;  %v11962_v18 = vpop.f32.mrb[59].mxu0 }
0x23e8   :  { %v9125_v26 = vand.u32 2147483647, %v9122_v56  ;;  %vm9131_vm12 = vcmp.ge.f32.partialorder %v9122_v56, 0.0 }
0x23ea   :  { %v9126_v27 = vsub.f32 0.0, %v9125_v26 }
0x23ec   :  { %v9127_v44 = vmul.f32 1.442695, %v9126_v27 }
0x23ee   :  { %12376 = vpow2.f32 %v9127_v44 }
0x23f8   :  { %v12377_v16 = vpop.eup %12376 }
0x23f9   :  { %v9129_v23 = vadd.f32 1.0, %v12377_v16 }
0x23fb   :  { %12378 = vrcp.f32 %v9129_v23 }
0x2405   :  { %v12379_v55 = vpop.eup %12378 }
0x2406   :  { %v9132_v24 = vmul.f32 %v12379_v55, %v12377_v16 }
0x2408   :  { %v9133_v0 = vsel %vm9131_vm12, %v12379_v55, %v9132_v24 }
0x2409   :  { %9134 = vst [vmem:[#allocation10] sm:$0x1] %v9133_v0 }
0x240a   :  { %12527 = shalt.err (!%p12524_p8)
}
0x240b   :  { %s12528_s16 = scalar_lea.hbm %s13975_s4, 16 }
0x240c   :  { %p12529_p9 = scmp.ne.s32.totalorder %s13975_s4, %s12528_s16  ;;  %p12532_p10 = scmp.lt.u32.totalorder %s12528_s16, %s13975_s4 }
0x240e   :  { %p12534_p11 = pnand %p12532_p10, %p12529_p9 }
0x2410   :  { %12537 = shalt.err (!%p12534_p11)
}
0x2411   :  { %9144 = dma.vmem_to_hbm [thread:$0]  %s9142_s27, 16, %s13975_s4, [#allocation4]  }
0x2412   :  { %12544 = dma.done.wait [#allocation4], 16  }
0x2413   :  { %12545 = vsyncadd [#allocation4], 4294967280 }
0x2414   :  { %9148 = vsyncpa [#allocation3], 1 }
0x2415   :  { %9149 = vsyncpa [#allocation6], 1 }
0x2416   :  { %9150 = vsyncpa [#allocation9], 1 }
0x2417   :  { %9151 = vsyncpa [#allocation4], 1 }

</bundles_post_ra>
